<compile_context>
chip_gen: v7x
topology: tpu7x:2x2x1
jax: 0.10.0
libtpu: 0.0.40
codegen_flags: <defaults>
</compile_context>

<pallas_src>
import functools

import jax
import jax.numpy as jnp
from jax.experimental import pallas as pl
from jax.experimental.pallas import tpu as pltpu

_LANE = 128


def _round_up(n, m):
    return ((n + m - 1) // m) * m


def _actor_mlp_kernel(x_ref,
                      w1_ref, b1_ref,
                      w2_ref, b2_ref,
                      w3_ref, b3_ref,
                      w4_ref, b4_ref,
                      w5_ref, b5_ref,
                      probs_ref):
    """Whole forward pass for one batch tile: 5 matmuls, ReLUs, softmax."""
    x = x_ref[...]

    h = jnp.dot(x, w1_ref[...], preferred_element_type=jnp.float32) + b1_ref[...]
    h = jnp.maximum(h, 0.0)

    h = jnp.dot(h, w2_ref[...], preferred_element_type=jnp.float32) + b2_ref[...]
    h = jnp.maximum(h, 0.0)

    h = jnp.dot(h, w3_ref[...], preferred_element_type=jnp.float32) + b3_ref[...]
    h = jnp.maximum(h, 0.0)

    h = jnp.dot(h, w4_ref[...], preferred_element_type=jnp.float32) + b4_ref[...]
    h = jnp.maximum(h, 0.0)

    # Padded output columns carry a -1e30 bias -> exp underflows to 0 ->
    # softmax over the 128 lanes equals softmax over the real n_cities lanes.
    logits = jnp.dot(h, w5_ref[...], preferred_element_type=jnp.float32) + b5_ref[...]

    # Softmax over the last dim (nn.Softmax() on a 2D input -> dim=1).
    m = jnp.max(logits, axis=-1, keepdims=True)
    e = jnp.exp(logits - m)
    denom = jnp.sum(e, axis=-1, keepdims=True)
    probs_ref[...] = (e * pl.reciprocal(denom, approx=True)).astype(probs_ref.dtype)


@functools.partial(jax.jit, static_argnames=("block_batch",))
def actor_forward(x, params, *, block_batch=512):
    """Runs the Actor MLP. x: (B, number_of_inputs). Returns probs (B, n_cities)."""
    (w1, b1), (w2, b2), (w3, b3), (w4, b4), (w5, b5) = params
    B, n_in = x.shape
    n_cities = w5.shape[1]

    # Lane-pad the input features and the output head to 128 lanes so loads
    # and the final store are unmasked (lane-dense).
    n_in_p = _round_up(n_in, _LANE)
    n_out_p = _round_up(n_cities, _LANE)

    x_p = jnp.pad(x.astype(jnp.float32), ((0, 0), (0, n_in_p - n_in)))
    w1_p = jnp.pad(w1, ((0, n_in_p - n_in), (0, 0)))          # zero rows: no-op
    w5_p = jnp.pad(w5, ((0, 0), (0, n_out_p - n_cities)))     # zero cols
    b5_p = jnp.pad(b5, ((0, 0), (0, n_out_p - n_cities)),
                   constant_values=-1e30)                     # -> prob 0

    # Pad the batch up to a tile multiple instead of asserting divisibility.
    bb = block_batch
    B_p = _round_up(max(B, 1), bb)
    if B_p != B:
        x_p = jnp.pad(x_p, ((0, B_p - B), (0, 0)))

    grid = (B_p // bb,)

    def x_map(i):
        return (i, 0)

    def full_map(i):
        return (0, 0)

    weight_inputs = (w1_p, b1, w2, b2, w3, b3, w4, b4, w5_p, b5_p)
    weight_specs = [pl.BlockSpec(w.shape, full_map) for w in weight_inputs]

    probs_padded = pl.pallas_call(
        _actor_mlp_kernel,
        out_shape=jax.ShapeDtypeStruct((B_p, n_out_p), jnp.float32),
        grid_spec=pltpu.PrefetchScalarGridSpec(
            num_scalar_prefetch=0,
            grid=grid,
            in_specs=[pl.BlockSpec((bb, n_in_p), x_map)] + weight_specs,
            out_specs=pl.BlockSpec((bb, n_out_p), x_map),
        ),
        compiler_params=pltpu.CompilerParams(
            dimension_semantics=("parallel",)),
    )(x_p, *weight_inputs)

    return probs_padded[:B, :n_cities]


def init_actor_params(key, number_of_inputs, number_of_cities):
    """Deterministic init mimicking PyTorch nn.Linear default (uniform +-1/sqrt(fan_in)).

    Weights are stored as (in_features, out_features); biases as (1, out_features).
    """
    hidden_layer = 64
    hidden_layer_2 = 32
    dims = [number_of_inputs, hidden_layer, hidden_layer_2,
            hidden_layer_2, hidden_layer_2, number_of_cities]
    params = []
    for fan_in, fan_out in zip(dims[:-1], dims[1:]):
        key, kw, kb = jax.random.split(key, 3)
        bound = 1.0 / jnp.sqrt(fan_in)
        w = jax.random.uniform(kw, (fan_in, fan_out), jnp.float32, -bound, bound)
        b = jax.random.uniform(kb, (1, fan_out), jnp.float32, -bound, bound)
        params.append((w, b))
    return params


def actor_forward_ref(x, params):
    """Pure-JAX reference for correctness checking."""
    h = x
    for i, (w, b) in enumerate(params):
        h = h @ w + b
        if i < len(params) - 1:
            h = jnp.maximum(h, 0.0)
    return jax.nn.softmax(h, axis=-1)


if __name__ == "__main__":
    number_of_inputs = 16    # e.g. number of cities in the TSP state encoding
    number_of_cities = 16

    key = jax.random.PRNGKey(0)
    params = init_actor_params(key, number_of_inputs, number_of_cities)

    # Test 1: batch large enough for two parallel batch tiles (v7x megacore path).
    x1 = jax.random.normal(jax.random.fold_in(key, 1),
                           (1024, number_of_inputs), jnp.float32)
    probs1 = jax.block_until_ready(actor_forward(x1, params, block_batch=512))
    ref1 = actor_forward_ref(x1, params)
    assert probs1.shape == (1024, number_of_cities)
    assert jnp.allclose(jnp.sum(probs1, axis=-1), 1.0, atol=2e-3)
    assert jnp.allclose(probs1, ref1, atol=2e-3, rtol=2e-3)

    # Test 2: batch that is NOT a multiple of the tile (exercises the padding path).
    x2 = jax.random.normal(jax.random.fold_in(key, 2),
                           (37, number_of_inputs), jnp.float32)
    probs2 = jax.block_until_ready(actor_forward(x2, params, block_batch=512))
    ref2 = actor_forward_ref(x2, params)
    assert probs2.shape == (37, number_of_cities)
    assert jnp.allclose(jnp.sum(probs2, axis=-1), 1.0, atol=2e-3)
    assert jnp.allclose(probs2, ref2, atol=2e-3, rtol=2e-3)

    # TODO(synk): torch.distributions.Categorical (sampling / log_prob) is a host-side
    # distribution object, not a tensor op; probs returned here parameterize it fully.
    print("KERNEL_OK")
</pallas_src>

<mosaic_0001>
module attributes {stable_mosaic.version = 11 : i64} {
  func.func @_actor_mlp_kernel(%arg0: i32, %arg1: memref<512x128xf32, #tpu.memory_space<vmem>>, %arg2: memref<128x64xf32, #tpu.memory_space<vmem>>, %arg3: memref<1x64xf32, #tpu.memory_space<vmem>>, %arg4: memref<64x32xf32, #tpu.memory_space<vmem>>, %arg5: memref<1x32xf32, #tpu.memory_space<vmem>>, %arg6: memref<32x32xf32, #tpu.memory_space<vmem>>, %arg7: memref<1x32xf32, #tpu.memory_space<vmem>>, %arg8: memref<32x32xf32, #tpu.memory_space<vmem>>, %arg9: memref<1x32xf32, #tpu.memory_space<vmem>>, %arg10: memref<32x128xf32, #tpu.memory_space<vmem>>, %arg11: memref<1x128xf32, #tpu.memory_space<vmem>>, %arg12: memref<512x128xf32, #tpu.memory_space<vmem>>) attributes {dimension_semantics = [#tpu.dimension_semantics<parallel>], iteration_bounds = array<i64: 2>, scalar_prefetch = 0 : i64, scratch_operands = 0 : i64, tpu.core_type = #tpu.core_type<tc>, window_params = [{transform_indices = @transform_0, window_bounds = array<i64: 512, 128>}, {pipeline_mode = #tpu.pipeline_mode<synchronous>, transform_indices = @transform_1, window_bounds = array<i64: 128, 64>}, {pipeline_mode = #tpu.pipeline_mode<synchronous>, transform_indices = @transform_2, window_bounds = array<i64: 1, 64>}, {pipeline_mode = #tpu.pipeline_mode<synchronous>, transform_indices = @transform_3, window_bounds = array<i64: 64, 32>}, {pipeline_mode = #tpu.pipeline_mode<synchronous>, transform_indices = @transform_4, window_bounds = array<i64: 1, 32>}, {pipeline_mode = #tpu.pipeline_mode<synchronous>, transform_indices = @transform_5, window_bounds = array<i64: 32, 32>}, {pipeline_mode = #tpu.pipeline_mode<synchronous>, transform_indices = @transform_6, window_bounds = array<i64: 1, 32>}, {pipeline_mode = #tpu.pipeline_mode<synchronous>, transform_indices = @transform_7, window_bounds = array<i64: 32, 32>}, {pipeline_mode = #tpu.pipeline_mode<synchronous>, transform_indices = @transform_8, window_bounds = array<i64: 1, 32>}, {pipeline_mode = #tpu.pipeline_mode<synchronous>, transform_indices = @transform_9, window_bounds = array<i64: 32, 128>}, {pipeline_mode = #tpu.pipeline_mode<synchronous>, transform_indices = @transform_10, window_bounds = array<i64: 1, 128>}, {transform_indices = @transform_11, window_bounds = array<i64: 512, 128>}]} {
    %c0 = arith.constant 0 : index
    %c0_0 = arith.constant 0 : index
    %0 = vector.load %arg1[%c0, %c0_0] : memref<512x128xf32, #tpu.memory_space<vmem>>, vector<512x128xf32>
    %c0_1 = arith.constant 0 : index
    %c0_2 = arith.constant 0 : index
    %1 = vector.load %arg2[%c0_1, %c0_2] : memref<128x64xf32, #tpu.memory_space<vmem>>, vector<128x64xf32>
    %cst = arith.constant dense<0.000000e+00> : vector<512x64xf32>
    %2 = tpu.matmul %0, %1, %cst {dimension_numbers = #tpu.dot_dimension_numbers<[1], [0], [0], [1], [0, 0, 1, 1], [], []>} : vector<512x128xf32>, vector<128x64xf32>, vector<512x64xf32> -> vector<512x64xf32>
    %c0_3 = arith.constant 0 : index
    %c0_4 = arith.constant 0 : index
    %3 = vector.load %arg3[%c0_3, %c0_4] : memref<1x64xf32, #tpu.memory_space<vmem>>, vector<1x64xf32>
    %4 = vector.broadcast %3 : vector<1x64xf32> to vector<512x64xf32>
    %5 = arith.addf %2, %4 : vector<512x64xf32>
    %cst_5 = arith.constant 0.000000e+00 : f32
    %6 = vector.broadcast %cst_5 : f32 to vector<512x64xf32>
    %7 = arith.maximumf %5, %6 : vector<512x64xf32>
    %c0_6 = arith.constant 0 : index
    %c0_7 = arith.constant 0 : index
    %8 = vector.load %arg4[%c0_6, %c0_7] : memref<64x32xf32, #tpu.memory_space<vmem>>, vector<64x32xf32>
    %cst_8 = arith.constant dense<0.000000e+00> : vector<512x32xf32>
    %9 = tpu.matmul %7, %8, %cst_8 {dimension_numbers = #tpu.dot_dimension_numbers<[1], [0], [0], [1], [0, 0, 1, 1], [], []>} : vector<512x64xf32>, vector<64x32xf32>, vector<512x32xf32> -> vector<512x32xf32>
    %c0_9 = arith.constant 0 : index
    %c0_10 = arith.constant 0 : index
    %10 = vector.load %arg5[%c0_9, %c0_10] : memref<1x32xf32, #tpu.memory_space<vmem>>, vector<1x32xf32>
    %11 = vector.broadcast %10 : vector<1x32xf32> to vector<512x32xf32>
    %12 = arith.addf %9, %11 : vector<512x32xf32>
    %cst_11 = arith.constant 0.000000e+00 : f32
    %13 = vector.broadcast %cst_11 : f32 to vector<512x32xf32>
    %14 = arith.maximumf %12, %13 : vector<512x32xf32>
    %c0_12 = arith.constant 0 : index
    %c0_13 = arith.constant 0 : index
    %15 = vector.load %arg6[%c0_12, %c0_13] : memref<32x32xf32, #tpu.memory_space<vmem>>, vector<32x32xf32>
    %cst_14 = arith.constant dense<0.000000e+00> : vector<512x32xf32>
    %16 = tpu.matmul %14, %15, %cst_14 {dimension_numbers = #tpu.dot_dimension_numbers<[1], [0], [0], [1], [0, 0, 1, 1], [], []>} : vector<512x32xf32>, vector<32x32xf32>, vector<512x32xf32> -> vector<512x32xf32>
    %c0_15 = arith.constant 0 : index
    %c0_16 = arith.constant 0 : index
    %17 = vector.load %arg7[%c0_15, %c0_16] : memref<1x32xf32, #tpu.memory_space<vmem>>, vector<1x32xf32>
    %18 = vector.broadcast %17 : vector<1x32xf32> to vector<512x32xf32>
    %19 = arith.addf %16, %18 : vector<512x32xf32>
    %cst_17 = arith.constant 0.000000e+00 : f32
    %20 = vector.broadcast %cst_17 : f32 to vector<512x32xf32>
    %21 = arith.maximumf %19, %20 : vector<512x32xf32>
    %c0_18 = arith.constant 0 : index
    %c0_19 = arith.constant 0 : index
    %22 = vector.load %arg8[%c0_18, %c0_19] : memref<32x32xf32, #tpu.memory_space<vmem>>, vector<32x32xf32>
    %cst_20 = arith.constant dense<0.000000e+00> : vector<512x32xf32>
    %23 = tpu.matmul %21, %22, %cst_20 {dimension_numbers = #tpu.dot_dimension_numbers<[1], [0], [0], [1], [0, 0, 1, 1], [], []>} : vector<512x32xf32>, vector<32x32xf32>, vector<512x32xf32> -> vector<512x32xf32>
    %c0_21 = arith.constant 0 : index
    %c0_22 = arith.constant 0 : index
    %24 = vector.load %arg9[%c0_21, %c0_22] : memref<1x32xf32, #tpu.memory_space<vmem>>, vector<1x32xf32>
    %25 = vector.broadcast %24 : vector<1x32xf32> to vector<512x32xf32>
    %26 = arith.addf %23, %25 : vector<512x32xf32>
    %cst_23 = arith.constant 0.000000e+00 : f32
    %27 = vector.broadcast %cst_23 : f32 to vector<512x32xf32>
    %28 = arith.maximumf %26, %27 : vector<512x32xf32>
    %c0_24 = arith.constant 0 : index
    %c0_25 = arith.constant 0 : index
    %29 = vector.load %arg10[%c0_24, %c0_25] : memref<32x128xf32, #tpu.memory_space<vmem>>, vector<32x128xf32>
    %cst_26 = arith.constant dense<0.000000e+00> : vector<512x128xf32>
    %30 = tpu.matmul %28, %29, %cst_26 {dimension_numbers = #tpu.dot_dimension_numbers<[1], [0], [0], [1], [0, 0, 1, 1], [], []>} : vector<512x32xf32>, vector<32x128xf32>, vector<512x128xf32> -> vector<512x128xf32>
    %c0_27 = arith.constant 0 : index
    %c0_28 = arith.constant 0 : index
    %31 = vector.load %arg11[%c0_27, %c0_28] : memref<1x128xf32, #tpu.memory_space<vmem>>, vector<1x128xf32>
    %32 = vector.broadcast %31 : vector<1x128xf32> to vector<512x128xf32>
    %33 = arith.addf %30, %32 : vector<512x128xf32>
    %cst_29 = arith.constant dense<0xFF800000> : vector<512xf32>
    %34 = vector.multi_reduction <maximumf>, %33, %cst_29 [1] : vector<512x128xf32> to vector<512xf32>
    %35 = vector.shape_cast %34 : vector<512xf32> to vector<512x1xf32>
    %36 = vector.broadcast %35 : vector<512x1xf32> to vector<512x128xf32>
    %37 = arith.subf %33, %36 : vector<512x128xf32>
    %38 = math.exp %37 : vector<512x128xf32>
    %cst_30 = arith.constant dense<0.000000e+00> : vector<512xf32>
    %39 = vector.multi_reduction <add>, %38, %cst_30 [1] : vector<512x128xf32> to vector<512xf32>
    %40 = vector.shape_cast %39 : vector<512xf32> to vector<512x1xf32>
    %41 = tpu.reciprocal %40 {approx = true} : vector<512x1xf32> -> vector<512x1xf32>
    %42 = vector.broadcast %41 : vector<512x1xf32> to vector<512x128xf32>
    %43 = arith.mulf %38, %42 : vector<512x128xf32>
    %c0_31 = arith.constant 0 : index
    %c0_32 = arith.constant 0 : index
    %44 = vector.load %arg12[%c0_31, %c0_32] : memref<512x128xf32, #tpu.memory_space<vmem>>, vector<512x128xf32>
    tpu.vector_store %arg12[%c0_31, %c0_32], %43 {strides = array<i32>} : memref<512x128xf32, #tpu.memory_space<vmem>>, vector<512x128xf32>,
    return
  }
  func.func @transform_0(%arg0: i32) -> (i32, i32) {
    %c0_i32 = arith.constant 0 : i32
    %c0_i32_0 = arith.constant 0 : i32
    return %arg0, %c0_i32 : i32, i32
  }
  func.func @transform_1(%arg0: i32) -> (i32, i32) {
    %c0_i32 = arith.constant 0 : i32
    %c0_i32_0 = arith.constant 0 : i32
    %c0_i32_1 = arith.constant 0 : i32
    return %c0_i32, %c0_i32_0 : i32, i32
  }
  func.func @transform_2(%arg0: i32) -> (i32, i32) {
    %c0_i32 = arith.constant 0 : i32
    %c0_i32_0 = arith.constant 0 : i32
    %c0_i32_1 = arith.constant 0 : i32
    return %c0_i32, %c0_i32_0 : i32, i32
  }
  func.func @transform_3(%arg0: i32) -> (i32, i32) {
    %c0_i32 = arith.constant 0 : i32
    %c0_i32_0 = arith.constant 0 : i32
    %c0_i32_1 = arith.constant 0 : i32
    return %c0_i32, %c0_i32_0 : i32, i32
  }
  func.func @transform_4(%arg0: i32) -> (i32, i32) {
    %c0_i32 = arith.constant 0 : i32
    %c0_i32_0 = arith.constant 0 : i32
    %c0_i32_1 = arith.constant 0 : i32
    return %c0_i32, %c0_i32_0 : i32, i32
  }
  func.func @transform_5(%arg0: i32) -> (i32, i32) {
    %c0_i32 = arith.constant 0 : i32
    %c0_i32_0 = arith.constant 0 : i32
    %c0_i32_1 = arith.constant 0 : i32
    return %c0_i32, %c0_i32_0 : i32, i32
  }
  func.func @transform_6(%arg0: i32) -> (i32, i32) {
    %c0_i32 = arith.constant 0 : i32
    %c0_i32_0 = arith.constant 0 : i32
    %c0_i32_1 = arith.constant 0 : i32
    return %c0_i32, %c0_i32_0 : i32, i32
  }
  func.func @transform_7(%arg0: i32) -> (i32, i32) {
    %c0_i32 = arith.constant 0 : i32
    %c0_i32_0 = arith.constant 0 : i32
    %c0_i32_1 = arith.constant 0 : i32
    return %c0_i32, %c0_i32_0 : i32, i32
  }
  func.func @transform_8(%arg0: i32) -> (i32, i32) {
    %c0_i32 = arith.constant 0 : i32
    %c0_i32_0 = arith.constant 0 : i32
    %c0_i32_1 = arith.constant 0 : i32
    return %c0_i32, %c0_i32_0 : i32, i32
  }
  func.func @transform_9(%arg0: i32) -> (i32, i32) {
    %c0_i32 = arith.constant 0 : i32
    %c0_i32_0 = arith.constant 0 : i32
    %c0_i32_1 = arith.constant 0 : i32
    return %c0_i32, %c0_i32_0 : i32, i32
  }
  func.func @transform_10(%arg0: i32) -> (i32, i32) {
    %c0_i32 = arith.constant 0 : i32
    %c0_i32_0 = arith.constant 0 : i32
    %c0_i32_1 = arith.constant 0 : i32
    return %c0_i32, %c0_i32_0 : i32, i32
  }
  func.func @transform_11(%arg0: i32) -> (i32, i32) {
    %c0_i32 = arith.constant 0 : i32
    %c0_i32_0 = arith.constant 0 : i32
    return %arg0, %c0_i32 : i32, i32
  }
}

</mosaic_0001>

<bundles_post_ra>
// kernel: actor_forward.1
= control target key start
LH: loop header
LB: loop body
LE: loop exit
PB: predicated region body
PF: predicated region fallthrough
CT: control target
= control target key end

     0   :  { %s5764_s17 = smov 0   ;;  %s7145_s0 = inlined_call_operand.vmem [shape: f32[1024,128], index: 0, kind: input, shape index: {}]   ;;  %s7146_s1 = inlined_call_operand.vmem [shape: f32[128,64], index: 1, kind: input, shape index: {}]   ;;  %s7147_s2 = inlined_call_operand.vmem [shape: f32[1,64], index: 2, kind: input, shape index: {}]   ;;  %s7148_s3 = inlined_call_operand.vmem [shape: f32[64,32], index: 3, kind: input, shape index: {}]   ;;  %s7149_s4 = inlined_call_operand.vmem [shape: f32[1,32], index: 4, kind: input, shape index: {}]   ;;  %s7150_s5 = inlined_call_operand.vmem [shape: f32[32,32], index: 5, kind: input, shape index: {}]   ;;  %s7151_s6 = inlined_call_operand.vmem [shape: f32[1,32], index: 6, kind: input, shape index: {}]   ;;  %s7152_s7 = inlined_call_operand.vmem [shape: f32[32,32], index: 7, kind: input, shape index: {}]   ;;  %s7153_s8 = inlined_call_operand.vmem [shape: f32[1,32], index: 8, kind: input, shape index: {}]   ;;  %s7154_s9 = inlined_call_operand.vmem [shape: f32[32,128], index: 9, kind: input, shape index: {}]   ;;  %s7155_s10 = inlined_call_operand.vmem [shape: f32[1,128], index: 10, kind: input, shape index: {}]   ;;  %s7156_s11 = inlined_call_operand.vmem [shape: f32[1024,128], index: 11, kind: output, shape index: {}]  }
   0x1 LB: > { %s4172_s18 = sadd.s32 4294967295, %s5702_s17   ;;  %p4176_p0 = scmp.ge.s32.totalorder %s5702_s17, 1  ;;  %s5702_s17 = sphi %s5764_s17, %s21_s17  }
   0x2   : > { %p338_p1 = scmp.lt.s32.totalorder %s5702_s17, 3 }
   0x4   : > { %p339_p2 = pnand %p4176_p0, %p338_p1 }
   0x6   : > { %342 = sbr.rel (%p339_p2) target bundleno = 1576 (0x628), region = 64 }
   0xd   : > { %v454_v0 = vld [vmem:[%s7146_s1] sm:$0xff]  ;;  %v455_v1 = vld [vmem:[%s7146_s1 + $0x8] sm:$0xff]  ;;  %v456_v2 = vld [vmem:[%s7146_s1 + $0x10] sm:$0xff]  ;;  %s4177_s25 = sshll.u32 %s4172_s18, 6  ;;  %vm941_vm0 = vcmask 523264   ;;  %vm1594_vm1 = vcmask 261120  }
   0xe   : > { %v5352_v3 = vpack.c.bf16 %v455_v1, %v454_v0  ;;  %v457_v4 = vld [vmem:[%s7146_s1 + $0x18] sm:$0xff]  ;;  %p379_p3 = scmp.lt.s32.totalorder %s4177_s25, 127  ;;  %v458_v6 = vld [vmem:[%s7146_s1 + $0x20] sm:$0xff]  ;;  %v459_v7 = vld [vmem:[%s7146_s1 + $0x28] sm:$0xff] }
   0xf   : > { %v5356_v5 = vpack.c.bf16 %v457_v4, %v456_v2  ;;  %v5360_v8 = vpack.c.bf16 %v459_v7, %v458_v6  ;;  %v926_v9 = vld [vmem:[%s7148_s3] sm:$0xff]  ;;  %v927_v10 = vld [vmem:[%s7148_s3 + $0x8] sm:$0xff]  ;;  %v460_v11 = vld [vmem:[%s7146_s1 + $0x30] sm:$0xff] }
  0x10   : > { %5353 = vmatprep.subr.bf16.mxu0 %v5352_v3  ;;  %s7230_s25 = smov (!%p379_p3, %s4177_s25), 127  ;;  %v461_v12 = vld [vmem:[%s7146_s1 + $0x38] sm:$0xff]  ;;  %v5384_v14 = vpack.c.bf16 %v927_v10, %v926_v9  ;;  %v462_v16 = vld [vmem:[%s7146_s1 + $0x40] sm:$0xff]  ;;  %v463_v17 = vld [vmem:[%s7146_s1 + $0x48] sm:$0xff] }
  0x11   : > { %5355 = vmatpush3.bf16.msra.mxu0 %v5352_v3  ;;  %s4178_s13 = sshll.u32 %s7230_s25, 3  ;;  %v5364_v15 = vpack.c.bf16 %v461_v12, %v460_v11  ;;  %v5368_v18 = vpack.c.bf16 %v463_v17, %v462_v16  ;;  %v464_v19 = vld [vmem:[%s7146_s1 + $0x50] sm:$0xff]  ;;  %v465_v20 = vld [vmem:[%s7146_s1 + $0x58] sm:$0xff]  ;;  %v466_v22 = vld [vmem:[%s7146_s1 + $0x60] sm:$0xff] }
  0x12   : > { %5357 = vmatprep.subr.bf16.mxu0 %v5356_v5  ;;  %s5810_s26 = scalar_lea.vmem %s7145_s0, %s4178_s13  ;;  %5424 = vmatprep.subr.bf16.mxu1 %v5384_v14  ;;  %v5372_v21 = vpack.c.bf16 %v465_v20, %v464_v19  ;;  %v467_v23 = vld [vmem:[%s7146_s1 + $0x68] sm:$0xff]  ;;  %v468_v25 = vld [vmem:[%s7146_s1 + $0x70] sm:$0xff]  ;;  %v469_v26 = vld [vmem:[%s7146_s1 + $0x78] sm:$0xff]  ;;  %s7012_s29 = scalar_lea.vmem %s7156_s11, %s4178_s13 }
  0x13   : > { %v390_v13 = vld [vmem:[%s5810_s26] sm:$0xff]  ;;  %5428 = vmatpush3.bf16.msra.mxu1 %v5384_v14  ;;  %v5376_v24 = vpack.c.bf16 %v467_v23, %v466_v22  ;;  %v5380_v27 = vpack.c.bf16 %v469_v26, %v468_v25  ;;  %v928_v28 = vld [vmem:[%s7148_s3 + $0x10] sm:$0xff]  ;;  %v929_v29 = vld [vmem:[%s7148_s3 + $0x18] sm:$0xff] }
  0x14   : > { %4832 = vmatprep.mubr.f32.mxu0 %v390_v13  ;;  %v5388_v30 = vpack.c.bf16 %v929_v29, %v928_v28  ;;  %v930_v31 = vld [vmem:[%s7148_s3 + $0x20] sm:$0xff]  ;;  %v931_v32 = vld [vmem:[%s7148_s3 + $0x28] sm:$0xff]  ;;  %v392_v35 = vld [vmem:[%s5810_s26 + $0x10] sm:$0xff] }
  0x15   : > { %5359 = vmatpush3.bf16.msra.mxu0 %v5356_v5  ;;  %v391_v33 = vld [vmem:[%s5810_s26 + $0x8] sm:$0xff]  ;;  %v5392_v34 = vpack.c.bf16 %v931_v32, %v930_v31  ;;  %v932_v36 = vld [vmem:[%s7148_s3 + $0x30] sm:$0xff]  ;;  %v933_v37 = vld [vmem:[%s7148_s3 + $0x38] sm:$0xff] }
  0x16   : > { %5361 = vmatprep.subr.bf16.mxu0 %v5360_v8  ;;  %5425 = vmatprep.subr.bf16.mxu1 %v5388_v30  ;;  %v393_v38 = vld [vmem:[%s5810_s26 + $0x18] sm:$0xff]  ;;  %v5396_v39 = vpack.c.bf16 %v933_v37, %v932_v36  ;;  %v394_v40 = vld [vmem:[%s5810_s26 + $0x20] sm:$0xff]  ;;  %v395_v41 = vld [vmem:[%s5810_s26 + $0x28] sm:$0xff] }
  0x17   : > { %5429 = vmatpush3.bf16.msra.mxu1 %v5388_v30  ;;  %v396_v42 = vld [vmem:[%s5810_s26 + $0x30] sm:$0xff]  ;;  %v397_v43 = vld [vmem:[%s5810_s26 + $0x38] sm:$0xff]  ;;  %v398_v44 = vld [vmem:[%s5810_s26 + $0x40] sm:$0xff] }
  0x18   : > { %5426 = vmatprep.subr.bf16.mxu1 %v5392_v34  ;;  %v399_v45 = vld [vmem:[%s5810_s26 + $0x48] sm:$0xff]  ;;  %v400_v46 = vld [vmem:[%s5810_s26 + $0x50] sm:$0xff]  ;;  %v401_v47 = vld [vmem:[%s5810_s26 + $0x58] sm:$0xff] }
  0x19   : > { %5363 = vmatpush3.bf16.msra.mxu0 %v5360_v8  ;;  %v402_v48 = vld [vmem:[%s5810_s26 + $0x60] sm:$0xff]  ;;  %v403_v49 = vld [vmem:[%s5810_s26 + $0x68] sm:$0xff]  ;;  %v404_v50 = vld [vmem:[%s5810_s26 + $0x70] sm:$0xff] }
  0x1a   : > { %5365 = vmatprep.subr.bf16.mxu0 %v5364_v15  ;;  %v405_v51 = vld [vmem:[%s5810_s26 + $0x78] sm:$0xff]  ;;  %v406_v52 = vld [vmem:[%s5810_s26 + $0x80] sm:$0xff]  ;;  %v407_v53 = vld [vmem:[%s5810_s26 + $0x88] sm:$0xff] }
  0x1b   : > { %5430 = vmatpush3.bf16.msra.mxu1 %v5392_v34  ;;  %v408_v54 = vld [vmem:[%s5810_s26 + $0x90] sm:$0xff]  ;;  %v409_v55 = vld [vmem:[%s5810_s26 + $0x98] sm:$0xff]  ;;  %v410_v56 = vld [vmem:[%s5810_s26 + $0xa0] sm:$0xff] }
  0x1c   : > { %5427 = vmatprep.subr.bf16.mxu1 %v5396_v39  ;;  %v411_v57 = vld [vmem:[%s5810_s26 + $0xa8] sm:$0xff]  ;;  %v412_v58 = vld [vmem:[%s5810_s26 + $0xb0] sm:$0xff]  ;;  %v413_v59 = vld [vmem:[%s5810_s26 + $0xb8] sm:$0xff] }
  0x1d   : > { %5367 = vmatpush3.bf16.msra.mxu0 %v5364_v15  ;;  %v414_v60 = vld [vmem:[%s5810_s26 + $0xc0] sm:$0xff]  ;;  %v415_v61 = vld [vmem:[%s5810_s26 + $0xc8] sm:$0xff]  ;;  %v416_v62 = vld [vmem:[%s5810_s26 + $0xd0] sm:$0xff] }
  0x1e   : > { %5369 = vmatprep.subr.bf16.mxu0 %v5368_v18  ;;  %v417_v63 = vld [vmem:[%s5810_s26 + $0xd8] sm:$0xff]  ;;  %v418_v0 = vld [vmem:[%s5810_s26 + $0xe0] sm:$0xff]  ;;  %v419_v1 = vld [vmem:[%s5810_s26 + $0xe8] sm:$0xff] }
  0x1f   : > { %5431 = vmatpush3.bf16.msra.mxu1 %v5396_v39  ;;  %v420_v2 = vld [vmem:[%s5810_s26 + $0xf0] sm:$0xff]  ;;  %v421_v3 = vld [vmem:[%s5810_s26 + $0xf8] sm:$0xff]  ;;  %v422_v4 = vld [vmem:[%s5810_s26 + $0x100] sm:$0xff] }
  0x20   : > { %v423_v5 = vld [vmem:[%s5810_s26 + $0x108] sm:$0xff]  ;;  %v424_v6 = vld [vmem:[%s5810_s26 + $0x110] sm:$0xff]  ;;  %v425_v7 = vld [vmem:[%s5810_s26 + $0x118] sm:$0xff] }
  0x21   : > { %5371 = vmatpush3.bf16.msra.mxu0 %v5368_v18  ;;  %v426_v8 = vld [vmem:[%s5810_s26 + $0x120] sm:$0xff]  ;;  %v427_v9 = vld [vmem:[%s5810_s26 + $0x128] sm:$0xff]  ;;  %v428_v10 = vld [vmem:[%s5810_s26 + $0x130] sm:$0xff] }
  0x22   : > { %5373 = vmatprep.subr.bf16.mxu0 %v5372_v21  ;;  %v429_v11 = vld [vmem:[%s5810_s26 + $0x138] sm:$0xff]  ;;  %v430_v12 = vld [vmem:[%s5810_s26 + $0x140] sm:$0xff]  ;;  %v431_v13 = vld [vmem:[%s5810_s26 + $0x148] sm:$0xff] }
  0x23   : > { %v433_v15 = vld [vmem:[%s5810_s26 + $0x158] sm:$0xff]  ;;  %v434_v16 = vld [vmem:[%s5810_s26 + $0x160] sm:$0xff]  ;;  %v435_v17 = vld [vmem:[%s5810_s26 + $0x168] sm:$0xff] }
  0x24   : > { %v436_v18 = vld [vmem:[%s5810_s26 + $0x170] sm:$0xff]  ;;  %v437_v19 = vld [vmem:[%s5810_s26 + $0x178] sm:$0xff]  ;;  %v438_v20 = vld [vmem:[%s5810_s26 + $0x180] sm:$0xff] }
  0x25   : > { %5375 = vmatpush3.bf16.msra.mxu0 %v5372_v21  ;;  %v439_v21 = vld [vmem:[%s5810_s26 + $0x188] sm:$0xff]  ;;  %v440_v22 = vld [vmem:[%s5810_s26 + $0x190] sm:$0xff]  ;;  %v441_v23 = vld [vmem:[%s5810_s26 + $0x198] sm:$0xff] }
  0x26   : > { %5377 = vmatprep.subr.bf16.mxu0 %v5376_v24  ;;  %v443_v25 = vld [vmem:[%s5810_s26 + $0x1a8] sm:$0xff]  ;;  %v444_v26 = vld [vmem:[%s5810_s26 + $0x1b0] sm:$0xff]  ;;  %v446_v28 = vld [vmem:[%s5810_s26 + $0x1c0] sm:$0xff] }
  0x27   : > { %v447_v29 = vld [vmem:[%s5810_s26 + $0x1c8] sm:$0xff]  ;;  %v449_v31 = vld [vmem:[%s5810_s26 + $0x1d8] sm:$0xff]  ;;  %v450_v32 = vld [vmem:[%s5810_s26 + $0x1e0] sm:$0xff] }
  0x28   : > { %v5921_v36 = vld [vmem:[%s7147_s2] ss:$0 sm:$0xff] }
  0x29   : > { %5379 = vmatpush3.bf16.msra.mxu0 %v5376_v24  ;;  %v442_v24 = vld [vmem:[%s5810_s26 + $0x1a0] sm:$0xff] }
  0x2a   : > { %5381 = vmatprep.subr.bf16.mxu0 %v5380_v27 }
  0x2d   : > { %5383 = vmatpush3.bf16.msra.mxu0 %v5380_v27  ;;  %v445_v27 = vld [vmem:[%s5810_s26 + $0x1b8] sm:$0xff] }
  0x2e   : > { %5385 = vmatprep.subr.bf16.mxu0 %v5384_v14 }
  0x30   : > { %4833 = vmatmul.mubr.f32.vlgmr.msra.gmra.mrb[0].mxu0 %v391_v33  ;;  %v451_v33 = vld [vmem:[%s5810_s26 + $0x1e8] sm:$0xff] }
  0x31   : > { %4835 = vmatprep.mubr.f32.mxu0 %v392_v35  ;;  %5387 = vmatpush3.bf16.msra.mxu0 %v5384_v14  ;;  %v432_v14 = vld [vmem:[%s5810_s26 + $0x150] sm:$0xff]  ;;  %v453_v35 = vld [vmem:[%s5810_s26 + $0x1f8] sm:$0xff] }
  0x32   : > { %5389 = vmatprep.subr.bf16.mxu0 %v5388_v30 }
  0x34   : > { %4836 = vmatmul.mubr.f32.gmra.mrb[2].mxu0 %v393_v38 }
  0x35   : > { %4838 = vmatprep.mubr.f32.mxu0 %v394_v40  ;;  %5391 = vmatpush3.bf16.msra.mxu0 %v5388_v30  ;;  %v448_v30 = vld [vmem:[%s5810_s26 + $0x1d0] sm:$0xff] }
  0x36   : > { %5393 = vmatprep.subr.bf16.mxu0 %v5392_v34 }
  0x38   : > { %4839 = vmatmul.mubr.f32.gmra.mrb[4].mxu0 %v395_v41  ;;  %v1583_v41 = vld [vmem:[%s7150_s5] sm:$0xff] }
  0x39   : > { %4841 = vmatprep.mubr.f32.mxu0 %v396_v42  ;;  %5395 = vmatpush3.bf16.msra.mxu0 %v5392_v34  ;;  %v452_v34 = vld [vmem:[%s5810_s26 + $0x1f0] sm:$0xff]  ;;  %v1584_v42 = vld [vmem:[%s7150_s5 + $0x8] sm:$0xff] }
  0x3a   : > { %5397 = vmatprep.subr.bf16.mxu0 %v5396_v39 }
  0x3c   : > { %4842 = vmatmul.mubr.f32.gmra.mrb[6].mxu0 %v397_v43 }
  0x3d   : > { %4844 = vmatprep.mubr.f32.mxu0 %v398_v44  ;;  %5399 = vmatpush3.bf16.msra.mxu0 %v5396_v39 }
  0x40   : > { %4845 = vmatmul.mubr.f32.gmra.mrb[8].mxu0 %v399_v45  ;;  %v5931_v45 = vpack.c.bf16 %v1584_v42, %v1583_v41 }
  0x41   : > { %4847 = vmatprep.mubr.f32.mxu0 %v400_v46 }
  0x42   : > { %5401 = vmatprep.subr.bf16.mxu1 %v5931_v45 }
  0x44   : > { %4848 = vmatmul.mubr.f32.gmra.mrb[10].mxu0 %v401_v47 }
  0x45   : > { %4850 = vmatprep.mubr.f32.mxu0 %v402_v48 }
  0x48   : > { %4851 = vmatmul.mubr.f32.gmra.mrb[12].mxu0 %v403_v49 }
  0x49   : > { %4853 = vmatprep.mubr.f32.mxu0 %v404_v50 }
  0x4c   : > { %4854 = vmatmul.mubr.f32.gmra.mrb[14].mxu0 %v405_v51 }
  0x4d   : > { %4856 = vmatprep.mubr.f32.mxu0 %v406_v52 }
  0x50   : > { %4857 = vmatmul.mubr.f32.gmra.mrb[16].mxu0 %v407_v53 }
  0x51   : > { %4859 = vmatprep.mubr.f32.mxu0 %v408_v54 }
  0x54   : > { %4860 = vmatmul.mubr.f32.gmra.mrb[18].mxu0 %v409_v55 }
  0x55   : > { %4862 = vmatprep.mubr.f32.mxu0 %v410_v56 }
  0x58   : > { %4863 = vmatmul.mubr.f32.gmra.mrb[20].mxu0 %v411_v57 }
  0x59   : > { %4865 = vmatprep.mubr.f32.mxu0 %v412_v58 }
  0x5c   : > { %4866 = vmatmul.mubr.f32.gmra.mrb[22].mxu0 %v413_v59 }
  0x5d   : > { %4868 = vmatprep.mubr.f32.mxu0 %v414_v60 }
  0x60   : > { %4869 = vmatmul.mubr.f32.gmra.mrb[24].mxu0 %v415_v61 }
  0x61   : > { %4871 = vmatprep.mubr.f32.mxu0 %v416_v62 }
  0x64   : > { %4872 = vmatmul.mubr.f32.gmra.mrb[26].mxu0 %v417_v63 }
  0x65   : > { %4874 = vmatprep.mubr.f32.mxu0 %v418_v0 }
  0x68   : > { %4875 = vmatmul.mubr.f32.gmra.mrb[28].mxu0 %v419_v1 }
  0x69   : > { %4877 = vmatprep.mubr.f32.mxu0 %v420_v2 }
  0x6c   : > { %4878 = vmatmul.mubr.f32.gmra.mrb[30].mxu0 %v421_v3 }
  0x6d   : > { %4880 = vmatprep.mubr.f32.mxu0 %v422_v4 }
  0x70   : > { %4881 = vmatmul.mubr.f32.gmra.mrb[32].mxu0 %v423_v5 }
  0x71   : > { %4883 = vmatprep.mubr.f32.mxu0 %v424_v6 }
  0x74   : > { %4884 = vmatmul.mubr.f32.gmra.mrb[34].mxu0 %v425_v7 }
  0x75   : > { %4886 = vmatprep.mubr.f32.mxu0 %v426_v8 }
  0x78   : > { %4887 = vmatmul.mubr.f32.gmra.mrb[36].mxu0 %v427_v9 }
  0x79   : > { %4889 = vmatprep.mubr.f32.mxu0 %v428_v10 }
  0x7c   : > { %4890 = vmatmul.mubr.f32.gmra.mrb[38].mxu0 %v429_v11 }
  0x7d   : > { %4892 = vmatprep.mubr.f32.mxu0 %v430_v12 }
  0x80   : > { %4893 = vmatmul.mubr.f32.gmra.mrb[40].mxu0 %v431_v13 }
  0x81   : > { %4895 = vmatprep.mubr.f32.mxu0 %v432_v14 }
  0x84   : > { %4896 = vmatmul.mubr.f32.gmra.mrb[42].mxu0 %v433_v15 }
  0x85   : > { %4898 = vmatprep.mubr.f32.mxu0 %v434_v16 }
  0x88   : > { %4899 = vmatmul.mubr.f32.gmra.mrb[44].mxu0 %v435_v17 }
  0x89   : > { %4901 = vmatprep.mubr.f32.mxu0 %v436_v18 }
  0x8c   : > { %4902 = vmatmul.mubr.f32.gmra.mrb[46].mxu0 %v437_v19 }
  0x8d   : > { %4904 = vmatprep.mubr.f32.mxu0 %v438_v20 }
  0x90   : > { %4905 = vmatmul.mubr.f32.gmra.mrb[48].mxu0 %v439_v21 }
  0x91   : > { %4907 = vmatprep.mubr.f32.mxu0 %v440_v22 }
  0x94   : > { %4908 = vmatmul.mubr.f32.gmra.mrb[50].mxu0 %v441_v23 }
  0x95   : > { %4910 = vmatprep.mubr.f32.mxu0 %v442_v24 }
  0x98   : > { %4911 = vmatmul.mubr.f32.gmra.mrb[52].mxu0 %v443_v25 }
  0x99   : > { %4913 = vmatprep.mubr.f32.mxu0 %v444_v26 }
  0x9c   : > { %4914 = vmatmul.mubr.f32.gmra.mrb[54].mxu0 %v445_v27 }
  0x9d   : > { %4916 = vmatprep.mubr.f32.mxu0 %v446_v28 }
  0xa0   : > { %4917 = vmatmul.mubr.f32.gmra.mrb[56].mxu0 %v447_v29 }
  0xa1   : > { %4919 = vmatprep.mubr.f32.mxu0 %v448_v30 }
  0xa4   : > { %4920 = vmatmul.mubr.f32.gmra.mrb[58].mxu0 %v449_v31 }
  0xa5   : > { %4922 = vmatprep.mubr.f32.mxu0 %v450_v32 }
  0xa8   : > { %4923 = vmatmul.mubr.f32.gmra.mrb[60].mxu0 %v451_v33 }
  0xa9   : > { %4925 = vmatprep.mubr.f32.mxu0 %v452_v34 }
  0xac   : > { %4926 = vmatmul.mubr.f32.gmra.mrb[62].mxu0 %v453_v35 }
 0x103   : > { %v4834_v37 = vpop.f32.mrb[0].mxu0 }
 0x104   : > { %v549_v38 = vadd.f32 %v4834_v37, %v5921_v36  ;;  %v543_v39 = vpop.f32.mrb[1].mxu0 }
 0x105   : > { %v544_v40 = vadd.f32 %v5921_v36, %v543_v39 }
 0x106   : > { %v863_v46 = vmax.f32 %v549_v38, 0.0 }
 0x107   : > { %v862_v43 = vmax.f32 %v544_v40, 0.0  ;;  %v4837_v44 = vpop.f32.mrb[2].mxu0 }
 0x108   : > { %v559_v47 = vadd.f32 %v4837_v44, %v5921_v36  ;;  %v553_v48 = vpop.f32.mrb[3].mxu0 }
 0x109   : > { %v554_v49 = vadd.f32 %v5921_v36, %v553_v48  ;;  %4944 = vmatprep.mubr.msk.f32.mxu0 %vm941_vm0, %v862_v43 }
 0x10a   : > { %4945 = vmatmul.mubr.msk.f32.vlgmr.msra.gmra.mrb[64].mxu0 %vm941_vm0, %v863_v46  ;;  %v865_v52 = vmax.f32 %v559_v47, 0.0 }
 0x10b   : > { %v864_v50 = vmax.f32 %v554_v49, 0.0  ;;  %v4840_v51 = vpop.f32.mrb[4].mxu0 }
 0x10c   : > { %v569_v53 = vadd.f32 %v4840_v51, %v5921_v36  ;;  %v563_v54 = vpop.f32.mrb[5].mxu0 }
 0x10d   : > { %v564_v55 = vadd.f32 %v5921_v36, %v563_v54  ;;  %4947 = vmatprep.mubr.msk.f32.mxu0 %vm941_vm0, %v864_v50 }
 0x10e   : > { %v867_v56 = vmax.f32 %v569_v53, 0.0  ;;  %4948 = vmatmul.mubr.msk.f32.gmra.mrb[66].mxu0 %vm941_vm0, %v865_v52 }
 0x10f   : > { %v866_v57 = vmax.f32 %v564_v55, 0.0  ;;  %v4843_v58 = vpop.f32.mrb[6].mxu0 }
 0x110   : > { %v579_v59 = vadd.f32 %v4843_v58, %v5921_v36  ;;  %v573_v60 = vpop.f32.mrb[7].mxu0 }
 0x111   : > { %v574_v61 = vadd.f32 %v5921_v36, %v573_v60  ;;  %4950 = vmatprep.mubr.msk.f32.mxu0 %vm941_vm0, %v866_v57 }
 0x112   : > { %v869_v62 = vmax.f32 %v579_v59, 0.0  ;;  %4951 = vmatmul.mubr.msk.f32.gmra.mrb[68].mxu0 %vm941_vm0, %v867_v56 }
 0x113   : > { %v868_v63 = vmax.f32 %v574_v61, 0.0  ;;  %v4846_v0 = vpop.f32.mrb[8].mxu0 }
 0x114   : > { %v589_v1 = vadd.f32 %v4846_v0, %v5921_v36  ;;  %v583_v2 = vpop.f32.mrb[9].mxu0 }
 0x115   : > { %v584_v3 = vadd.f32 %v5921_v36, %v583_v2  ;;  %4953 = vmatprep.mubr.msk.f32.mxu0 %vm941_vm0, %v868_v63  ;;  %v1585_v2 = vld [vmem:[%s7150_s5 + $0x10] sm:$0xff] }
 0x116   : > { %v871_v4 = vmax.f32 %v589_v1, 0.0  ;;  %4954 = vmatmul.mubr.msk.f32.gmra.mrb[70].mxu0 %vm941_vm0, %v869_v62 }
 0x117   : > { %v870_v5 = vmax.f32 %v584_v3, 0.0  ;;  %v4849_v6 = vpop.f32.mrb[10].mxu0  ;;  %v1586_v3 = vld [vmem:[%s7150_s5 + $0x18] sm:$0xff] }
 0x118   : > { %v599_v7 = vadd.f32 %v4849_v6, %v5921_v36  ;;  %v593_v8 = vpop.f32.mrb[11].mxu0 }
 0x119   : > { %v594_v9 = vadd.f32 %v5921_v36, %v593_v8  ;;  %4956 = vmatprep.mubr.msk.f32.mxu0 %vm941_vm0, %v870_v5 }
 0x11a   : > { %v873_v10 = vmax.f32 %v599_v7, 0.0  ;;  %4957 = vmatmul.mubr.msk.f32.gmra.mrb[72].mxu0 %vm941_vm0, %v871_v4 }
 0x11b   : > { %v872_v11 = vmax.f32 %v594_v9, 0.0  ;;  %v4852_v12 = vpop.f32.mrb[12].mxu0  ;;  %v5404_v9 = vpack.c.bf16 %v1586_v3, %v1585_v2 }
 0x11c   : > { %v609_v13 = vadd.f32 %v4852_v12, %v5921_v36  ;;  %v603_v14 = vpop.f32.mrb[13].mxu0 }
 0x11d   : > { %v604_v15 = vadd.f32 %v5921_v36, %v603_v14  ;;  %4959 = vmatprep.mubr.msk.f32.mxu0 %vm941_vm0, %v872_v11 }
 0x11e   : > { %v875_v16 = vmax.f32 %v609_v13, 0.0  ;;  %4960 = vmatmul.mubr.msk.f32.gmra.mrb[74].mxu0 %vm941_vm0, %v873_v10 }
 0x11f   : > { %v874_v17 = vmax.f32 %v604_v15, 0.0  ;;  %v4855_v18 = vpop.f32.mrb[14].mxu0 }
 0x120   : > { %v619_v19 = vadd.f32 %v4855_v18, %v5921_v36  ;;  %v613_v20 = vpop.f32.mrb[15].mxu0 }
 0x121   : > { %v614_v21 = vadd.f32 %v5921_v36, %v613_v20  ;;  %4962 = vmatprep.mubr.msk.f32.mxu0 %vm941_vm0, %v874_v17 }
 0x122   : > { %v877_v22 = vmax.f32 %v619_v19, 0.0  ;;  %4963 = vmatmul.mubr.msk.f32.gmra.mrb[76].mxu0 %vm941_vm0, %v875_v16 }
 0x123   : > { %v876_v23 = vmax.f32 %v614_v21, 0.0  ;;  %v4858_v24 = vpop.f32.mrb[16].mxu0 }
 0x124   : > { %v629_v25 = vadd.f32 %v4858_v24, %v5921_v36  ;;  %v623_v26 = vpop.f32.mrb[17].mxu0 }
 0x125   : > { %v624_v27 = vadd.f32 %v5921_v36, %v623_v26  ;;  %4965 = vmatprep.mubr.msk.f32.mxu0 %vm941_vm0, %v876_v23 }
 0x126   : > { %v879_v28 = vmax.f32 %v629_v25, 0.0  ;;  %4966 = vmatmul.mubr.msk.f32.gmra.mrb[78].mxu0 %vm941_vm0, %v877_v22 }
 0x127   : > { %v878_v29 = vmax.f32 %v624_v27, 0.0  ;;  %v4861_v30 = vpop.f32.mrb[18].mxu0 }
 0x128   : > { %v639_v31 = vadd.f32 %v4861_v30, %v5921_v36  ;;  %v633_v32 = vpop.f32.mrb[19].mxu0 }
 0x129   : > { %v634_v33 = vadd.f32 %v5921_v36, %v633_v32  ;;  %4968 = vmatprep.mubr.msk.f32.mxu0 %vm941_vm0, %v878_v29 }
 0x12a   : > { %v881_v34 = vmax.f32 %v639_v31, 0.0  ;;  %4969 = vmatmul.mubr.msk.f32.gmra.mrb[80].mxu0 %vm941_vm0, %v879_v28 }
 0x12b   : > { %v880_v35 = vmax.f32 %v634_v33, 0.0  ;;  %v4864_v37 = vpop.f32.mrb[20].mxu0 }
 0x12c   : > { %v649_v38 = vadd.f32 %v4864_v37, %v5921_v36  ;;  %v643_v39 = vpop.f32.mrb[21].mxu0 }
 0x12d   : > { %v644_v40 = vadd.f32 %v5921_v36, %v643_v39  ;;  %4971 = vmatprep.mubr.msk.f32.mxu0 %vm941_vm0, %v880_v35 }
 0x12e   : > { %v883_v41 = vmax.f32 %v649_v38, 0.0  ;;  %4972 = vmatmul.mubr.msk.f32.gmra.mrb[82].mxu0 %vm941_vm0, %v881_v34 }
 0x12f   : > { %v882_v42 = vmax.f32 %v644_v40, 0.0  ;;  %v4867_v43 = vpop.f32.mrb[22].mxu0 }
 0x130   : > { %v659_v44 = vadd.f32 %v4867_v43, %v5921_v36  ;;  %v653_v46 = vpop.f32.mrb[23].mxu0 }
 0x131   : > { %v654_v47 = vadd.f32 %v5921_v36, %v653_v46  ;;  %4974 = vmatprep.mubr.msk.f32.mxu0 %vm941_vm0, %v882_v42 }
 0x132   : > { %v885_v48 = vmax.f32 %v659_v44, 0.0  ;;  %4975 = vmatmul.mubr.msk.f32.gmra.mrb[84].mxu0 %vm941_vm0, %v883_v41 }
 0x133   : > { %v884_v49 = vmax.f32 %v654_v47, 0.0  ;;  %v4870_v50 = vpop.f32.mrb[24].mxu0 }
 0x134   : > { %v669_v51 = vadd.f32 %v4870_v50, %v5921_v36  ;;  %v663_v52 = vpop.f32.mrb[25].mxu0 }
 0x135   : > { %v664_v53 = vadd.f32 %v5921_v36, %v663_v52  ;;  %4977 = vmatprep.mubr.msk.f32.mxu0 %vm941_vm0, %v884_v49 }
 0x136   : > { %v887_v54 = vmax.f32 %v669_v51, 0.0  ;;  %4978 = vmatmul.mubr.msk.f32.gmra.mrb[86].mxu0 %vm941_vm0, %v885_v48 }
 0x137   : > { %v886_v55 = vmax.f32 %v664_v53, 0.0  ;;  %v4873_v56 = vpop.f32.mrb[26].mxu0 }
 0x138   : > { %v679_v57 = vadd.f32 %v4873_v56, %v5921_v36  ;;  %v673_v58 = vpop.f32.mrb[27].mxu0 }
 0x139   : > { %v674_v59 = vadd.f32 %v5921_v36, %v673_v58  ;;  %4980 = vmatprep.mubr.msk.f32.mxu0 %vm941_vm0, %v886_v55 }
 0x13a   : > { %v889_v60 = vmax.f32 %v679_v57, 0.0  ;;  %4981 = vmatmul.mubr.msk.f32.gmra.mrb[88].mxu0 %vm941_vm0, %v887_v54 }
 0x13b   : > { %v888_v61 = vmax.f32 %v674_v59, 0.0  ;;  %v4876_v62 = vpop.f32.mrb[28].mxu0 }
 0x13c   : > { %v689_v63 = vadd.f32 %v4876_v62, %v5921_v36  ;;  %v683_v0 = vpop.f32.mrb[29].mxu0 }
 0x13d   : > { %v684_v1 = vadd.f32 %v5921_v36, %v683_v0  ;;  %4983 = vmatprep.mubr.msk.f32.mxu0 %vm941_vm0, %v888_v61 }
 0x13e   : > { %v891_v4 = vmax.f32 %v689_v63, 0.0  ;;  %4984 = vmatmul.mubr.msk.f32.gmra.mrb[90].mxu0 %vm941_vm0, %v889_v60 }
 0x13f   : > { %v890_v5 = vmax.f32 %v684_v1, 0.0  ;;  %v4879_v6 = vpop.f32.mrb[30].mxu0 }
 0x140   : > { %v699_v7 = vadd.f32 %v4879_v6, %v5921_v36  ;;  %v693_v8 = vpop.f32.mrb[31].mxu0 }
 0x141   : > { %v694_v10 = vadd.f32 %v5921_v36, %v693_v8  ;;  %4986 = vmatprep.mubr.msk.f32.mxu1 %vm941_vm0, %v890_v5 }
 0x142   : > { %v893_v11 = vmax.f32 %v699_v7, 0.0  ;;  %4987 = vmatmul.mubr.msk.f32.vlgmr.msra.gmra.mrb[0].mxu1 %vm941_vm0, %v891_v4 }
 0x143   : > { %v892_v12 = vmax.f32 %v694_v10, 0.0  ;;  %v4882_v13 = vpop.f32.mrb[32].mxu0  ;;  %5403 = vmatpush3.bf16.msra.mxu1 %v5931_v45 }
 0x144   : > { %v709_v14 = vadd.f32 %v4882_v13, %v5921_v36  ;;  %v703_v15 = vpop.f32.mrb[33].mxu0  ;;  %5405 = vmatprep.subr.bf16.mxu1 %v5404_v9 }
 0x145   : > { %v704_v16 = vadd.f32 %v5921_v36, %v703_v15  ;;  %4989 = vmatprep.mubr.msk.f32.mxu1 %vm941_vm0, %v892_v12 }
 0x146   : > { %v895_v17 = vmax.f32 %v709_v14, 0.0  ;;  %4990 = vmatmul.mubr.msk.f32.gmra.mrb[2].mxu1 %vm941_vm0, %v893_v11 }
 0x147   : > { %v894_v18 = vmax.f32 %v704_v16, 0.0  ;;  %v4885_v19 = vpop.f32.mrb[34].mxu0  ;;  %5407 = vmatpush3.bf16.msra.mxu1 %v5404_v9 }
 0x148   : > { %v719_v20 = vadd.f32 %v4885_v19, %v5921_v36  ;;  %v713_v21 = vpop.f32.mrb[35].mxu0 }
 0x149   : > { %v714_v22 = vadd.f32 %v5921_v36, %v713_v21  ;;  %4992 = vmatprep.mubr.msk.f32.mxu1 %vm941_vm0, %v894_v18 }
 0x14a   : > { %v897_v45 = vmax.f32 %v719_v20, 0.0  ;;  %4993 = vmatmul.mubr.msk.f32.gmra.mrb[4].mxu1 %vm941_vm0, %v895_v17 }
 0x14b   : > { %v896_v23 = vmax.f32 %v714_v22, 0.0  ;;  %v4888_v24 = vpop.f32.mrb[36].mxu0 }
 0x14c   : > { %v729_v25 = vadd.f32 %v4888_v24, %v5921_v36  ;;  %v723_v26 = vpop.f32.mrb[37].mxu0 }
 0x14d   : > { %v724_v27 = vadd.f32 %v5921_v36, %v723_v26  ;;  %4995 = vmatprep.mubr.msk.f32.mxu1 %vm941_vm0, %v896_v23 }
 0x14e   : > { %v899_v28 = vmax.f32 %v729_v25, 0.0  ;;  %4996 = vmatmul.mubr.msk.f32.gmra.mrb[6].mxu1 %vm941_vm0, %v897_v45 }
 0x14f   : > { %v898_v29 = vmax.f32 %v724_v27, 0.0  ;;  %v4891_v30 = vpop.f32.mrb[38].mxu0 }
 0x150   : > { %v739_v31 = vadd.f32 %v4891_v30, %v5921_v36  ;;  %v733_v32 = vpop.f32.mrb[39].mxu0 }
 0x151   : > { %v734_v33 = vadd.f32 %v5921_v36, %v733_v32  ;;  %4998 = vmatprep.mubr.msk.f32.mxu1 %vm941_vm0, %v898_v29 }
 0x152   : > { %v901_v34 = vmax.f32 %v739_v31, 0.0  ;;  %4999 = vmatmul.mubr.msk.f32.gmra.mrb[8].mxu1 %vm941_vm0, %v899_v28 }
 0x153   : > { %v900_v35 = vmax.f32 %v734_v33, 0.0  ;;  %v4894_v37 = vpop.f32.mrb[40].mxu0 }
 0x154   : > { %v749_v38 = vadd.f32 %v4894_v37, %v5921_v36  ;;  %v743_v39 = vpop.f32.mrb[41].mxu0 }
 0x155   : > { %v744_v40 = vadd.f32 %v5921_v36, %v743_v39  ;;  %5001 = vmatprep.mubr.msk.f32.mxu1 %vm941_vm0, %v900_v35 }
 0x156   : > { %v903_v41 = vmax.f32 %v749_v38, 0.0  ;;  %5002 = vmatmul.mubr.msk.f32.gmra.mrb[10].mxu1 %vm941_vm0, %v901_v34 }
 0x157   : > { %v902_v42 = vmax.f32 %v744_v40, 0.0  ;;  %v4897_v43 = vpop.f32.mrb[42].mxu0 }
 0x158   : > { %v759_v44 = vadd.f32 %v4897_v43, %v5921_v36  ;;  %v753_v46 = vpop.f32.mrb[43].mxu0 }
 0x159   : > { %v754_v47 = vadd.f32 %v5921_v36, %v753_v46  ;;  %5004 = vmatprep.mubr.msk.f32.mxu1 %vm941_vm0, %v902_v42 }
 0x15a   : > { %v905_v48 = vmax.f32 %v759_v44, 0.0  ;;  %5005 = vmatmul.mubr.msk.f32.gmra.mrb[12].mxu1 %vm941_vm0, %v903_v41 }
 0x15b   : > { %v904_v49 = vmax.f32 %v754_v47, 0.0  ;;  %v4900_v50 = vpop.f32.mrb[44].mxu0  ;;  %v6070_v47 = vld [vmem:[%s7149_s4] ss:$0 sm:$0xff] }
 0x15c   : > { %v769_v51 = vadd.f32 %v4900_v50, %v5921_v36  ;;  %v763_v52 = vpop.f32.mrb[45].mxu0 }
 0x15d   : > { %v764_v53 = vadd.f32 %v5921_v36, %v763_v52  ;;  %5007 = vmatprep.mubr.msk.f32.mxu1 %vm941_vm0, %v904_v49  ;;  %v2237_v52 = vld [vmem:[%s7152_s7 + $0x8] sm:$0xff] }
 0x15e   : > { %v907_v54 = vmax.f32 %v769_v51, 0.0  ;;  %5008 = vmatmul.mubr.msk.f32.gmra.mrb[14].mxu1 %vm941_vm0, %v905_v48  ;;  %v2236_v51 = vld [vmem:[%s7152_s7] sm:$0xff] }
 0x15f   : > { %v906_v55 = vmax.f32 %v764_v53, 0.0  ;;  %v4903_v56 = vpop.f32.mrb[46].mxu0  ;;  %v2238_v53 = vld [vmem:[%s7152_s7 + $0x10] sm:$0xff] }
 0x160   : > { %v779_v57 = vadd.f32 %v4903_v56, %v5921_v36  ;;  %v773_v58 = vpop.f32.mrb[47].mxu0  ;;  %v5408_v56 = vpack.c.bf16 %v2237_v52, %v2236_v51 }
 0x161   : > { %v774_v59 = vadd.f32 %v5921_v36, %v773_v58  ;;  %5010 = vmatprep.mubr.msk.f32.mxu1 %vm941_vm0, %v906_v55 }
 0x162   : > { %v909_v60 = vmax.f32 %v779_v57, 0.0  ;;  %5011 = vmatmul.mubr.msk.f32.gmra.mrb[16].mxu1 %vm941_vm0, %v907_v54  ;;  %v2239_v57 = vld [vmem:[%s7152_s7 + $0x18] sm:$0xff]  ;;  %5409 = vmatprep.subr.bf16.mxu0 %v5408_v56 }
 0x163   : > { %v908_v61 = vmax.f32 %v774_v59, 0.0  ;;  %v4906_v62 = vpop.f32.mrb[48].mxu0  ;;  %5411 = vmatpush3.bf16.msra.mxu0 %v5408_v56 }
 0x164   : > { %v789_v63 = vadd.f32 %v4906_v62, %v5921_v36  ;;  %v783_v0 = vpop.f32.mrb[49].mxu0 }
 0x165   : > { %v784_v1 = vadd.f32 %v5921_v36, %v783_v0  ;;  %5013 = vmatprep.mubr.msk.f32.mxu1 %vm941_vm0, %v908_v61  ;;  %v5412_v61 = vpack.c.bf16 %v2239_v57, %v2238_v53 }
 0x166   : > { %v911_v2 = vmax.f32 %v789_v63, 0.0  ;;  %5014 = vmatmul.mubr.msk.f32.gmra.mrb[18].mxu1 %vm941_vm0, %v909_v60 }
 0x167   : > { %v910_v3 = vmax.f32 %v784_v1, 0.0  ;;  %v4909_v4 = vpop.f32.mrb[50].mxu0  ;;  %5413 = vmatprep.subr.bf16.mxu0 %v5412_v61 }
 0x168   : > { %v799_v5 = vadd.f32 %v4909_v4, %v5921_v36  ;;  %v793_v6 = vpop.f32.mrb[51].mxu0  ;;  %5415 = vmatpush3.bf16.msra.mxu0 %v5412_v61 }
 0x169   : > { %v794_v7 = vadd.f32 %v5921_v36, %v793_v6  ;;  %5016 = vmatprep.mubr.msk.f32.mxu1 %vm941_vm0, %v910_v3 }
 0x16a   : > { %v913_v8 = vmax.f32 %v799_v5, 0.0  ;;  %5017 = vmatmul.mubr.msk.f32.gmra.mrb[20].mxu1 %vm941_vm0, %v911_v2 }
 0x16b   : > { %v912_v9 = vmax.f32 %v794_v7, 0.0  ;;  %v4912_v10 = vpop.f32.mrb[52].mxu0 }
 0x16c   : > { %v809_v11 = vadd.f32 %v4912_v10, %v5921_v36  ;;  %v803_v12 = vpop.f32.mrb[53].mxu0 }
 0x16d   : > { %v804_v13 = vadd.f32 %v5921_v36, %v803_v12  ;;  %5019 = vmatprep.mubr.msk.f32.mxu1 %vm941_vm0, %v912_v9 }
 0x16e   : > { %v915_v14 = vmax.f32 %v809_v11, 0.0  ;;  %5020 = vmatmul.mubr.msk.f32.gmra.mrb[22].mxu1 %vm941_vm0, %v913_v8 }
 0x16f   : > { %v914_v15 = vmax.f32 %v804_v13, 0.0  ;;  %v4915_v16 = vpop.f32.mrb[54].mxu0 }
 0x170   : > { %v819_v17 = vadd.f32 %v4915_v16, %v5921_v36  ;;  %v813_v18 = vpop.f32.mrb[55].mxu0 }
 0x171   : > { %v814_v19 = vadd.f32 %v5921_v36, %v813_v18  ;;  %5022 = vmatprep.mubr.msk.f32.mxu1 %vm941_vm0, %v914_v15 }
 0x172   : > { %v917_v20 = vmax.f32 %v819_v17, 0.0  ;;  %5023 = vmatmul.mubr.msk.f32.gmra.mrb[24].mxu1 %vm941_vm0, %v915_v14 }
 0x173   : > { %v916_v21 = vmax.f32 %v814_v19, 0.0  ;;  %v4918_v22 = vpop.f32.mrb[56].mxu0 }
 0x174   : > { %v829_v45 = vadd.f32 %v4918_v22, %v5921_v36  ;;  %v823_v23 = vpop.f32.mrb[57].mxu0 }
 0x175   : > { %v824_v24 = vadd.f32 %v5921_v36, %v823_v23  ;;  %5025 = vmatprep.mubr.msk.f32.mxu1 %vm941_vm0, %v916_v21 }
 0x176   : > { %v919_v25 = vmax.f32 %v829_v45, 0.0  ;;  %5026 = vmatmul.mubr.msk.f32.gmra.mrb[26].mxu1 %vm941_vm0, %v917_v20 }
 0x177   : > { %v918_v26 = vmax.f32 %v824_v24, 0.0  ;;  %v4921_v27 = vpop.f32.mrb[58].mxu0 }
 0x178   : > { %v839_v28 = vadd.f32 %v4921_v27, %v5921_v36  ;;  %v833_v29 = vpop.f32.mrb[59].mxu0 }
 0x179   : > { %v834_v30 = vadd.f32 %v5921_v36, %v833_v29  ;;  %5028 = vmatprep.mubr.msk.f32.mxu1 %vm941_vm0, %v918_v26 }
 0x17a   : > { %v921_v31 = vmax.f32 %v839_v28, 0.0  ;;  %5029 = vmatmul.mubr.msk.f32.gmra.mrb[28].mxu1 %vm941_vm0, %v919_v25 }
 0x17b   : > { %v920_v32 = vmax.f32 %v834_v30, 0.0  ;;  %v4924_v33 = vpop.f32.mrb[60].mxu0 }
 0x17c   : > { %v849_v34 = vadd.f32 %v4924_v33, %v5921_v36  ;;  %v843_v35 = vpop.f32.mrb[61].mxu0 }
 0x17d   : > { %v844_v37 = vadd.f32 %v5921_v36, %v843_v35  ;;  %5031 = vmatprep.mubr.msk.f32.mxu1 %vm941_vm0, %v920_v32 }
 0x17e   : > { %v923_v38 = vmax.f32 %v849_v34, 0.0  ;;  %5032 = vmatmul.mubr.msk.f32.gmra.mrb[30].mxu1 %vm941_vm0, %v921_v31 }
 0x17f   : > { %v922_v39 = vmax.f32 %v844_v37, 0.0  ;;  %v4927_v40 = vpop.f32.mrb[62].mxu0 }
 0x180   : > { %v859_v41 = vadd.f32 %v4927_v40, %v5921_v36  ;;  %v853_v42 = vpop.f32.mrb[63].mxu0 }
 0x181   : > { %v854_v43 = vadd.f32 %v5921_v36, %v853_v42  ;;  %5034 = vmatprep.mubr.msk.f32.mxu1 %vm941_vm0, %v922_v39 }
 0x182   : > { %v925_v44 = vmax.f32 %v859_v41, 0.0  ;;  %5035 = vmatmul.mubr.msk.f32.gmra.mrb[32].mxu1 %vm941_vm0, %v923_v38 }
 0x183   : > { %v924_v46 = vmax.f32 %v854_v43, 0.0 }
 0x185   : > { %5037 = vmatprep.mubr.msk.f32.mxu1 %vm941_vm0, %v924_v46 }
 0x186   : > { %5038 = vmatmul.mubr.msk.f32.gmra.mrb[34].mxu1 %vm941_vm0, %v925_v44 }
 0x1dd   : > { %v4946_v48 = vpop.f32.mrb[64].mxu0 }
 0x1de   : > { %v1206_v49 = vadd.f32 %v4946_v48, %v6070_v47  ;;  %v1200_v50 = vpop.f32.mrb[65].mxu0 }
 0x1df   : > { %v1201_v36 = vadd.f32 %v6070_v47, %v1200_v50 }
 0x1e0   : > { %v1520_v58 = vmax.f32 %v1206_v49, 0.0 }
 0x1e1   : > { %v1519_v54 = vmax.f32 %v1201_v36, 0.0  ;;  %v4949_v55 = vpop.f32.mrb[66].mxu0 }
 0x1e2   : > { %v1216_v59 = vadd.f32 %v4949_v55, %v6070_v47  ;;  %v1210_v60 = vpop.f32.mrb[67].mxu0 }
 0x1e3   : > { %v1211_v62 = vadd.f32 %v6070_v47, %v1210_v60  ;;  %5048 = vmatprep.mubr.msk.f32.mxu1 %vm1594_vm1, %v1519_v54 }
 0x1e4   : > { %5049 = vmatmul.mubr.msk.f32.vlgmr.msra.gmra.mrb[36].mxu1 %vm1594_vm1, %v1520_v58  ;;  %v1522_v1 = vmax.f32 %v1216_v59, 0.0 }
 0x1e5   : > { %v1521_v63 = vmax.f32 %v1211_v62, 0.0  ;;  %v4952_v0 = vpop.f32.mrb[68].mxu0 }
 0x1e6   : > { %v1226_v2 = vadd.f32 %v4952_v0, %v6070_v47  ;;  %v1220_v3 = vpop.f32.mrb[69].mxu0 }
 0x1e7   : > { %v1221_v4 = vadd.f32 %v6070_v47, %v1220_v3  ;;  %5051 = vmatprep.mubr.msk.f32.mxu1 %vm1594_vm1, %v1521_v63 }
 0x1e8   : > { %v1524_v5 = vmax.f32 %v1226_v2, 0.0  ;;  %5052 = vmatmul.mubr.msk.f32.gmra.mrb[38].mxu1 %vm1594_vm1, %v1522_v1 }
 0x1e9   : > { %v1523_v6 = vmax.f32 %v1221_v4, 0.0  ;;  %v4955_v7 = vpop.f32.mrb[70].mxu0 }
 0x1ea   : > { %v1236_v8 = vadd.f32 %v4955_v7, %v6070_v47  ;;  %v1230_v9 = vpop.f32.mrb[71].mxu0 }
 0x1eb   : > { %v1231_v10 = vadd.f32 %v6070_v47, %v1230_v9  ;;  %5054 = vmatprep.mubr.msk.f32.mxu1 %vm1594_vm1, %v1523_v6 }
 0x1ec   : > { %v1526_v11 = vmax.f32 %v1236_v8, 0.0  ;;  %5055 = vmatmul.mubr.msk.f32.gmra.mrb[40].mxu1 %vm1594_vm1, %v1524_v5 }
 0x1ed   : > { %v1525_v12 = vmax.f32 %v1231_v10, 0.0  ;;  %v4958_v13 = vpop.f32.mrb[72].mxu0 }
 0x1ee   : > { %v1246_v14 = vadd.f32 %v4958_v13, %v6070_v47  ;;  %v1240_v15 = vpop.f32.mrb[73].mxu0 }
 0x1ef   : > { %v1241_v16 = vadd.f32 %v6070_v47, %v1240_v15  ;;  %5057 = vmatprep.mubr.msk.f32.mxu1 %vm1594_vm1, %v1525_v12 }
 0x1f0   : > { %v1528_v17 = vmax.f32 %v1246_v14, 0.0  ;;  %5058 = vmatmul.mubr.msk.f32.gmra.mrb[42].mxu1 %vm1594_vm1, %v1526_v11 }
 0x1f1   : > { %v1527_v18 = vmax.f32 %v1241_v16, 0.0  ;;  %v4961_v19 = vpop.f32.mrb[74].mxu0 }
 0x1f2   : > { %v1256_v20 = vadd.f32 %v4961_v19, %v6070_v47  ;;  %v1250_v21 = vpop.f32.mrb[75].mxu0 }
 0x1f3   : > { %v1251_v22 = vadd.f32 %v6070_v47, %v1250_v21  ;;  %5060 = vmatprep.mubr.msk.f32.mxu1 %vm1594_vm1, %v1527_v18 }
 0x1f4   : > { %v1530_v45 = vmax.f32 %v1256_v20, 0.0  ;;  %5061 = vmatmul.mubr.msk.f32.gmra.mrb[44].mxu1 %vm1594_vm1, %v1528_v17 }
 0x1f5   : > { %v1529_v23 = vmax.f32 %v1251_v22, 0.0  ;;  %v4964_v24 = vpop.f32.mrb[76].mxu0 }
 0x1f6   : > { %v1266_v25 = vadd.f32 %v4964_v24, %v6070_v47  ;;  %v1260_v26 = vpop.f32.mrb[77].mxu0 }
 0x1f7   : > { %v1261_v27 = vadd.f32 %v6070_v47, %v1260_v26  ;;  %5063 = vmatprep.mubr.msk.f32.mxu1 %vm1594_vm1, %v1529_v23 }
 0x1f8   : > { %v1532_v28 = vmax.f32 %v1266_v25, 0.0  ;;  %5064 = vmatmul.mubr.msk.f32.gmra.mrb[46].mxu1 %vm1594_vm1, %v1530_v45 }
 0x1f9   : > { %v1531_v29 = vmax.f32 %v1261_v27, 0.0  ;;  %v4967_v30 = vpop.f32.mrb[78].mxu0 }
 0x1fa   : > { %v1276_v31 = vadd.f32 %v4967_v30, %v6070_v47  ;;  %v1270_v32 = vpop.f32.mrb[79].mxu0 }
 0x1fb   : > { %v1271_v33 = vadd.f32 %v6070_v47, %v1270_v32  ;;  %5066 = vmatprep.mubr.msk.f32.mxu1 %vm1594_vm1, %v1531_v29 }
 0x1fc   : > { %v1534_v34 = vmax.f32 %v1276_v31, 0.0  ;;  %5067 = vmatmul.mubr.msk.f32.gmra.mrb[48].mxu1 %vm1594_vm1, %v1532_v28 }
 0x1fd   : > { %v1533_v35 = vmax.f32 %v1271_v33, 0.0  ;;  %v4970_v37 = vpop.f32.mrb[80].mxu0 }
 0x1fe   : > { %v1286_v38 = vadd.f32 %v4970_v37, %v6070_v47  ;;  %v1280_v39 = vpop.f32.mrb[81].mxu0 }
 0x1ff   : > { %v1281_v40 = vadd.f32 %v6070_v47, %v1280_v39  ;;  %5069 = vmatprep.mubr.msk.f32.mxu1 %vm1594_vm1, %v1533_v35 }
 0x200   : > { %v1536_v41 = vmax.f32 %v1286_v38, 0.0  ;;  %5070 = vmatmul.mubr.msk.f32.gmra.mrb[50].mxu1 %vm1594_vm1, %v1534_v34 }
 0x201   : > { %v1535_v42 = vmax.f32 %v1281_v40, 0.0  ;;  %v4973_v43 = vpop.f32.mrb[82].mxu0 }
 0x202   : > { %v1296_v44 = vadd.f32 %v4973_v43, %v6070_v47  ;;  %v1290_v46 = vpop.f32.mrb[83].mxu0 }
 0x203   : > { %v1291_v48 = vadd.f32 %v6070_v47, %v1290_v46  ;;  %5072 = vmatprep.mubr.msk.f32.mxu1 %vm1594_vm1, %v1535_v42 }
 0x204   : > { %v1538_v49 = vmax.f32 %v1296_v44, 0.0  ;;  %5073 = vmatmul.mubr.msk.f32.gmra.mrb[52].mxu1 %vm1594_vm1, %v1536_v41 }
 0x205   : > { %v1537_v50 = vmax.f32 %v1291_v48, 0.0  ;;  %v4976_v36 = vpop.f32.mrb[84].mxu0 }
 0x206   : > { %v1306_v51 = vadd.f32 %v4976_v36, %v6070_v47  ;;  %v1300_v52 = vpop.f32.mrb[85].mxu0 }
 0x207   : > { %v1301_v53 = vadd.f32 %v6070_v47, %v1300_v52  ;;  %5075 = vmatprep.mubr.msk.f32.mxu1 %vm1594_vm1, %v1537_v50 }
 0x208   : > { %v1540_v54 = vmax.f32 %v1306_v51, 0.0  ;;  %5076 = vmatmul.mubr.msk.f32.gmra.mrb[54].mxu1 %vm1594_vm1, %v1538_v49 }
 0x209   : > { %v1539_v55 = vmax.f32 %v1301_v53, 0.0  ;;  %v4979_v56 = vpop.f32.mrb[86].mxu0 }
 0x20a   : > { %v1316_v57 = vadd.f32 %v4979_v56, %v6070_v47  ;;  %v1310_v58 = vpop.f32.mrb[87].mxu0 }
 0x20b   : > { %v1311_v59 = vadd.f32 %v6070_v47, %v1310_v58  ;;  %5078 = vmatprep.mubr.msk.f32.mxu1 %vm1594_vm1, %v1539_v55 }
 0x20c   : > { %v1542_v60 = vmax.f32 %v1316_v57, 0.0  ;;  %5079 = vmatmul.mubr.msk.f32.gmra.mrb[56].mxu1 %vm1594_vm1, %v1540_v54 }
 0x20d   : > { %v1541_v61 = vmax.f32 %v1311_v59, 0.0  ;;  %v4982_v62 = vpop.f32.mrb[88].mxu0 }
 0x20e   : > { %v1326_v63 = vadd.f32 %v4982_v62, %v6070_v47  ;;  %v1320_v0 = vpop.f32.mrb[89].mxu0 }
 0x20f   : > { %v1321_v1 = vadd.f32 %v6070_v47, %v1320_v0  ;;  %5081 = vmatprep.mubr.msk.f32.mxu1 %vm1594_vm1, %v1541_v61 }
 0x210   : > { %v1544_v2 = vmax.f32 %v1326_v63, 0.0  ;;  %5082 = vmatmul.mubr.msk.f32.gmra.mrb[58].mxu1 %vm1594_vm1, %v1542_v60 }
 0x211   : > { %v1543_v3 = vmax.f32 %v1321_v1, 0.0  ;;  %v4985_v4 = vpop.f32.mrb[90].mxu0 }
 0x212   : > { %v1336_v5 = vadd.f32 %v4985_v4, %v6070_v47  ;;  %v1330_v6 = vpop.f32.mrb[91].mxu0 }
 0x213   : > { %v1331_v7 = vadd.f32 %v6070_v47, %v1330_v6  ;;  %5084 = vmatprep.mubr.msk.f32.mxu1 %vm1594_vm1, %v1543_v3 }
 0x214   : > { %v1546_v8 = vmax.f32 %v1336_v5, 0.0  ;;  %5085 = vmatmul.mubr.msk.f32.gmra.mrb[60].mxu1 %vm1594_vm1, %v1544_v2 }
 0x215   : > { %v1545_v9 = vmax.f32 %v1331_v7, 0.0  ;;  %v4988_v10 = vpop.f32.mrb[0].mxu1 }
 0x216   : > { %v1346_v11 = vadd.f32 %v4988_v10, %v6070_v47  ;;  %v1340_v12 = vpop.f32.mrb[1].mxu1 }
 0x217   : > { %v1341_v13 = vadd.f32 %v6070_v47, %v1340_v12  ;;  %5087 = vmatprep.mubr.msk.f32.mxu1 %vm1594_vm1, %v1545_v9 }
 0x218   : > { %v1548_v14 = vmax.f32 %v1346_v11, 0.0  ;;  %5088 = vmatmul.mubr.msk.f32.gmra.mrb[62].mxu1 %vm1594_vm1, %v1546_v8 }
 0x219   : > { %v1547_v15 = vmax.f32 %v1341_v13, 0.0  ;;  %v4991_v16 = vpop.f32.mrb[2].mxu1 }
 0x21a   : > { %v1356_v17 = vadd.f32 %v4991_v16, %v6070_v47  ;;  %v1350_v18 = vpop.f32.mrb[3].mxu1 }
 0x21b   : > { %v1351_v19 = vadd.f32 %v6070_v47, %v1350_v18  ;;  %5090 = vmatprep.mubr.msk.f32.mxu1 %vm1594_vm1, %v1547_v15 }
 0x21c   : > { %v1550_v20 = vmax.f32 %v1356_v17, 0.0  ;;  %5091 = vmatmul.mubr.msk.f32.gmra.mrb[64].mxu1 %vm1594_vm1, %v1548_v14 }
 0x21d   : > { %v1549_v21 = vmax.f32 %v1351_v19, 0.0  ;;  %v4994_v22 = vpop.f32.mrb[4].mxu1 }
 0x21e   : > { %v1366_v45 = vadd.f32 %v4994_v22, %v6070_v47  ;;  %v1360_v23 = vpop.f32.mrb[5].mxu1 }
 0x21f   : > { %v1361_v24 = vadd.f32 %v6070_v47, %v1360_v23  ;;  %5093 = vmatprep.mubr.msk.f32.mxu1 %vm1594_vm1, %v1549_v21 }
 0x220   : > { %v1552_v25 = vmax.f32 %v1366_v45, 0.0  ;;  %5094 = vmatmul.mubr.msk.f32.gmra.mrb[66].mxu1 %vm1594_vm1, %v1550_v20 }
 0x221   : > { %v1551_v26 = vmax.f32 %v1361_v24, 0.0  ;;  %v4997_v27 = vpop.f32.mrb[6].mxu1 }
 0x222   : > { %v1376_v28 = vadd.f32 %v4997_v27, %v6070_v47  ;;  %v1370_v29 = vpop.f32.mrb[7].mxu1 }
 0x223   : > { %v1371_v30 = vadd.f32 %v6070_v47, %v1370_v29  ;;  %5096 = vmatprep.mubr.msk.f32.mxu1 %vm1594_vm1, %v1551_v26 }
 0x224   : > { %v1554_v31 = vmax.f32 %v1376_v28, 0.0  ;;  %5097 = vmatmul.mubr.msk.f32.gmra.mrb[68].mxu1 %vm1594_vm1, %v1552_v25 }
 0x225   : > { %v1553_v32 = vmax.f32 %v1371_v30, 0.0  ;;  %v5000_v33 = vpop.f32.mrb[8].mxu1 }
 0x226   : > { %v1386_v34 = vadd.f32 %v5000_v33, %v6070_v47  ;;  %v1380_v35 = vpop.f32.mrb[9].mxu1 }
 0x227   : > { %v1381_v37 = vadd.f32 %v6070_v47, %v1380_v35  ;;  %5099 = vmatprep.mubr.msk.f32.mxu1 %vm1594_vm1, %v1553_v32 }
 0x228   : > { %v1556_v38 = vmax.f32 %v1386_v34, 0.0  ;;  %5100 = vmatmul.mubr.msk.f32.gmra.mrb[70].mxu1 %vm1594_vm1, %v1554_v31 }
 0x229   : > { %v1555_v39 = vmax.f32 %v1381_v37, 0.0  ;;  %v5003_v40 = vpop.f32.mrb[10].mxu1 }
 0x22a   : > { %v1396_v41 = vadd.f32 %v5003_v40, %v6070_v47  ;;  %v1390_v42 = vpop.f32.mrb[11].mxu1 }
 0x22b   : > { %v1391_v43 = vadd.f32 %v6070_v47, %v1390_v42  ;;  %5102 = vmatprep.mubr.msk.f32.mxu1 %vm1594_vm1, %v1555_v39 }
 0x22c   : > { %v1558_v44 = vmax.f32 %v1396_v41, 0.0  ;;  %5103 = vmatmul.mubr.msk.f32.gmra.mrb[72].mxu1 %vm1594_vm1, %v1556_v38 }
 0x22d   : > { %v1557_v46 = vmax.f32 %v1391_v43, 0.0  ;;  %v5006_v48 = vpop.f32.mrb[12].mxu1 }
 0x22e   : > { %v1406_v49 = vadd.f32 %v5006_v48, %v6070_v47  ;;  %v1400_v50 = vpop.f32.mrb[13].mxu1 }
 0x22f   : > { %v1401_v36 = vadd.f32 %v6070_v47, %v1400_v50  ;;  %5105 = vmatprep.mubr.msk.f32.mxu1 %vm1594_vm1, %v1557_v46 }
 0x230   : > { %v1560_v51 = vmax.f32 %v1406_v49, 0.0  ;;  %5106 = vmatmul.mubr.msk.f32.gmra.mrb[74].mxu1 %vm1594_vm1, %v1558_v44 }
 0x231   : > { %v1559_v52 = vmax.f32 %v1401_v36, 0.0  ;;  %v5009_v53 = vpop.f32.mrb[14].mxu1 }
 0x232   : > { %v1416_v54 = vadd.f32 %v5009_v53, %v6070_v47  ;;  %v1410_v55 = vpop.f32.mrb[15].mxu1 }
 0x233   : > { %v1411_v56 = vadd.f32 %v6070_v47, %v1410_v55  ;;  %5108 = vmatprep.mubr.msk.f32.mxu1 %vm1594_vm1, %v1559_v52 }
 0x234   : > { %v1562_v57 = vmax.f32 %v1416_v54, 0.0  ;;  %5109 = vmatmul.mubr.msk.f32.gmra.mrb[76].mxu1 %vm1594_vm1, %v1560_v51 }
 0x235   : > { %v1561_v58 = vmax.f32 %v1411_v56, 0.0  ;;  %v5012_v59 = vpop.f32.mrb[16].mxu1  ;;  %v2888_v56 = vld [vmem:[%s7154_s9] sm:$0xff] }
 0x236   : > { %v1426_v60 = vadd.f32 %v5012_v59, %v6070_v47  ;;  %v1420_v61 = vpop.f32.mrb[17].mxu1 }
 0x237   : > { %v1421_v62 = vadd.f32 %v6070_v47, %v1420_v61  ;;  %5111 = vmatprep.mubr.msk.f32.mxu1 %vm1594_vm1, %v1561_v58 }
 0x238   : > { %v1564_v63 = vmax.f32 %v1426_v60, 0.0  ;;  %5112 = vmatmul.mubr.msk.f32.gmra.mrb[78].mxu1 %vm1594_vm1, %v1562_v57  ;;  %v2889_v57 = vld [vmem:[%s7154_s9 + $0x8] sm:$0xff] }
 0x239   : > { %v1563_v0 = vmax.f32 %v1421_v62, 0.0  ;;  %v5015_v1 = vpop.f32.mrb[18].mxu1  ;;  %v5416_v58 = vpack.c.bf16 %v2889_v57, %v2888_v56 }
 0x23a   : > { %v1436_v2 = vadd.f32 %v5015_v1, %v6070_v47  ;;  %v1430_v3 = vpop.f32.mrb[19].mxu1 }
 0x23b   : > { %v1431_v4 = vadd.f32 %v6070_v47, %v1430_v3  ;;  %5114 = vmatprep.mubr.msk.f32.mxu1 %vm1594_vm1, %v1563_v0  ;;  %5417 = vmatprep.subr.bf16.mxu1 %v5416_v58  ;;  %v2891_v0 = vld [vmem:[%s7154_s9 + $0x18] sm:$0xff] }
 0x23c   : > { %v1566_v5 = vmax.f32 %v1436_v2, 0.0  ;;  %5115 = vmatmul.mubr.msk.f32.gmra.mrb[80].mxu1 %vm1594_vm1, %v1564_v63  ;;  %v2890_v63 = vld [vmem:[%s7154_s9 + $0x10] sm:$0xff] }
 0x23d   : > { %v1565_v6 = vmax.f32 %v1431_v4, 0.0  ;;  %v5018_v7 = vpop.f32.mrb[20].mxu1  ;;  %5419 = vmatpush3.bf16.msra.mxu1 %v5416_v58  ;;  %v5420_v3 = vpack.c.bf16 %v2891_v0, %v2890_v63 }
 0x23e   : > { %v1446_v8 = vadd.f32 %v5018_v7, %v6070_v47  ;;  %v1440_v9 = vpop.f32.mrb[21].mxu1 }
 0x23f   : > { %v1441_v10 = vadd.f32 %v6070_v47, %v1440_v9  ;;  %5117 = vmatprep.mubr.msk.f32.mxu1 %vm1594_vm1, %v1565_v6  ;;  %5421 = vmatprep.subr.bf16.mxu1 %v5420_v3 }
 0x240   : > { %v1568_v11 = vmax.f32 %v1446_v8, 0.0  ;;  %5118 = vmatmul.mubr.msk.f32.gmra.mrb[82].mxu1 %vm1594_vm1, %v1566_v5 }
 0x241   : > { %v1567_v12 = vmax.f32 %v1441_v10, 0.0  ;;  %v5021_v13 = vpop.f32.mrb[22].mxu1  ;;  %5423 = vmatpush3.bf16.msra.mxu1 %v5420_v3 }
 0x242   : > { %v1456_v14 = vadd.f32 %v5021_v13, %v6070_v47  ;;  %v1450_v15 = vpop.f32.mrb[23].mxu1 }
 0x243   : > { %v1451_v16 = vadd.f32 %v6070_v47, %v1450_v15  ;;  %5120 = vmatprep.mubr.msk.f32.mxu1 %vm1594_vm1, %v1567_v12 }
 0x244   : > { %v1570_v17 = vmax.f32 %v1456_v14, 0.0  ;;  %5121 = vmatmul.mubr.msk.f32.gmra.mrb[84].mxu1 %vm1594_vm1, %v1568_v11 }
 0x245   : > { %v1569_v18 = vmax.f32 %v1451_v16, 0.0  ;;  %v5024_v19 = vpop.f32.mrb[24].mxu1 }
 0x246   : > { %v1466_v20 = vadd.f32 %v5024_v19, %v6070_v47  ;;  %v1460_v21 = vpop.f32.mrb[25].mxu1 }
 0x247   : > { %v1461_v22 = vadd.f32 %v6070_v47, %v1460_v21  ;;  %5123 = vmatprep.mubr.msk.f32.mxu1 %vm1594_vm1, %v1569_v18 }
 0x248   : > { %v1572_v45 = vmax.f32 %v1466_v20, 0.0  ;;  %5124 = vmatmul.mubr.msk.f32.gmra.mrb[86].mxu1 %vm1594_vm1, %v1570_v17 }
 0x249   : > { %v1571_v23 = vmax.f32 %v1461_v22, 0.0  ;;  %v5027_v24 = vpop.f32.mrb[26].mxu1 }
 0x24a   : > { %v1476_v25 = vadd.f32 %v5027_v24, %v6070_v47  ;;  %v1470_v26 = vpop.f32.mrb[27].mxu1 }
 0x24b   : > { %v1471_v27 = vadd.f32 %v6070_v47, %v1470_v26  ;;  %5126 = vmatprep.mubr.msk.f32.mxu1 %vm1594_vm1, %v1571_v23 }
 0x24c   : > { %v1574_v28 = vmax.f32 %v1476_v25, 0.0  ;;  %5127 = vmatmul.mubr.msk.f32.gmra.mrb[88].mxu1 %vm1594_vm1, %v1572_v45 }
 0x24d   : > { %v1573_v29 = vmax.f32 %v1471_v27, 0.0  ;;  %v5030_v30 = vpop.f32.mrb[28].mxu1 }
 0x24e   : > { %v1486_v31 = vadd.f32 %v5030_v30, %v6070_v47  ;;  %v1480_v32 = vpop.f32.mrb[29].mxu1 }
 0x24f   : > { %v1481_v33 = vadd.f32 %v6070_v47, %v1480_v32  ;;  %5129 = vmatprep.mubr.msk.f32.mxu1 %vm1594_vm1, %v1573_v29 }
 0x250   : > { %v1576_v34 = vmax.f32 %v1486_v31, 0.0  ;;  %5130 = vmatmul.mubr.msk.f32.gmra.mrb[90].mxu1 %vm1594_vm1, %v1574_v28 }
 0x251   : > { %v1575_v35 = vmax.f32 %v1481_v33, 0.0  ;;  %v5033_v37 = vpop.f32.mrb[30].mxu1 }
 0x252   : > { %v1496_v38 = vadd.f32 %v5033_v37, %v6070_v47  ;;  %v1490_v39 = vpop.f32.mrb[31].mxu1 }
 0x253   : > { %v1491_v40 = vadd.f32 %v6070_v47, %v1490_v39  ;;  %5132 = vmatprep.mubr.msk.f32.mxu1 %vm1594_vm1, %v1575_v35 }
 0x254   : > { %v1578_v41 = vmax.f32 %v1496_v38, 0.0  ;;  %5133 = vmatmul.mubr.msk.f32.gmra.mrb[92].mxu1 %vm1594_vm1, %v1576_v34 }
 0x255   : > { %v1577_v42 = vmax.f32 %v1491_v40, 0.0  ;;  %v5036_v43 = vpop.f32.mrb[32].mxu1 }
 0x256   : > { %v1506_v44 = vadd.f32 %v5036_v43, %v6070_v47  ;;  %v1500_v46 = vpop.f32.mrb[33].mxu1 }
 0x257   : > { %v1501_v48 = vadd.f32 %v6070_v47, %v1500_v46  ;;  %5135 = vmatprep.mubr.msk.f32.mxu1 %vm1594_vm1, %v1577_v42 }
 0x258   : > { %v1580_v49 = vmax.f32 %v1506_v44, 0.0  ;;  %5136 = vmatmul.mubr.msk.f32.gmra.mrb[94].mxu1 %vm1594_vm1, %v1578_v41 }
 0x259   : > { %v1579_v50 = vmax.f32 %v1501_v48, 0.0  ;;  %v5039_v36 = vpop.f32.mrb[34].mxu1 }
 0x25a   : > { %v1516_v51 = vadd.f32 %v5039_v36, %v6070_v47  ;;  %v1510_v52 = vpop.f32.mrb[35].mxu1 }
 0x25b   : > { %v1511_v53 = vadd.f32 %v6070_v47, %v1510_v52  ;;  %5138 = vmatprep.mubr.msk.f32.mxu1 %vm1594_vm1, %v1579_v50  ;;  %v6221_v47 = vld [vmem:[%s7151_s6] ss:$0 sm:$0xff] }
 0x25c   : > { %v1582_v54 = vmax.f32 %v1516_v51, 0.0  ;;  %5139 = vmatmul.mubr.msk.f32.gmra.mrb[96].mxu1 %vm1594_vm1, %v1580_v49 }
 0x25d   : > { %v1581_v55 = vmax.f32 %v1511_v53, 0.0 }
 0x25f   : > { %5141 = vmatprep.mubr.msk.f32.mxu1 %vm1594_vm1, %v1581_v55 }
 0x260   : > { %5142 = vmatmul.mubr.msk.f32.gmra.mrb[98].mxu1 %vm1594_vm1, %v1582_v54 }
 0x2b7   : > { %v5050_v59 = vpop.f32.mrb[36].mxu1 }
 0x2b8   : > { %v1859_v60 = vadd.f32 %v5050_v59, %v6221_v47  ;;  %v1853_v61 = vpop.f32.mrb[37].mxu1 }
 0x2b9   : > { %v1854_v62 = vadd.f32 %v6221_v47, %v1853_v61 }
 0x2ba   : > { %v2173_v4 = vmax.f32 %v1859_v60, 0.0 }
 0x2bb   : > { %v2172_v1 = vmax.f32 %v1854_v62, 0.0  ;;  %v5053_v2 = vpop.f32.mrb[38].mxu1 }
 0x2bc   : > { %v1869_v5 = vadd.f32 %v5053_v2, %v6221_v47  ;;  %v1863_v6 = vpop.f32.mrb[39].mxu1 }
 0x2bd   : > { %v1864_v7 = vadd.f32 %v6221_v47, %v1863_v6  ;;  %5152 = vmatprep.mubr.msk.f32.mxu0 %vm1594_vm1, %v2172_v1 }
 0x2be   : > { %5153 = vmatmul.mubr.msk.f32.vlgmr.msra.gmra.mrb[92].mxu0 %vm1594_vm1, %v2173_v4  ;;  %v2175_v10 = vmax.f32 %v1869_v5, 0.0 }
 0x2bf   : > { %v2174_v8 = vmax.f32 %v1864_v7, 0.0  ;;  %v5056_v9 = vpop.f32.mrb[40].mxu1 }
 0x2c0   : > { %v1879_v11 = vadd.f32 %v5056_v9, %v6221_v47  ;;  %v1873_v12 = vpop.f32.mrb[41].mxu1 }
 0x2c1   : > { %v1874_v13 = vadd.f32 %v6221_v47, %v1873_v12  ;;  %5155 = vmatprep.mubr.msk.f32.mxu0 %vm1594_vm1, %v2174_v8 }
 0x2c2   : > { %5156 = vmatmul.mubr.msk.f32.gmra.mrb[94].mxu0 %vm1594_vm1, %v2175_v10  ;;  %v2177_v16 = vmax.f32 %v1879_v11, 0.0 }
 0x2c3   : > { %v2176_v14 = vmax.f32 %v1874_v13, 0.0  ;;  %v5059_v15 = vpop.f32.mrb[42].mxu1 }
 0x2c4   : > { %v1889_v17 = vadd.f32 %v5059_v15, %v6221_v47  ;;  %v1883_v18 = vpop.f32.mrb[43].mxu1 }
 0x2c5   : > { %v1884_v19 = vadd.f32 %v6221_v47, %v1883_v18  ;;  %5158 = vmatprep.mubr.msk.f32.mxu0 %vm1594_vm1, %v2176_v14 }
 0x2c6   : > { %5159 = vmatmul.mubr.msk.f32.gmra.mrb[96].mxu0 %vm1594_vm1, %v2177_v16  ;;  %v2179_v22 = vmax.f32 %v1889_v17, 0.0 }
 0x2c7   : > { %v2178_v20 = vmax.f32 %v1884_v19, 0.0  ;;  %v5062_v21 = vpop.f32.mrb[44].mxu1 }
 0x2c8   : > { %v1899_v45 = vadd.f32 %v5062_v21, %v6221_v47  ;;  %v1893_v23 = vpop.f32.mrb[45].mxu1 }
 0x2c9   : > { %v1894_v24 = vadd.f32 %v6221_v47, %v1893_v23  ;;  %5161 = vmatprep.mubr.msk.f32.mxu0 %vm1594_vm1, %v2178_v20 }
 0x2ca   : > { %5162 = vmatmul.mubr.msk.f32.gmra.mrb[98].mxu0 %vm1594_vm1, %v2179_v22  ;;  %v2181_v27 = vmax.f32 %v1899_v45, 0.0 }
 0x2cb   : > { %v2180_v25 = vmax.f32 %v1894_v24, 0.0  ;;  %v5065_v26 = vpop.f32.mrb[46].mxu1 }
 0x2cc   : > { %v1909_v28 = vadd.f32 %v5065_v26, %v6221_v47  ;;  %v1903_v29 = vpop.f32.mrb[47].mxu1 }
 0x2cd   : > { %v1904_v30 = vadd.f32 %v6221_v47, %v1903_v29  ;;  %5164 = vmatprep.mubr.msk.f32.mxu0 %vm1594_vm1, %v2180_v25 }
 0x2ce   : > { %5165 = vmatmul.mubr.msk.f32.gmra.mrb[100].mxu0 %vm1594_vm1, %v2181_v27  ;;  %v2183_v33 = vmax.f32 %v1909_v28, 0.0 }
 0x2cf   : > { %v2182_v31 = vmax.f32 %v1904_v30, 0.0  ;;  %v5068_v32 = vpop.f32.mrb[48].mxu1 }
 0x2d0   : > { %v1919_v34 = vadd.f32 %v5068_v32, %v6221_v47  ;;  %v1913_v35 = vpop.f32.mrb[49].mxu1 }
 0x2d1   : > { %v1914_v37 = vadd.f32 %v6221_v47, %v1913_v35  ;;  %5167 = vmatprep.mubr.msk.f32.mxu0 %vm1594_vm1, %v2182_v31 }
 0x2d2   : > { %5168 = vmatmul.mubr.msk.f32.gmra.mrb[102].mxu0 %vm1594_vm1, %v2183_v33  ;;  %v2185_v40 = vmax.f32 %v1919_v34, 0.0 }
 0x2d3   : > { %v2184_v38 = vmax.f32 %v1914_v37, 0.0  ;;  %v5071_v39 = vpop.f32.mrb[50].mxu1 }
 0x2d4   : > { %v1929_v41 = vadd.f32 %v5071_v39, %v6221_v47  ;;  %v1923_v42 = vpop.f32.mrb[51].mxu1 }
 0x2d5   : > { %v1924_v43 = vadd.f32 %v6221_v47, %v1923_v42  ;;  %5170 = vmatprep.mubr.msk.f32.mxu0 %vm1594_vm1, %v2184_v38 }
 0x2d6   : > { %5171 = vmatmul.mubr.msk.f32.gmra.mrb[104].mxu0 %vm1594_vm1, %v2185_v40  ;;  %v2187_v48 = vmax.f32 %v1929_v41, 0.0 }
 0x2d7   : > { %v2186_v44 = vmax.f32 %v1924_v43, 0.0  ;;  %v5074_v46 = vpop.f32.mrb[52].mxu1 }
 0x2d8   : > { %v1939_v49 = vadd.f32 %v5074_v46, %v6221_v47  ;;  %v1933_v50 = vpop.f32.mrb[53].mxu1 }
 0x2d9   : > { %v1934_v36 = vadd.f32 %v6221_v47, %v1933_v50  ;;  %5173 = vmatprep.mubr.msk.f32.mxu0 %vm1594_vm1, %v2186_v44 }
 0x2da   : > { %5174 = vmatmul.mubr.msk.f32.gmra.mrb[106].mxu0 %vm1594_vm1, %v2187_v48  ;;  %v2189_v53 = vmax.f32 %v1939_v49, 0.0 }
 0x2db   : > { %v2188_v51 = vmax.f32 %v1934_v36, 0.0  ;;  %v5077_v52 = vpop.f32.mrb[54].mxu1 }
 0x2dc   : > { %v1949_v54 = vadd.f32 %v5077_v52, %v6221_v47  ;;  %v1943_v55 = vpop.f32.mrb[55].mxu1 }
 0x2dd   : > { %v1944_v56 = vadd.f32 %v6221_v47, %v1943_v55  ;;  %5176 = vmatprep.mubr.msk.f32.mxu0 %vm1594_vm1, %v2188_v51 }
 0x2de   : > { %5177 = vmatmul.mubr.msk.f32.gmra.mrb[108].mxu0 %vm1594_vm1, %v2189_v53  ;;  %v2191_v59 = vmax.f32 %v1949_v54, 0.0 }
 0x2df   : > { %v2190_v57 = vmax.f32 %v1944_v56, 0.0  ;;  %v5080_v58 = vpop.f32.mrb[56].mxu1 }
 0x2e0   : > { %v1959_v60 = vadd.f32 %v5080_v58, %v6221_v47  ;;  %v1953_v61 = vpop.f32.mrb[57].mxu1 }
 0x2e1   : > { %v1954_v62 = vadd.f32 %v6221_v47, %v1953_v61  ;;  %5179 = vmatprep.mubr.msk.f32.mxu0 %vm1594_vm1, %v2190_v57 }
 0x2e2   : > { %5180 = vmatmul.mubr.msk.f32.gmra.mrb[110].mxu0 %vm1594_vm1, %v2191_v59  ;;  %v2193_v1 = vmax.f32 %v1959_v60, 0.0 }
 0x2e3   : > { %v2192_v63 = vmax.f32 %v1954_v62, 0.0  ;;  %v5083_v0 = vpop.f32.mrb[58].mxu1 }
 0x2e4   : > { %v1969_v2 = vadd.f32 %v5083_v0, %v6221_v47  ;;  %v1963_v3 = vpop.f32.mrb[59].mxu1 }
 0x2e5   : > { %v1964_v4 = vadd.f32 %v6221_v47, %v1963_v3  ;;  %5182 = vmatprep.mubr.msk.f32.mxu0 %vm1594_vm1, %v2192_v63 }
 0x2e6   : > { %5183 = vmatmul.mubr.msk.f32.gmra.mrb[112].mxu0 %vm1594_vm1, %v2193_v1  ;;  %v2195_v7 = vmax.f32 %v1969_v2, 0.0 }
 0x2e7   : > { %v2194_v5 = vmax.f32 %v1964_v4, 0.0  ;;  %v5086_v6 = vpop.f32.mrb[60].mxu1 }
 0x2e8   : > { %v1979_v8 = vadd.f32 %v5086_v6, %v6221_v47  ;;  %v1973_v9 = vpop.f32.mrb[61].mxu1 }
 0x2e9   : > { %v1974_v10 = vadd.f32 %v6221_v47, %v1973_v9  ;;  %5185 = vmatprep.mubr.msk.f32.mxu0 %vm1594_vm1, %v2194_v5 }
 0x2ea   : > { %5186 = vmatmul.mubr.msk.f32.gmra.mrb[114].mxu0 %vm1594_vm1, %v2195_v7  ;;  %v2197_v13 = vmax.f32 %v1979_v8, 0.0 }
 0x2eb   : > { %v2196_v11 = vmax.f32 %v1974_v10, 0.0  ;;  %v5089_v12 = vpop.f32.mrb[62].mxu1 }
 0x2ec   : > { %v1989_v14 = vadd.f32 %v5089_v12, %v6221_v47  ;;  %v1983_v15 = vpop.f32.mrb[63].mxu1 }
 0x2ed   : > { %v1984_v16 = vadd.f32 %v6221_v47, %v1983_v15  ;;  %5188 = vmatprep.mubr.msk.f32.mxu0 %vm1594_vm1, %v2196_v11 }
 0x2ee   : > { %5189 = vmatmul.mubr.msk.f32.gmra.mrb[116].mxu0 %vm1594_vm1, %v2197_v13  ;;  %v2199_v19 = vmax.f32 %v1989_v14, 0.0 }
 0x2ef   : > { %v2198_v17 = vmax.f32 %v1984_v16, 0.0  ;;  %v5092_v18 = vpop.f32.mrb[64].mxu1 }
 0x2f0   : > { %v1999_v20 = vadd.f32 %v5092_v18, %v6221_v47  ;;  %v1993_v21 = vpop.f32.mrb[65].mxu1 }
 0x2f1   : > { %v1994_v22 = vadd.f32 %v6221_v47, %v1993_v21  ;;  %5191 = vmatprep.mubr.msk.f32.mxu0 %vm1594_vm1, %v2198_v17 }
 0x2f2   : > { %5192 = vmatmul.mubr.msk.f32.gmra.mrb[118].mxu0 %vm1594_vm1, %v2199_v19  ;;  %v2201_v24 = vmax.f32 %v1999_v20, 0.0 }
 0x2f3   : > { %v2200_v45 = vmax.f32 %v1994_v22, 0.0  ;;  %v5095_v23 = vpop.f32.mrb[66].mxu1 }
 0x2f4   : > { %v2009_v25 = vadd.f32 %v5095_v23, %v6221_v47  ;;  %v2003_v26 = vpop.f32.mrb[67].mxu1 }
 0x2f5   : > { %v2004_v27 = vadd.f32 %v6221_v47, %v2003_v26  ;;  %5194 = vmatprep.mubr.msk.f32.mxu0 %vm1594_vm1, %v2200_v45 }
 0x2f6   : > { %5195 = vmatmul.mubr.msk.f32.gmra.mrb[120].mxu0 %vm1594_vm1, %v2201_v24  ;;  %v2203_v30 = vmax.f32 %v2009_v25, 0.0 }
 0x2f7   : > { %v2202_v28 = vmax.f32 %v2004_v27, 0.0  ;;  %v5098_v29 = vpop.f32.mrb[68].mxu1 }
 0x2f8   : > { %v2019_v31 = vadd.f32 %v5098_v29, %v6221_v47  ;;  %v2013_v32 = vpop.f32.mrb[69].mxu1 }
 0x2f9   : > { %v2014_v33 = vadd.f32 %v6221_v47, %v2013_v32  ;;  %5197 = vmatprep.mubr.msk.f32.mxu0 %vm1594_vm1, %v2202_v28 }
 0x2fa   : > { %5198 = vmatmul.mubr.msk.f32.gmra.mrb[122].mxu0 %vm1594_vm1, %v2203_v30  ;;  %v2205_v37 = vmax.f32 %v2019_v31, 0.0 }
 0x2fb   : > { %v2204_v34 = vmax.f32 %v2014_v33, 0.0  ;;  %v5101_v35 = vpop.f32.mrb[70].mxu1 }
 0x2fc   : > { %v2029_v38 = vadd.f32 %v5101_v35, %v6221_v47  ;;  %v2023_v39 = vpop.f32.mrb[71].mxu1 }
 0x2fd   : > { %v2024_v40 = vadd.f32 %v6221_v47, %v2023_v39  ;;  %5200 = vmatprep.mubr.msk.f32.mxu0 %vm1594_vm1, %v2204_v34 }
 0x2fe   : > { %5201 = vmatmul.mubr.msk.f32.gmra.mrb[124].mxu0 %vm1594_vm1, %v2205_v37  ;;  %v2207_v43 = vmax.f32 %v2029_v38, 0.0 }
 0x2ff   : > { %v2206_v41 = vmax.f32 %v2024_v40, 0.0  ;;  %v5104_v42 = vpop.f32.mrb[72].mxu1 }
 0x300   : > { %v2039_v44 = vadd.f32 %v5104_v42, %v6221_v47  ;;  %v2033_v46 = vpop.f32.mrb[73].mxu1 }
 0x301   : > { %v2034_v48 = vadd.f32 %v6221_v47, %v2033_v46  ;;  %5203 = vmatprep.mubr.msk.f32.mxu0 %vm1594_vm1, %v2206_v41 }
 0x302   : > { %5204 = vmatmul.mubr.msk.f32.gmra.mrb[126].mxu0 %vm1594_vm1, %v2207_v43  ;;  %v2209_v36 = vmax.f32 %v2039_v44, 0.0 }
 0x303   : > { %v2208_v49 = vmax.f32 %v2034_v48, 0.0  ;;  %v5107_v50 = vpop.f32.mrb[74].mxu1 }
 0x304   : > { %v2049_v51 = vadd.f32 %v5107_v50, %v6221_v47  ;;  %v2043_v52 = vpop.f32.mrb[75].mxu1 }
 0x305   : > { %v2044_v53 = vadd.f32 %v6221_v47, %v2043_v52  ;;  %5206 = vmatprep.mubr.msk.f32.mxu0 %vm1594_vm1, %v2208_v49 }
 0x306   : > { %5207 = vmatmul.mubr.msk.f32.gmra.mrb[128].mxu0 %vm1594_vm1, %v2209_v36  ;;  %v2211_v56 = vmax.f32 %v2049_v51, 0.0 }
 0x307   : > { %v2210_v54 = vmax.f32 %v2044_v53, 0.0  ;;  %v5110_v55 = vpop.f32.mrb[76].mxu1 }
 0x308   : > { %v2059_v57 = vadd.f32 %v5110_v55, %v6221_v47  ;;  %v2053_v58 = vpop.f32.mrb[77].mxu1 }
 0x309   : > { %v2054_v59 = vadd.f32 %v6221_v47, %v2053_v58  ;;  %5209 = vmatprep.mubr.msk.f32.mxu0 %vm1594_vm1, %v2210_v54 }
 0x30a   : > { %5210 = vmatmul.mubr.msk.f32.gmra.mrb[130].mxu0 %vm1594_vm1, %v2211_v56  ;;  %v2213_v62 = vmax.f32 %v2059_v57, 0.0 }
 0x30b   : > { %v2212_v60 = vmax.f32 %v2054_v59, 0.0  ;;  %v5113_v61 = vpop.f32.mrb[78].mxu1 }
 0x30c   : > { %v2069_v63 = vadd.f32 %v5113_v61, %v6221_v47  ;;  %v2063_v0 = vpop.f32.mrb[79].mxu1 }
 0x30d   : > { %v2064_v1 = vadd.f32 %v6221_v47, %v2063_v0  ;;  %5212 = vmatprep.mubr.msk.f32.mxu0 %vm1594_vm1, %v2212_v60 }
 0x30e   : > { %5213 = vmatmul.mubr.msk.f32.gmra.mrb[132].mxu0 %vm1594_vm1, %v2213_v62  ;;  %v2215_v4 = vmax.f32 %v2069_v63, 0.0 }
 0x30f   : > { %v2214_v2 = vmax.f32 %v2064_v1, 0.0  ;;  %v5116_v3 = vpop.f32.mrb[80].mxu1  ;;  %v6360_v1 = vld [vmem:[%s7153_s8] ss:$0 sm:$0xff] }
 0x310   : > { %v2079_v5 = vadd.f32 %v5116_v3, %v6221_v47  ;;  %v2073_v6 = vpop.f32.mrb[81].mxu1 }
 0x311   : > { %v2074_v7 = vadd.f32 %v6221_v47, %v2073_v6  ;;  %5215 = vmatprep.mubr.msk.f32.mxu0 %vm1594_vm1, %v2214_v2 }
 0x312   : > { %5216 = vmatmul.mubr.msk.f32.gmra.mrb[134].mxu0 %vm1594_vm1, %v2215_v4  ;;  %v2217_v10 = vmax.f32 %v2079_v5, 0.0 }
 0x313   : > { %v2216_v8 = vmax.f32 %v2074_v7, 0.0  ;;  %v5119_v9 = vpop.f32.mrb[82].mxu1 }
 0x314   : > { %v2089_v11 = vadd.f32 %v5119_v9, %v6221_v47  ;;  %v2083_v12 = vpop.f32.mrb[83].mxu1 }
 0x315   : > { %v2084_v13 = vadd.f32 %v6221_v47, %v2083_v12  ;;  %5218 = vmatprep.mubr.msk.f32.mxu0 %vm1594_vm1, %v2216_v8 }
 0x316   : > { %5219 = vmatmul.mubr.msk.f32.gmra.mrb[136].mxu0 %vm1594_vm1, %v2217_v10  ;;  %v2219_v16 = vmax.f32 %v2089_v11, 0.0 }
 0x317   : > { %v2218_v14 = vmax.f32 %v2084_v13, 0.0  ;;  %v5122_v15 = vpop.f32.mrb[84].mxu1 }
 0x318   : > { %v2099_v17 = vadd.f32 %v5122_v15, %v6221_v47  ;;  %v2093_v18 = vpop.f32.mrb[85].mxu1 }
 0x319   : > { %v2094_v19 = vadd.f32 %v6221_v47, %v2093_v18  ;;  %5221 = vmatprep.mubr.msk.f32.mxu0 %vm1594_vm1, %v2218_v14 }
 0x31a   : > { %5222 = vmatmul.mubr.msk.f32.gmra.mrb[138].mxu0 %vm1594_vm1, %v2219_v16  ;;  %v2221_v22 = vmax.f32 %v2099_v17, 0.0 }
 0x31b   : > { %v2220_v20 = vmax.f32 %v2094_v19, 0.0  ;;  %v5125_v21 = vpop.f32.mrb[86].mxu1 }
 0x31c   : > { %v2109_v45 = vadd.f32 %v5125_v21, %v6221_v47  ;;  %v2103_v23 = vpop.f32.mrb[87].mxu1 }
 0x31d   : > { %v2104_v24 = vadd.f32 %v6221_v47, %v2103_v23  ;;  %5224 = vmatprep.mubr.msk.f32.mxu0 %vm1594_vm1, %v2220_v20 }
 0x31e   : > { %5225 = vmatmul.mubr.msk.f32.gmra.mrb[140].mxu0 %vm1594_vm1, %v2221_v22  ;;  %v2223_v27 = vmax.f32 %v2109_v45, 0.0 }
 0x31f   : > { %v2222_v25 = vmax.f32 %v2104_v24, 0.0  ;;  %v5128_v26 = vpop.f32.mrb[88].mxu1 }
 0x320   : > { %v2119_v28 = vadd.f32 %v5128_v26, %v6221_v47  ;;  %v2113_v29 = vpop.f32.mrb[89].mxu1 }
 0x321   : > { %v2114_v30 = vadd.f32 %v6221_v47, %v2113_v29  ;;  %5227 = vmatprep.mubr.msk.f32.mxu0 %vm1594_vm1, %v2222_v25 }
 0x322   : > { %5228 = vmatmul.mubr.msk.f32.gmra.mrb[142].mxu0 %vm1594_vm1, %v2223_v27  ;;  %v2225_v33 = vmax.f32 %v2119_v28, 0.0 }
 0x323   : > { %v2224_v31 = vmax.f32 %v2114_v30, 0.0  ;;  %v5131_v32 = vpop.f32.mrb[90].mxu1 }
 0x324   : > { %v2129_v34 = vadd.f32 %v5131_v32, %v6221_v47  ;;  %v2123_v35 = vpop.f32.mrb[91].mxu1 }
 0x325   : > { %v2124_v37 = vadd.f32 %v6221_v47, %v2123_v35  ;;  %5230 = vmatprep.mubr.msk.f32.mxu0 %vm1594_vm1, %v2224_v31 }
 0x326   : > { %5231 = vmatmul.mubr.msk.f32.gmra.mrb[144].mxu0 %vm1594_vm1, %v2225_v33  ;;  %v2227_v40 = vmax.f32 %v2129_v34, 0.0 }
 0x327   : > { %v2226_v38 = vmax.f32 %v2124_v37, 0.0  ;;  %v5134_v39 = vpop.f32.mrb[92].mxu1 }
 0x328   : > { %v2139_v41 = vadd.f32 %v5134_v39, %v6221_v47  ;;  %v2133_v42 = vpop.f32.mrb[93].mxu1 }
 0x329   : > { %v2134_v43 = vadd.f32 %v6221_v47, %v2133_v42  ;;  %5233 = vmatprep.mubr.msk.f32.mxu0 %vm1594_vm1, %v2226_v38 }
 0x32a   : > { %5234 = vmatmul.mubr.msk.f32.gmra.mrb[146].mxu0 %vm1594_vm1, %v2227_v40  ;;  %v2229_v48 = vmax.f32 %v2139_v41, 0.0 }
 0x32b   : > { %v2228_v44 = vmax.f32 %v2134_v43, 0.0  ;;  %v5137_v46 = vpop.f32.mrb[94].mxu1 }
 0x32c   : > { %v2149_v49 = vadd.f32 %v5137_v46, %v6221_v47  ;;  %v2143_v50 = vpop.f32.mrb[95].mxu1 }
 0x32d   : > { %v2144_v36 = vadd.f32 %v6221_v47, %v2143_v50  ;;  %5236 = vmatprep.mubr.msk.f32.mxu0 %vm1594_vm1, %v2228_v44 }
 0x32e   : > { %5237 = vmatmul.mubr.msk.f32.gmra.mrb[148].mxu0 %vm1594_vm1, %v2229_v48  ;;  %v2231_v53 = vmax.f32 %v2149_v49, 0.0 }
 0x32f   : > { %v2230_v51 = vmax.f32 %v2144_v36, 0.0  ;;  %v5140_v52 = vpop.f32.mrb[96].mxu1 }
 0x330   : > { %v2159_v54 = vadd.f32 %v5140_v52, %v6221_v47  ;;  %v2153_v55 = vpop.f32.mrb[97].mxu1 }
 0x331   : > { %v2154_v56 = vadd.f32 %v6221_v47, %v2153_v55  ;;  %5239 = vmatprep.mubr.msk.f32.mxu0 %vm1594_vm1, %v2230_v51 }
 0x332   : > { %5240 = vmatmul.mubr.msk.f32.gmra.mrb[150].mxu0 %vm1594_vm1, %v2231_v53  ;;  %v2233_v59 = vmax.f32 %v2159_v54, 0.0 }
 0x333   : > { %v2232_v57 = vmax.f32 %v2154_v56, 0.0  ;;  %v5143_v58 = vpop.f32.mrb[98].mxu1 }
 0x334   : > { %v2169_v60 = vadd.f32 %v5143_v58, %v6221_v47  ;;  %v2163_v61 = vpop.f32.mrb[99].mxu1 }
 0x335   : > { %v2164_v62 = vadd.f32 %v6221_v47, %v2163_v61  ;;  %5242 = vmatprep.mubr.msk.f32.mxu0 %vm1594_vm1, %v2232_v57 }
 0x336   : > { %5243 = vmatmul.mubr.msk.f32.gmra.mrb[152].mxu0 %vm1594_vm1, %v2233_v59  ;;  %v2235_v0 = vmax.f32 %v2169_v60, 0.0 }
 0x337   : > { %v2234_v63 = vmax.f32 %v2164_v62, 0.0 }
 0x339   : > { %5245 = vmatprep.mubr.msk.f32.mxu0 %vm1594_vm1, %v2234_v63 }
 0x33a   : > { %5246 = vmatmul.mubr.msk.f32.gmra.mrb[154].mxu0 %vm1594_vm1, %v2235_v0 }
 0x391   : > { %v5154_v2 = vpop.f32.mrb[92].mxu0 }
 0x392   : > { %v2511_v3 = vadd.f32 %v5154_v2, %v6360_v1  ;;  %v2505_v4 = vpop.f32.mrb[93].mxu0 }
 0x393   : > { %v2506_v47 = vadd.f32 %v6360_v1, %v2505_v4 }
 0x394   : > { %v2825_v7 = vmax.f32 %v2511_v3, 0.0 }
 0x395   : > { %v2824_v5 = vmax.f32 %v2506_v47, 0.0  ;;  %v5157_v6 = vpop.f32.mrb[94].mxu0 }
 0x396   : > { %v2521_v8 = vadd.f32 %v5157_v6, %v6360_v1  ;;  %v2515_v9 = vpop.f32.mrb[95].mxu0 }
 0x397   : > { %v2516_v10 = vadd.f32 %v6360_v1, %v2515_v9  ;;  %5256 = vmatprep.mubr.msk.f32.mxu1 %vm1594_vm1, %v2824_v5 }
 0x398   : > { %5257 = vmatmul.mubr.msk.f32.vlgmr.msra.gmra.mrb[100].mxu1 %vm1594_vm1, %v2825_v7  ;;  %v2827_v13 = vmax.f32 %v2521_v8, 0.0 }
 0x399   : > { %v2826_v11 = vmax.f32 %v2516_v10, 0.0  ;;  %v5160_v12 = vpop.f32.mrb[96].mxu0 }
 0x39a   : > { %v2531_v14 = vadd.f32 %v5160_v12, %v6360_v1  ;;  %v2525_v15 = vpop.f32.mrb[97].mxu0 }
 0x39b   : > { %v2526_v16 = vadd.f32 %v6360_v1, %v2525_v15  ;;  %5259 = vmatprep.mubr.msk.f32.mxu1 %vm1594_vm1, %v2826_v11 }
 0x39c   : > { %5260 = vmatmul.mubr.msk.f32.gmra.mrb[102].mxu1 %vm1594_vm1, %v2827_v13  ;;  %v2829_v19 = vmax.f32 %v2531_v14, 0.0 }
 0x39d   : > { %v2828_v17 = vmax.f32 %v2526_v16, 0.0  ;;  %v5163_v18 = vpop.f32.mrb[98].mxu0 }
 0x39e   : > { %v2541_v20 = vadd.f32 %v5163_v18, %v6360_v1  ;;  %v2535_v21 = vpop.f32.mrb[99].mxu0 }
 0x39f   : > { %v2536_v22 = vadd.f32 %v6360_v1, %v2535_v21  ;;  %5262 = vmatprep.mubr.msk.f32.mxu1 %vm1594_vm1, %v2828_v17 }
 0x3a0   : > { %5263 = vmatmul.mubr.msk.f32.gmra.mrb[104].mxu1 %vm1594_vm1, %v2829_v19  ;;  %v2831_v24 = vmax.f32 %v2541_v20, 0.0 }
 0x3a1   : > { %v2830_v45 = vmax.f32 %v2536_v22, 0.0  ;;  %v5166_v23 = vpop.f32.mrb[100].mxu0 }
 0x3a2   : > { %v2551_v25 = vadd.f32 %v5166_v23, %v6360_v1  ;;  %v2545_v26 = vpop.f32.mrb[101].mxu0 }
 0x3a3   : > { %v2546_v27 = vadd.f32 %v6360_v1, %v2545_v26  ;;  %5265 = vmatprep.mubr.msk.f32.mxu1 %vm1594_vm1, %v2830_v45 }
 0x3a4   : > { %5266 = vmatmul.mubr.msk.f32.gmra.mrb[106].mxu1 %vm1594_vm1, %v2831_v24  ;;  %v2833_v30 = vmax.f32 %v2551_v25, 0.0 }
 0x3a5   : > { %v2832_v28 = vmax.f32 %v2546_v27, 0.0  ;;  %v5169_v29 = vpop.f32.mrb[102].mxu0 }
 0x3a6   : > { %v2561_v31 = vadd.f32 %v5169_v29, %v6360_v1  ;;  %v2555_v32 = vpop.f32.mrb[103].mxu0 }
 0x3a7   : > { %v2556_v33 = vadd.f32 %v6360_v1, %v2555_v32  ;;  %5268 = vmatprep.mubr.msk.f32.mxu1 %vm1594_vm1, %v2832_v28 }
 0x3a8   : > { %5269 = vmatmul.mubr.msk.f32.gmra.mrb[108].mxu1 %vm1594_vm1, %v2833_v30  ;;  %v2835_v37 = vmax.f32 %v2561_v31, 0.0 }
 0x3a9   : > { %v2834_v34 = vmax.f32 %v2556_v33, 0.0  ;;  %v5172_v35 = vpop.f32.mrb[104].mxu0 }
 0x3aa   : > { %v2571_v38 = vadd.f32 %v5172_v35, %v6360_v1  ;;  %v2565_v39 = vpop.f32.mrb[105].mxu0 }
 0x3ab   : > { %v2566_v40 = vadd.f32 %v6360_v1, %v2565_v39  ;;  %5271 = vmatprep.mubr.msk.f32.mxu1 %vm1594_vm1, %v2834_v34 }
 0x3ac   : > { %5272 = vmatmul.mubr.msk.f32.gmra.mrb[110].mxu1 %vm1594_vm1, %v2835_v37  ;;  %v2837_v43 = vmax.f32 %v2571_v38, 0.0 }
 0x3ad   : > { %v2836_v41 = vmax.f32 %v2566_v40, 0.0  ;;  %v5175_v42 = vpop.f32.mrb[106].mxu0 }
 0x3ae   : > { %v2581_v44 = vadd.f32 %v5175_v42, %v6360_v1  ;;  %v2575_v46 = vpop.f32.mrb[107].mxu0 }
 0x3af   : > { %v2576_v48 = vadd.f32 %v6360_v1, %v2575_v46  ;;  %5274 = vmatprep.mubr.msk.f32.mxu1 %vm1594_vm1, %v2836_v41 }
 0x3b0   : > { %5275 = vmatmul.mubr.msk.f32.gmra.mrb[112].mxu1 %vm1594_vm1, %v2837_v43  ;;  %v2839_v36 = vmax.f32 %v2581_v44, 0.0 }
 0x3b1   : > { %v2838_v49 = vmax.f32 %v2576_v48, 0.0  ;;  %v5178_v50 = vpop.f32.mrb[108].mxu0 }
 0x3b2   : > { %v2591_v51 = vadd.f32 %v5178_v50, %v6360_v1  ;;  %v2585_v52 = vpop.f32.mrb[109].mxu0 }
 0x3b3   : > { %v2586_v53 = vadd.f32 %v6360_v1, %v2585_v52  ;;  %5277 = vmatprep.mubr.msk.f32.mxu1 %vm1594_vm1, %v2838_v49 }
 0x3b4   : > { %5278 = vmatmul.mubr.msk.f32.gmra.mrb[114].mxu1 %vm1594_vm1, %v2839_v36  ;;  %v2841_v56 = vmax.f32 %v2591_v51, 0.0 }
 0x3b5   : > { %v2840_v54 = vmax.f32 %v2586_v53, 0.0  ;;  %v5181_v55 = vpop.f32.mrb[110].mxu0 }
 0x3b6   : > { %v2601_v57 = vadd.f32 %v5181_v55, %v6360_v1  ;;  %v2595_v58 = vpop.f32.mrb[111].mxu0 }
 0x3b7   : > { %v2596_v59 = vadd.f32 %v6360_v1, %v2595_v58  ;;  %5280 = vmatprep.mubr.msk.f32.mxu1 %vm1594_vm1, %v2840_v54 }
 0x3b8   : > { %5281 = vmatmul.mubr.msk.f32.gmra.mrb[116].mxu1 %vm1594_vm1, %v2841_v56  ;;  %v2843_v62 = vmax.f32 %v2601_v57, 0.0 }
 0x3b9   : > { %v2842_v60 = vmax.f32 %v2596_v59, 0.0  ;;  %v5184_v61 = vpop.f32.mrb[112].mxu0 }
 0x3ba   : > { %v2611_v63 = vadd.f32 %v5184_v61, %v6360_v1  ;;  %v2605_v0 = vpop.f32.mrb[113].mxu0 }
 0x3bb   : > { %v2606_v2 = vadd.f32 %v6360_v1, %v2605_v0  ;;  %5283 = vmatprep.mubr.msk.f32.mxu1 %vm1594_vm1, %v2842_v60 }
 0x3bc   : > { %5284 = vmatmul.mubr.msk.f32.gmra.mrb[118].mxu1 %vm1594_vm1, %v2843_v62  ;;  %v2845_v47 = vmax.f32 %v2611_v63, 0.0 }
 0x3bd   : > { %v2844_v3 = vmax.f32 %v2606_v2, 0.0  ;;  %v5187_v4 = vpop.f32.mrb[114].mxu0 }
 0x3be   : > { %v2621_v5 = vadd.f32 %v5187_v4, %v6360_v1  ;;  %v2615_v6 = vpop.f32.mrb[115].mxu0 }
 0x3bf   : > { %v2616_v7 = vadd.f32 %v6360_v1, %v2615_v6  ;;  %5286 = vmatprep.mubr.msk.f32.mxu1 %vm1594_vm1, %v2844_v3 }
 0x3c0   : > { %5287 = vmatmul.mubr.msk.f32.gmra.mrb[120].mxu1 %vm1594_vm1, %v2845_v47  ;;  %v2847_v10 = vmax.f32 %v2621_v5, 0.0 }
 0x3c1   : > { %v2846_v8 = vmax.f32 %v2616_v7, 0.0  ;;  %v5190_v9 = vpop.f32.mrb[116].mxu0 }
 0x3c2   : > { %v2631_v11 = vadd.f32 %v5190_v9, %v6360_v1  ;;  %v2625_v12 = vpop.f32.mrb[117].mxu0 }
 0x3c3   : > { %v2626_v13 = vadd.f32 %v6360_v1, %v2625_v12  ;;  %5289 = vmatprep.mubr.msk.f32.mxu1 %vm1594_vm1, %v2846_v8 }
 0x3c4   : > { %5290 = vmatmul.mubr.msk.f32.gmra.mrb[122].mxu1 %vm1594_vm1, %v2847_v10  ;;  %v2849_v16 = vmax.f32 %v2631_v11, 0.0 }
 0x3c5   : > { %v2848_v14 = vmax.f32 %v2626_v13, 0.0  ;;  %v5193_v15 = vpop.f32.mrb[118].mxu0 }
 0x3c6   : > { %v2641_v17 = vadd.f32 %v5193_v15, %v6360_v1  ;;  %v2635_v18 = vpop.f32.mrb[119].mxu0 }
 0x3c7   : > { %v2636_v19 = vadd.f32 %v6360_v1, %v2635_v18  ;;  %5292 = vmatprep.mubr.msk.f32.mxu1 %vm1594_vm1, %v2848_v14 }
 0x3c8   : > { %5293 = vmatmul.mubr.msk.f32.gmra.mrb[124].mxu1 %vm1594_vm1, %v2849_v16  ;;  %v2851_v22 = vmax.f32 %v2641_v17, 0.0 }
 0x3c9   : > { %v2850_v20 = vmax.f32 %v2636_v19, 0.0  ;;  %v5196_v21 = vpop.f32.mrb[120].mxu0 }
 0x3ca   : > { %v2651_v45 = vadd.f32 %v5196_v21, %v6360_v1  ;;  %v2645_v23 = vpop.f32.mrb[121].mxu0 }
 0x3cb   : > { %v2646_v24 = vadd.f32 %v6360_v1, %v2645_v23  ;;  %5295 = vmatprep.mubr.msk.f32.mxu1 %vm1594_vm1, %v2850_v20 }
 0x3cc   : > { %5296 = vmatmul.mubr.msk.f32.gmra.mrb[126].mxu1 %vm1594_vm1, %v2851_v22  ;;  %v2853_v27 = vmax.f32 %v2651_v45, 0.0 }
 0x3cd   : > { %v2852_v25 = vmax.f32 %v2646_v24, 0.0  ;;  %v5199_v26 = vpop.f32.mrb[122].mxu0 }
 0x3ce   : > { %v2661_v28 = vadd.f32 %v5199_v26, %v6360_v1  ;;  %v2655_v29 = vpop.f32.mrb[123].mxu0 }
 0x3cf   : > { %v2656_v30 = vadd.f32 %v6360_v1, %v2655_v29  ;;  %5298 = vmatprep.mubr.msk.f32.mxu1 %vm1594_vm1, %v2852_v25 }
 0x3d0   : > { %5299 = vmatmul.mubr.msk.f32.gmra.mrb[128].mxu1 %vm1594_vm1, %v2853_v27  ;;  %v2855_v33 = vmax.f32 %v2661_v28, 0.0 }
 0x3d1   : > { %v2854_v31 = vmax.f32 %v2656_v30, 0.0  ;;  %v5202_v32 = vpop.f32.mrb[124].mxu0 }
 0x3d2   : > { %v2671_v34 = vadd.f32 %v5202_v32, %v6360_v1  ;;  %v2665_v35 = vpop.f32.mrb[125].mxu0 }
 0x3d3   : > { %v2666_v37 = vadd.f32 %v6360_v1, %v2665_v35  ;;  %5301 = vmatprep.mubr.msk.f32.mxu1 %vm1594_vm1, %v2854_v31 }
 0x3d4   : > { %5302 = vmatmul.mubr.msk.f32.gmra.mrb[130].mxu1 %vm1594_vm1, %v2855_v33  ;;  %v2857_v40 = vmax.f32 %v2671_v34, 0.0 }
 0x3d5   : > { %v2856_v38 = vmax.f32 %v2666_v37, 0.0  ;;  %v5205_v39 = vpop.f32.mrb[126].mxu0 }
 0x3d6   : > { %v2681_v41 = vadd.f32 %v5205_v39, %v6360_v1  ;;  %v2675_v42 = vpop.f32.mrb[127].mxu0 }
 0x3d7   : > { %v2676_v43 = vadd.f32 %v6360_v1, %v2675_v42  ;;  %5304 = vmatprep.mubr.msk.f32.mxu1 %vm1594_vm1, %v2856_v38 }
 0x3d8   : > { %5305 = vmatmul.mubr.msk.f32.gmra.mrb[132].mxu1 %vm1594_vm1, %v2857_v40  ;;  %v2859_v48 = vmax.f32 %v2681_v41, 0.0 }
 0x3d9   : > { %v2858_v44 = vmax.f32 %v2676_v43, 0.0  ;;  %v5208_v46 = vpop.f32.mrb[128].mxu0 }
 0x3da   : > { %v2691_v49 = vadd.f32 %v5208_v46, %v6360_v1  ;;  %v2685_v50 = vpop.f32.mrb[129].mxu0 }
 0x3db   : > { %v2686_v36 = vadd.f32 %v6360_v1, %v2685_v50  ;;  %5307 = vmatprep.mubr.msk.f32.mxu1 %vm1594_vm1, %v2858_v44 }
 0x3dc   : > { %5308 = vmatmul.mubr.msk.f32.gmra.mrb[134].mxu1 %vm1594_vm1, %v2859_v48  ;;  %v2861_v53 = vmax.f32 %v2691_v49, 0.0 }
 0x3dd   : > { %v2860_v51 = vmax.f32 %v2686_v36, 0.0  ;;  %v5211_v52 = vpop.f32.mrb[130].mxu0 }
 0x3de   : > { %v2701_v54 = vadd.f32 %v5211_v52, %v6360_v1  ;;  %v2695_v55 = vpop.f32.mrb[131].mxu0 }
 0x3df   : > { %v2696_v56 = vadd.f32 %v6360_v1, %v2695_v55  ;;  %5310 = vmatprep.mubr.msk.f32.mxu1 %vm1594_vm1, %v2860_v51 }
 0x3e0   : > { %5311 = vmatmul.mubr.msk.f32.gmra.mrb[136].mxu1 %vm1594_vm1, %v2861_v53  ;;  %v2863_v59 = vmax.f32 %v2701_v54, 0.0 }
 0x3e1   : > { %v2862_v57 = vmax.f32 %v2696_v56, 0.0  ;;  %v5214_v58 = vpop.f32.mrb[132].mxu0 }
 0x3e2   : > { %v2711_v60 = vadd.f32 %v5214_v58, %v6360_v1  ;;  %v2705_v61 = vpop.f32.mrb[133].mxu0 }
 0x3e3   : > { %v2706_v62 = vadd.f32 %v6360_v1, %v2705_v61  ;;  %5313 = vmatprep.mubr.msk.f32.mxu1 %vm1594_vm1, %v2862_v57 }
 0x3e4   : > { %5314 = vmatmul.mubr.msk.f32.gmra.mrb[138].mxu1 %vm1594_vm1, %v2863_v59  ;;  %v2865_v2 = vmax.f32 %v2711_v60, 0.0 }
 0x3e5   : > { %v2864_v63 = vmax.f32 %v2706_v62, 0.0  ;;  %v5217_v0 = vpop.f32.mrb[134].mxu0 }
 0x3e6   : > { %v2721_v3 = vadd.f32 %v5217_v0, %v6360_v1  ;;  %v2715_v4 = vpop.f32.mrb[135].mxu0 }
 0x3e7   : > { %v2716_v47 = vadd.f32 %v6360_v1, %v2715_v4  ;;  %5316 = vmatprep.mubr.msk.f32.mxu1 %vm1594_vm1, %v2864_v63 }
 0x3e8   : > { %5317 = vmatmul.mubr.msk.f32.gmra.mrb[140].mxu1 %vm1594_vm1, %v2865_v2  ;;  %v2867_v7 = vmax.f32 %v2721_v3, 0.0 }
 0x3e9   : > { %v2866_v5 = vmax.f32 %v2716_v47, 0.0  ;;  %v5220_v6 = vpop.f32.mrb[136].mxu0  ;;  %v6493_v47 = vld [vmem:[%s7155_s10] ss:$0 sm:$0xff] }
 0x3ea   : > { %v2731_v8 = vadd.f32 %v5220_v6, %v6360_v1  ;;  %v2725_v9 = vpop.f32.mrb[137].mxu0 }
 0x3eb   : > { %v2726_v10 = vadd.f32 %v6360_v1, %v2725_v9  ;;  %5319 = vmatprep.mubr.msk.f32.mxu1 %vm1594_vm1, %v2866_v5 }
 0x3ec   : > { %5320 = vmatmul.mubr.msk.f32.gmra.mrb[142].mxu1 %vm1594_vm1, %v2867_v7  ;;  %v2869_v13 = vmax.f32 %v2731_v8, 0.0 }
 0x3ed   : > { %v2868_v11 = vmax.f32 %v2726_v10, 0.0  ;;  %v5223_v12 = vpop.f32.mrb[138].mxu0 }
 0x3ee   : > { %v2741_v14 = vadd.f32 %v5223_v12, %v6360_v1  ;;  %v2735_v15 = vpop.f32.mrb[139].mxu0 }
 0x3ef   : > { %v2736_v16 = vadd.f32 %v6360_v1, %v2735_v15  ;;  %5322 = vmatprep.mubr.msk.f32.mxu1 %vm1594_vm1, %v2868_v11 }
 0x3f0   : > { %5323 = vmatmul.mubr.msk.f32.gmra.mrb[144].mxu1 %vm1594_vm1, %v2869_v13  ;;  %v2871_v19 = vmax.f32 %v2741_v14, 0.0 }
 0x3f1   : > { %v2870_v17 = vmax.f32 %v2736_v16, 0.0  ;;  %v5226_v18 = vpop.f32.mrb[140].mxu0 }
 0x3f2   : > { %v2751_v20 = vadd.f32 %v5226_v18, %v6360_v1  ;;  %v2745_v21 = vpop.f32.mrb[141].mxu0 }
 0x3f3   : > { %v2746_v22 = vadd.f32 %v6360_v1, %v2745_v21  ;;  %5325 = vmatprep.mubr.msk.f32.mxu1 %vm1594_vm1, %v2870_v17 }
 0x3f4   : > { %5326 = vmatmul.mubr.msk.f32.gmra.mrb[146].mxu1 %vm1594_vm1, %v2871_v19  ;;  %v2873_v24 = vmax.f32 %v2751_v20, 0.0 }
 0x3f5   : > { %v2872_v45 = vmax.f32 %v2746_v22, 0.0  ;;  %v5229_v23 = vpop.f32.mrb[142].mxu0 }
 0x3f6   : > { %v2761_v25 = vadd.f32 %v5229_v23, %v6360_v1  ;;  %v2755_v26 = vpop.f32.mrb[143].mxu0 }
 0x3f7   : > { %v2756_v27 = vadd.f32 %v6360_v1, %v2755_v26  ;;  %5328 = vmatprep.mubr.msk.f32.mxu1 %vm1594_vm1, %v2872_v45 }
 0x3f8   : > { %5329 = vmatmul.mubr.msk.f32.gmra.mrb[148].mxu1 %vm1594_vm1, %v2873_v24  ;;  %v2875_v30 = vmax.f32 %v2761_v25, 0.0 }
 0x3f9   : > { %v2874_v28 = vmax.f32 %v2756_v27, 0.0  ;;  %v5232_v29 = vpop.f32.mrb[144].mxu0 }
 0x3fa   : > { %v2771_v31 = vadd.f32 %v5232_v29, %v6360_v1  ;;  %v2765_v32 = vpop.f32.mrb[145].mxu0 }
 0x3fb   : > { %v2766_v33 = vadd.f32 %v6360_v1, %v2765_v32  ;;  %5331 = vmatprep.mubr.msk.f32.mxu1 %vm1594_vm1, %v2874_v28 }
 0x3fc   : > { %5332 = vmatmul.mubr.msk.f32.gmra.mrb[150].mxu1 %vm1594_vm1, %v2875_v30  ;;  %v2877_v37 = vmax.f32 %v2771_v31, 0.0 }
 0x3fd   : > { %v2876_v34 = vmax.f32 %v2766_v33, 0.0  ;;  %v5235_v35 = vpop.f32.mrb[146].mxu0 }
 0x3fe   : > { %v2781_v38 = vadd.f32 %v5235_v35, %v6360_v1  ;;  %v2775_v39 = vpop.f32.mrb[147].mxu0 }
 0x3ff   : > { %v2776_v40 = vadd.f32 %v6360_v1, %v2775_v39  ;;  %5334 = vmatprep.mubr.msk.f32.mxu1 %vm1594_vm1, %v2876_v34 }
 0x400   : > { %5335 = vmatmul.mubr.msk.f32.gmra.mrb[152].mxu1 %vm1594_vm1, %v2877_v37  ;;  %v2879_v43 = vmax.f32 %v2781_v38, 0.0 }
 0x401   : > { %v2878_v41 = vmax.f32 %v2776_v40, 0.0  ;;  %v5238_v42 = vpop.f32.mrb[148].mxu0 }
 0x402   : > { %v2791_v44 = vadd.f32 %v5238_v42, %v6360_v1  ;;  %v2785_v46 = vpop.f32.mrb[149].mxu0 }
 0x403   : > { %v2786_v48 = vadd.f32 %v6360_v1, %v2785_v46  ;;  %5337 = vmatprep.mubr.msk.f32.mxu1 %vm1594_vm1, %v2878_v41 }
 0x404   : > { %5338 = vmatmul.mubr.msk.f32.gmra.mrb[154].mxu1 %vm1594_vm1, %v2879_v43  ;;  %v2881_v36 = vmax.f32 %v2791_v44, 0.0 }
 0x405   : > { %v2880_v49 = vmax.f32 %v2786_v48, 0.0  ;;  %v5241_v50 = vpop.f32.mrb[150].mxu0 }
 0x406   : > { %v2801_v51 = vadd.f32 %v5241_v50, %v6360_v1  ;;  %v2795_v52 = vpop.f32.mrb[151].mxu0 }
 0x407   : > { %v2796_v53 = vadd.f32 %v6360_v1, %v2795_v52  ;;  %5340 = vmatprep.mubr.msk.f32.mxu1 %vm1594_vm1, %v2880_v49 }
 0x408   : > { %5341 = vmatmul.mubr.msk.f32.gmra.mrb[156].mxu1 %vm1594_vm1, %v2881_v36  ;;  %v2883_v56 = vmax.f32 %v2801_v51, 0.0 }
 0x409   : > { %v2882_v54 = vmax.f32 %v2796_v53, 0.0  ;;  %v5244_v55 = vpop.f32.mrb[152].mxu0 }
 0x40a   : > { %v2811_v57 = vadd.f32 %v5244_v55, %v6360_v1  ;;  %v2805_v58 = vpop.f32.mrb[153].mxu0 }
 0x40b   : > { %v2806_v59 = vadd.f32 %v6360_v1, %v2805_v58  ;;  %5343 = vmatprep.mubr.msk.f32.mxu1 %vm1594_vm1, %v2882_v54 }
 0x40c   : > { %5344 = vmatmul.mubr.msk.f32.gmra.mrb[158].mxu1 %vm1594_vm1, %v2883_v56  ;;  %v2885_v62 = vmax.f32 %v2811_v57, 0.0 }
 0x40d   : > { %v2884_v60 = vmax.f32 %v2806_v59, 0.0  ;;  %v5247_v61 = vpop.f32.mrb[154].mxu0 }
 0x40e   : > { %v2821_v63 = vadd.f32 %v5247_v61, %v6360_v1  ;;  %v2815_v0 = vpop.f32.mrb[155].mxu0 }
 0x40f   : > { %v2816_v2 = vadd.f32 %v6360_v1, %v2815_v0  ;;  %5346 = vmatprep.mubr.msk.f32.mxu1 %vm1594_vm1, %v2884_v60 }
 0x410   : > { %5347 = vmatmul.mubr.msk.f32.gmra.mrb[160].mxu1 %vm1594_vm1, %v2885_v62  ;;  %v2887_v4 = vmax.f32 %v2821_v63, 0.0 }
 0x411   : > { %v2886_v3 = vmax.f32 %v2816_v2, 0.0 }
 0x413   : > { %5349 = vmatprep.mubr.msk.f32.mxu1 %vm1594_vm1, %v2886_v3 }
 0x414   : > { %5350 = vmatmul.mubr.msk.f32.gmra.mrb[162].mxu1 %vm1594_vm1, %v2887_v4 }
 0x46b   : > { %v5258_v5 = vpop.f32.mrb[100].mxu1 }
 0x46c   : > { %v6496_v6 = vadd.f32 %v5258_v5, %v6493_v47  ;;  %v3157_v1 = vpop.f32.mrb[101].mxu1 }
 0x46d   : > { %v6500_v8 = vadd.f32 %v6493_v47, %v3157_v1 }
 0x46e   : > { %3478 = vmax.xlane.f32.xlu0 %v6496_v6 }
 0x46f   : > { %v5261_v7 = vpop.f32.mrb[102].mxu1 }
 0x470   : > { %v6503_v9 = vadd.f32 %v5261_v7, %v6493_v47  ;;  %v3167_v10 = vpop.f32.mrb[103].mxu1 }
 0x471   : > { %v6508_v12 = vadd.f32 %v6493_v47, %v3167_v10 }
 0x472   : > { %3482 = vmax.xlane.f32.xlu1 %v6503_v9  ;;  %3476 = vmax.xlane.f32.xlu0 %v6500_v8 }
 0x473   : > { %v5264_v11 = vpop.f32.mrb[104].mxu1 }
 0x474   : > { %v3177_v13 = vpop.f32.mrb[105].mxu1  ;;  %v6516_v16 = vadd.f32 %v5264_v11, %v6493_v47 }
 0x475   : > { %v6511_v14 = vadd.f32 %v6493_v47, %v3177_v13 }
 0x476   : > { %3480 = vmax.xlane.f32.xlu1 %v6508_v12 }
 0x477   : > { %v5267_v15 = vpop.f32.mrb[106].mxu1  ;;  %3484 = vmax.xlane.f32.xlu0 %v6511_v14 }
 0x478   : > { %v3187_v17 = vpop.f32.mrb[107].mxu1  ;;  %v6524_v20 = vadd.f32 %v5267_v15, %v6493_v47 }
 0x479   : > { %v6519_v18 = vadd.f32 %v6493_v47, %v3187_v17 }
 0x47a   : > { %3486 = vmax.xlane.f32.xlu1 %v6516_v16 }
 0x47b   : > { %v5270_v19 = vpop.f32.mrb[108].mxu1  ;;  %3488 = vmax.xlane.f32.xlu0 %v6519_v18 }
 0x47c   : > { %v3197_v21 = vpop.f32.mrb[109].mxu1  ;;  %v6532_v23 = vadd.f32 %v5270_v19, %v6493_v47 }
 0x47d   : > { %v6527_v22 = vadd.f32 %v6493_v47, %v3197_v21 }
 0x47e   : > { %3490 = vmax.xlane.f32.xlu1 %v6524_v20 }
 0x47f   : > { %v5273_v45 = vpop.f32.mrb[110].mxu1  ;;  %3492 = vmax.xlane.f32.xlu0 %v6527_v22 }
 0x480   : > { %v3207_v24 = vpop.f32.mrb[111].mxu1  ;;  %v6540_v27 = vadd.f32 %v5273_v45, %v6493_v47 }
 0x481   : > { %v6535_v25 = vadd.f32 %v6493_v47, %v3207_v24 }
 0x482   : > { %3494 = vmax.xlane.f32.xlu1 %v6532_v23 }
 0x483   : > { %v5276_v26 = vpop.f32.mrb[112].mxu1  ;;  %3496 = vmax.xlane.f32.xlu0 %v6535_v25 }
 0x484   : > { %v3217_v28 = vpop.f32.mrb[113].mxu1  ;;  %v6548_v31 = vadd.f32 %v5276_v26, %v6493_v47 }
 0x485   : > { %v6543_v29 = vadd.f32 %v6493_v47, %v3217_v28 }
 0x486   : > { %3498 = vmax.xlane.f32.xlu1 %v6540_v27 }
 0x487   : > { %v5279_v30 = vpop.f32.mrb[114].mxu1  ;;  %3500 = vmax.xlane.f32.xlu0 %v6543_v29 }
 0x488   : > { %v3227_v32 = vpop.f32.mrb[115].mxu1  ;;  %v6556_v35 = vadd.f32 %v5279_v30, %v6493_v47 }
 0x489   : > { %v6551_v33 = vadd.f32 %v6493_v47, %v3227_v32 }
 0x48a   : > { %3502 = vmax.xlane.f32.xlu1 %v6548_v31 }
 0x48b   : > { %v5282_v34 = vpop.f32.mrb[116].mxu1  ;;  %3504 = vmax.xlane.f32.xlu0 %v6551_v33 }
 0x48c   : > { %v3237_v37 = vpop.f32.mrb[117].mxu1  ;;  %v6564_v40 = vadd.f32 %v5282_v34, %v6493_v47 }
 0x48d   : > { %v6559_v38 = vadd.f32 %v6493_v47, %v3237_v37 }
 0x48e   : > { %3506 = vmax.xlane.f32.xlu1 %v6556_v35 }
 0x48f   : > { %v5285_v39 = vpop.f32.mrb[118].mxu1  ;;  %3508 = vmax.xlane.f32.xlu0 %v6559_v38 }
 0x490   : > { %v3247_v41 = vpop.f32.mrb[119].mxu1  ;;  %v6572_v44 = vadd.f32 %v5285_v39, %v6493_v47 }
 0x491   : > { %v6567_v42 = vadd.f32 %v6493_v47, %v3247_v41 }
 0x492   : > { %3510 = vmax.xlane.f32.xlu1 %v6564_v40 }
 0x493   : > { %v5288_v43 = vpop.f32.mrb[120].mxu1  ;;  %3512 = vmax.xlane.f32.xlu0 %v6567_v42 }
 0x494   : > { %v3257_v46 = vpop.f32.mrb[121].mxu1  ;;  %v6580_v50 = vadd.f32 %v5288_v43, %v6493_v47 }
 0x495   : > { %v6575_v48 = vadd.f32 %v6493_v47, %v3257_v46 }
 0x496   : > { %3514 = vmax.xlane.f32.xlu1 %v6572_v44 }
 0x497   : > { %v5291_v49 = vpop.f32.mrb[122].mxu1  ;;  %3516 = vmax.xlane.f32.xlu0 %v6575_v48 }
 0x498   : > { %v3267_v36 = vpop.f32.mrb[123].mxu1  ;;  %v6588_v53 = vadd.f32 %v5291_v49, %v6493_v47 }
 0x499   : > { %v6583_v51 = vadd.f32 %v6493_v47, %v3267_v36 }
 0x49a   : > { %3518 = vmax.xlane.f32.xlu1 %v6580_v50 }
 0x49b   : > { %v5294_v52 = vpop.f32.mrb[124].mxu1  ;;  %3520 = vmax.xlane.f32.xlu0 %v6583_v51 }
 0x49c   : > { %v3277_v54 = vpop.f32.mrb[125].mxu1  ;;  %v6596_v57 = vadd.f32 %v5294_v52, %v6493_v47 }
 0x49d   : > { %v6591_v55 = vadd.f32 %v6493_v47, %v3277_v54 }
 0x49e   : > { %3522 = vmax.xlane.f32.xlu1 %v6588_v53 }
 0x49f   : > { %v5297_v56 = vpop.f32.mrb[126].mxu1  ;;  %3524 = vmax.xlane.f32.xlu0 %v6591_v55 }
 0x4a0   : > { %v3287_v58 = vpop.f32.mrb[127].mxu1  ;;  %v6604_v61 = vadd.f32 %v5297_v56, %v6493_v47 }
 0x4a1   : > { %v6599_v59 = vadd.f32 %v6493_v47, %v3287_v58 }
 0x4a2   : > { %3526 = vmax.xlane.f32.xlu1 %v6596_v57 }
 0x4a3   : > { %v5300_v60 = vpop.f32.mrb[128].mxu1  ;;  %3528 = vmax.xlane.f32.xlu0 %v6599_v59 }
 0x4a4   : > { %v3297_v62 = vpop.f32.mrb[129].mxu1  ;;  %v6612_v2 = vadd.f32 %v5300_v60, %v6493_v47 }
 0x4a5   : > { %v6607_v63 = vadd.f32 %v6493_v47, %v3297_v62 }
 0x4a6   : > { %3530 = vmax.xlane.f32.xlu1 %v6604_v61 }
 0x4a7   : > { %v5303_v0 = vpop.f32.mrb[130].mxu1  ;;  %3532 = vmax.xlane.f32.xlu0 %v6607_v63 }
 0x4a8   : > { %v3307_v3 = vpop.f32.mrb[131].mxu1  ;;  %v6620_v1 = vadd.f32 %v5303_v0, %v6493_v47 }
 0x4a9   : > { %v6615_v4 = vadd.f32 %v6493_v47, %v3307_v3 }
 0x4aa   : > { %3534 = vmax.xlane.f32.xlu1 %v6612_v2 }
 0x4ab   : > { %v5306_v5 = vpop.f32.mrb[132].mxu1  ;;  %3536 = vmax.xlane.f32.xlu0 %v6615_v4 }
 0x4ac   : > { %v3317_v7 = vpop.f32.mrb[133].mxu1  ;;  %v6628_v13 = vadd.f32 %v5306_v5, %v6493_v47 }
 0x4ad   : > { %v6623_v10 = vadd.f32 %v6493_v47, %v3317_v7 }
 0x4ae   : > { %3538 = vmax.xlane.f32.xlu1 %v6620_v1 }
 0x4af   : > { %v5309_v11 = vpop.f32.mrb[134].mxu1  ;;  %3540 = vmax.xlane.f32.xlu0 %v6623_v10 }
 0x4b0   : > { %v3327_v15 = vpop.f32.mrb[135].mxu1  ;;  %v6636_v21 = vadd.f32 %v5309_v11, %v6493_v47 }
 0x4b1   : > { %v6631_v17 = vadd.f32 %v6493_v47, %v3327_v15 }
 0x4b2   : > { %3542 = vmax.xlane.f32.xlu1 %v6628_v13 }
 0x4b3   : > { %v5312_v19 = vpop.f32.mrb[136].mxu1  ;;  %3544 = vmax.xlane.f32.xlu0 %v6631_v17 }
 0x4b4   : > { %v3337_v45 = vpop.f32.mrb[137].mxu1  ;;  %v6644_v28 = vadd.f32 %v5312_v19, %v6493_v47 }
 0x4b5   : > { %v6639_v24 = vadd.f32 %v6493_v47, %v3337_v45 }
 0x4b6   : > { %3546 = vmax.xlane.f32.xlu1 %v6636_v21 }
 0x4b7   : > { %v5315_v26 = vpop.f32.mrb[138].mxu1  ;;  %3548 = vmax.xlane.f32.xlu0 %v6639_v24 }
 0x4b8   : > { %v3347_v30 = vpop.f32.mrb[139].mxu1  ;;  %v6652_v37 = vadd.f32 %v5315_v26, %v6493_v47 }
 0x4b9   : > { %v6647_v32 = vadd.f32 %v6493_v47, %v3347_v30 }
 0x4ba   : > { %3550 = vmax.xlane.f32.xlu1 %v6644_v28 }
 0x4bb   : > { %v5318_v34 = vpop.f32.mrb[140].mxu1  ;;  %3552 = vmax.xlane.f32.xlu0 %v6647_v32 }
 0x4bc   : > { %v3357_v39 = vpop.f32.mrb[141].mxu1  ;;  %v6660_v46 = vadd.f32 %v5318_v34, %v6493_v47 }
 0x4bd   : > { %v6655_v41 = vadd.f32 %v6493_v47, %v3357_v39 }
 0x4be   : > { %3554 = vmax.xlane.f32.xlu1 %v6652_v37 }
 0x4bf   : > { %v5321_v43 = vpop.f32.mrb[142].mxu1  ;;  %3556 = vmax.xlane.f32.xlu0 %v6655_v41 }
 0x4c0   : > { %v3367_v49 = vpop.f32.mrb[143].mxu1  ;;  %v6668_v54 = vadd.f32 %v5321_v43, %v6493_v47 }
 0x4c1   : > { %v6663_v36 = vadd.f32 %v6493_v47, %v3367_v49 }
 0x4c2   : > { %3558 = vmax.xlane.f32.xlu1 %v6660_v46 }
 0x4c3   : > { %v5324_v52 = vpop.f32.mrb[144].mxu1  ;;  %3560 = vmax.xlane.f32.xlu0 %v6663_v36 }
 0x4c4   : > { %v3377_v56 = vpop.f32.mrb[145].mxu1  ;;  %v6676_v62 = vadd.f32 %v5324_v52, %v6493_v47 }
 0x4c5   : > { %v6671_v58 = vadd.f32 %v6493_v47, %v3377_v56 }
 0x4c6   : > { %3562 = vmax.xlane.f32.xlu1 %v6668_v54 }
 0x4c7   : > { %v5327_v60 = vpop.f32.mrb[146].mxu1  ;;  %3564 = vmax.xlane.f32.xlu0 %v6671_v58 }
 0x4c8   : > { %v3387_v0 = vpop.f32.mrb[147].mxu1  ;;  %v6684_v7 = vadd.f32 %v5327_v60, %v6493_v47 }
 0x4c9   : > { %v6679_v3 = vadd.f32 %v6493_v47, %v3387_v0 }
 0x4ca   : > { %3566 = vmax.xlane.f32.xlu1 %v6676_v62 }
 0x4cb   : > { %v5330_v5 = vpop.f32.mrb[148].mxu1  ;;  %3568 = vmax.xlane.f32.xlu0 %v6679_v3 }
 0x4cc   : > { %v3397_v11 = vpop.f32.mrb[149].mxu1  ;;  %v6692_v45 = vadd.f32 %v5330_v5, %v6493_v47 }
 0x4cd   : > { %v6687_v15 = vadd.f32 %v6493_v47, %v3397_v11 }
 0x4ce   : > { %3570 = vmax.xlane.f32.xlu1 %v6684_v7 }
 0x4cf   : > { %v5333_v19 = vpop.f32.mrb[150].mxu1  ;;  %3572 = vmax.xlane.f32.xlu0 %v6687_v15 }
 0x4d0   : > { %v3407_v26 = vpop.f32.mrb[151].mxu1  ;;  %v6700_v39 = vadd.f32 %v5333_v19, %v6493_v47 }
 0x4d1   : > { %v6695_v30 = vadd.f32 %v6493_v47, %v3407_v26 }
 0x4d2   : > { %3574 = vmax.xlane.f32.xlu1 %v6692_v45  ;;  %7182 = vst [vmem:[#allocation3_spill] sm:$0xff] %v6700_v39 }
 0x4d3   : > { %7181 = vst [vmem:[#allocation2_spill] sm:$0xff] %v6695_v30  ;;  %v5336_v34 = vpop.f32.mrb[152].mxu1  ;;  %3576 = vmax.xlane.f32.xlu0 %v6695_v30 }
 0x4d4   : > { %v3417_v43 = vpop.f32.mrb[153].mxu1  ;;  %v6708_v56 = vadd.f32 %v5336_v34, %v6493_v47 }
 0x4d5   : > { %v6703_v49 = vadd.f32 %v6493_v47, %v3417_v43 }
 0x4d6   : > { %3578 = vmax.xlane.f32.xlu1 %v6700_v39  ;;  %7184 = vst [vmem:[#allocation5_spill] sm:$0xff] %v6708_v56 }
 0x4d7   : > { %7183 = vst [vmem:[#allocation4_spill] sm:$0xff] %v6703_v49  ;;  %v5339_v52 = vpop.f32.mrb[154].mxu1  ;;  %3580 = vmax.xlane.f32.xlu0 %v6703_v49 }
 0x4d8   : > { %v3427_v60 = vpop.f32.mrb[155].mxu1  ;;  %v6716_v11 = vadd.f32 %v5339_v52, %v6493_v47 }
 0x4d9   : > { %v6711_v0 = vadd.f32 %v6493_v47, %v3427_v60 }
 0x4da   : > { %3582 = vmax.xlane.f32.xlu1 %v6708_v56  ;;  %7186 = vst [vmem:[#allocation7_spill] sm:$0xff] %v6716_v11 }
 0x4db   : > { %7185 = vst [vmem:[#allocation6_spill] sm:$0xff] %v6711_v0  ;;  %v5342_v5 = vpop.f32.mrb[156].mxu1  ;;  %3584 = vmax.xlane.f32.xlu0 %v6711_v0 }
 0x4dc   : > { %v3437_v19 = vpop.f32.mrb[157].mxu1  ;;  %v6724_v43 = vadd.f32 %v5342_v5, %v6493_v47 }
 0x4dd   : > { %v6719_v26 = vadd.f32 %v6493_v47, %v3437_v19 }
 0x4de   : > { %3586 = vmax.xlane.f32.xlu1 %v6716_v11  ;;  %7188 = vst [vmem:[#allocation9_spill] sm:$0xff] %v6724_v43 }
 0x4df   : > { %7187 = vst [vmem:[#allocation8_spill] sm:$0xff] %v6719_v26  ;;  %v5345_v34 = vpop.f32.mrb[158].mxu1  ;;  %3588 = vmax.xlane.f32.xlu0 %v6719_v26 }
 0x4e0   : > { %v3447_v60 = vpop.f32.mrb[159].mxu1  ;;  %v6732_v19 = vadd.f32 %v5345_v34, %v6493_v47 }
 0x4e1   : > { %v6727_v56 = vadd.f32 %v6493_v47, %v3447_v60 }
 0x4e2   : > { %3590 = vmax.xlane.f32.xlu1 %v6724_v43  ;;  %7190 = vst [vmem:[#allocation11_spill] sm:$0xff] %v6732_v19 }
 0x4e3   : > { %7189 = vst [vmem:[#allocation10_spill] sm:$0xff] %v6727_v56  ;;  %v5348_v52 = vpop.f32.mrb[160].mxu1  ;;  %3592 = vmax.xlane.f32.xlu0 %v6727_v56 }
 0x4e4   : > { %v3457_v0 = vpop.f32.mrb[161].mxu1  ;;  %v6740_v60 = vadd.f32 %v5348_v52, %v6493_v47 }
 0x4e5   : > { %v6735_v11 = vadd.f32 %v6493_v47, %v3457_v0 }
 0x4e6   : > { %3594 = vmax.xlane.f32.xlu1 %v6732_v19  ;;  %7192 = vst [vmem:[#allocation13_spill] sm:$0xff] %v6740_v60 }
 0x4e7   : > { %7191 = vst [vmem:[#allocation12_spill] sm:$0xff] %v6735_v11  ;;  %v5351_v5 = vpop.f32.mrb[162].mxu1  ;;  %3596 = vmax.xlane.f32.xlu0 %v6735_v11 }
 0x4e8   : > { %v3467_v26 = vpop.f32.mrb[163].mxu1  ;;  %v6748_v34 = vadd.f32 %v5351_v5, %v6493_v47 }
 0x4e9   : > { %v6743_v43 = vadd.f32 %v6493_v47, %v3467_v26 }
 0x4ea   : > { %3598 = vmax.xlane.f32.xlu1 %v6740_v60  ;;  %7194 = vst [vmem:[#allocation15_spill] sm:$0xff] %v6748_v34 }
 0x4eb   : > { %7193 = vst [vmem:[#allocation14_spill] sm:$0xff] %v6743_v43  ;;  %3600 = vmax.xlane.f32.xlu0 %v6743_v43 }
 0x4ee   : > { %3602 = vmax.xlane.f32.xlu1 %v6748_v34 }
 0x4fb   : > { %v3479_v0 = vpop.xlane.xlu0 %3478 }
 0x4fc   : > { %v3605_v19 = vsub.f32 %v6496_v6, %v3479_v0 }
 0x4fe   : > { %v3670_v11 = vmul.f32 1.442695, %v3605_v19 }
 0x4ff   : > { %v3483_v56 = vpop.xlane.xlu1 %3482  ;;  %v3477_v52 = vpop.xlane.xlu0 %3476 }
 0x500   : > { %5440 = vpow2.f32 %v3670_v11  ;;  %v3607_v49 = vsub.f32 %v6503_v9, %v3483_v56  ;;  %v3604_v26 = vsub.f32 %v6500_v8, %v3477_v52 }
 0x502   : > { %v3674_v39 = vmul.f32 1.442695, %v3607_v49  ;;  %v3668_v60 = vmul.f32 1.442695, %v3604_v26 }
 0x503   : > { %v3481_v30 = vpop.xlane.xlu1 %3480 }
 0x504   : > { %5442 = vpow2.f32 %v3674_v39  ;;  %v3606_v47 = vsub.f32 %v6508_v12, %v3481_v30  ;;  %v3485_v5 = vpop.xlane.xlu0 %3484 }
 0x505   : > { %5444 = vpow2.f32 %v3668_v60  ;;  %v3608_v34 = vsub.f32 %v6511_v14, %v3485_v5 }
 0x506   : > { %v3672_v43 = vmul.f32 1.442695, %v3606_v47 }
 0x507   : > { %v3487_v6 = vpop.xlane.xlu1 %3486  ;;  %v3676_v0 = vmul.f32 1.442695, %v3608_v34 }
 0x508   : > { %5446 = vpow2.f32 %v3672_v43  ;;  %v3609_v19 = vsub.f32 %v6516_v16, %v3487_v6  ;;  %v3489_v11 = vpop.xlane.xlu0 %3488 }
 0x509   : > { %v3610_v9 = vsub.f32 %v6519_v18, %v3489_v11 }
 0x50a   : > { %v6758_v8 = vpop.eup %5440  ;;  %v3678_v49 = vmul.f32 1.442695, %v3609_v19 }
 0x50b   : > { %3798 = vadd.xlane.f32.xlu1 %v6758_v8  ;;  %v3491_v39 = vpop.xlane.xlu1 %3490  ;;  %v3680_v14 = vmul.f32 1.442695, %v3610_v9 }
 0x50c   : > { %5448 = vpow2.f32 %v3678_v49  ;;  %v3611_v12 = vsub.f32 %v6524_v20, %v3491_v39  ;;  %v3493_v30 = vpop.xlane.xlu0 %3492 }
 0x50d   : > { %5450 = vpow2.f32 %v3676_v0  ;;  %v3612_v56 = vsub.f32 %v6527_v22, %v3493_v30 }
 0x50e   : > { %v6763_v43 = vpop.eup %5442  ;;  %v3682_v16 = vmul.f32 1.442695, %v3611_v12 }
 0x50f   : > { %v6765_v60 = vpop.eup %5444  ;;  %3802 = vadd.xlane.f32.xlu1 %v6763_v43  ;;  %v3495_v18 = vpop.xlane.xlu1 %3494  ;;  %v3684_v20 = vmul.f32 1.442695, %v3612_v56 }
 0x510   : > { %5452 = vpow2.f32 %v3682_v16  ;;  %v3613_v34 = vsub.f32 %v6532_v23, %v3495_v18  ;;  %3796 = vadd.xlane.f32.xlu0 %v6765_v60  ;;  %v3497_v52 = vpop.xlane.xlu0 %3496 }
 0x511   : > { %5454 = vpow2.f32 %v3680_v14  ;;  %v3614_v26 = vsub.f32 %v6535_v25, %v3497_v52 }
 0x512   : > { %v6771_v47 = vpop.eup %5446  ;;  %v3686_v22 = vmul.f32 1.442695, %v3613_v34 }
 0x513   : > { %v3499_v5 = vpop.xlane.xlu1 %3498  ;;  %v3688_v11 = vmul.f32 1.442695, %v3614_v26 }
 0x514   : > { %5456 = vpow2.f32 %v3686_v22  ;;  %v3615_v6 = vsub.f32 %v6540_v27, %v3499_v5  ;;  %3800 = vadd.xlane.f32.xlu0 %v6771_v47  ;;  %v3501_v19 = vpop.xlane.xlu0 %3500 }
 0x515   : > { %5458 = vpow2.f32 %v3684_v20  ;;  %v3616_v23 = vsub.f32 %v6543_v29, %v3501_v19 }
 0x516   : > { %v6776_v0 = vpop.eup %5448  ;;  %v3690_v9 = vmul.f32 1.442695, %v3615_v6 }
 0x517   : > { %v6778_v49 = vpop.eup %5450  ;;  %3806 = vadd.xlane.f32.xlu1 %v6776_v0  ;;  %v3503_v25 = vpop.xlane.xlu1 %3502  ;;  %v3692_v12 = vmul.f32 1.442695, %v3616_v23 }
 0x518   : > { %5460 = vpow2.f32 %v3690_v9  ;;  %v3617_v39 = vsub.f32 %v6548_v31, %v3503_v25  ;;  %3804 = vadd.xlane.f32.xlu0 %v6778_v49  ;;  %v3505_v27 = vpop.xlane.xlu0 %3504 }
 0x519   : > { %5462 = vpow2.f32 %v3688_v11  ;;  %v3618_v30 = vsub.f32 %v6551_v33, %v3505_v27 }
 0x51a   : > { %v6784_v14 = vpop.eup %5452  ;;  %v3694_v29 = vmul.f32 1.442695, %v3617_v39 }
 0x51b   : > { %v6786_v56 = vpop.eup %5454  ;;  %3810 = vadd.xlane.f32.xlu1 %v6784_v14  ;;  %v3507_v16 = vpop.xlane.xlu1 %3506  ;;  %v3696_v34 = vmul.f32 1.442695, %v3618_v30 }
 0x51c   : > { %5464 = vpow2.f32 %v3694_v29  ;;  %v3619_v18 = vsub.f32 %v6556_v35, %v3507_v16  ;;  %3808 = vadd.xlane.f32.xlu0 %v6786_v56  ;;  %v3509_v31 = vpop.xlane.xlu0 %3508 }
 0x51d   : > { %5466 = vpow2.f32 %v3692_v12  ;;  %v3620_v52 = vsub.f32 %v6559_v38, %v3509_v31 }
 0x51e   : > { %v6792_v20 = vpop.eup %5456  ;;  %v3698_v33 = vmul.f32 1.442695, %v3619_v18 }
 0x51f   : > { %v6794_v26 = vpop.eup %5458  ;;  %3814 = vadd.xlane.f32.xlu1 %v6792_v20  ;;  %v3511_v22 = vpop.xlane.xlu1 %3510  ;;  %v3700_v6 = vmul.f32 1.442695, %v3620_v52 }
 0x520   : > { %5468 = vpow2.f32 %v3698_v33  ;;  %v3621_v5 = vsub.f32 %v6564_v40, %v3511_v22  ;;  %3812 = vadd.xlane.f32.xlu0 %v6794_v26  ;;  %v3513_v35 = vpop.xlane.xlu0 %3512 }
 0x521   : > { %5470 = vpow2.f32 %v3696_v34  ;;  %v3622_v19 = vsub.f32 %v6567_v42, %v3513_v35 }
 0x522   : > { %v6800_v11 = vpop.eup %5460  ;;  %v3702_v38 = vmul.f32 1.442695, %v3621_v5 }
 0x523   : > { %v6802_v23 = vpop.eup %5462  ;;  %3818 = vadd.xlane.f32.xlu1 %v6800_v11  ;;  %v3515_v9 = vpop.xlane.xlu1 %3514  ;;  %v3704_v39 = vmul.f32 1.442695, %v3622_v19 }
 0x524   : > { %5472 = vpow2.f32 %v3702_v38  ;;  %v3623_v25 = vsub.f32 %v6572_v44, %v3515_v9  ;;  %3816 = vadd.xlane.f32.xlu0 %v6802_v23  ;;  %v3517_v40 = vpop.xlane.xlu0 %3516 }
 0x525   : > { %5474 = vpow2.f32 %v3700_v6  ;;  %v3624_v27 = vsub.f32 %v6575_v48, %v3517_v40 }
 0x526   : > { %v6808_v12 = vpop.eup %5464  ;;  %v3706_v42 = vmul.f32 1.442695, %v3623_v25 }
 0x527   : > { %v6810_v30 = vpop.eup %5466  ;;  %3822 = vadd.xlane.f32.xlu1 %v6808_v12  ;;  %v3519_v29 = vpop.xlane.xlu1 %3518  ;;  %v3708_v18 = vmul.f32 1.442695, %v3624_v27 }
 0x528   : > { %5476 = vpow2.f32 %v3706_v42  ;;  %v3625_v16 = vsub.f32 %v6580_v50, %v3519_v29  ;;  %3820 = vadd.xlane.f32.xlu0 %v6810_v30  ;;  %v3521_v44 = vpop.xlane.xlu0 %3520 }
 0x529   : > { %5478 = vpow2.f32 %v3704_v39  ;;  %v3626_v31 = vsub.f32 %v6583_v51, %v3521_v44 }
 0x52a   : > { %v6816_v34 = vpop.eup %5468  ;;  %v3710_v48 = vmul.f32 1.442695, %v3625_v16 }
 0x52b   : > { %v6818_v52 = vpop.eup %5470  ;;  %3826 = vadd.xlane.f32.xlu1 %v6816_v34  ;;  %v3523_v33 = vpop.xlane.xlu1 %3522  ;;  %v3712_v5 = vmul.f32 1.442695, %v3626_v31 }
 0x52c   : > { %5480 = vpow2.f32 %v3710_v48  ;;  %v3627_v22 = vsub.f32 %v6588_v53, %v3523_v33  ;;  %3824 = vadd.xlane.f32.xlu0 %v6818_v52  ;;  %v3525_v50 = vpop.xlane.xlu0 %3524 }
 0x52d   : > { %5482 = vpow2.f32 %v3708_v18  ;;  %v3628_v35 = vsub.f32 %v6591_v55, %v3525_v50 }
 0x52e   : > { %v6824_v6 = vpop.eup %5472  ;;  %v3714_v51 = vmul.f32 1.442695, %v3627_v22 }
 0x52f   : > { %v6826_v19 = vpop.eup %5474  ;;  %3830 = vadd.xlane.f32.xlu1 %v6824_v6  ;;  %v3527_v38 = vpop.xlane.xlu1 %3526  ;;  %v3716_v25 = vmul.f32 1.442695, %v3628_v35 }
 0x530   : > { %5484 = vpow2.f32 %v3714_v51  ;;  %v3629_v9 = vsub.f32 %v6596_v57, %v3527_v38  ;;  %3828 = vadd.xlane.f32.xlu0 %v6826_v19  ;;  %v3529_v53 = vpop.xlane.xlu0 %3528 }
 0x531   : > { %5486 = vpow2.f32 %v3712_v5  ;;  %v3630_v40 = vsub.f32 %v6599_v59, %v3529_v53 }
 0x532   : > { %v6832_v39 = vpop.eup %5476  ;;  %v3718_v55 = vmul.f32 1.442695, %v3629_v9 }
 0x533   : > { %v6834_v27 = vpop.eup %5478  ;;  %3834 = vadd.xlane.f32.xlu1 %v6832_v39  ;;  %v3531_v42 = vpop.xlane.xlu1 %3530  ;;  %v3720_v16 = vmul.f32 1.442695, %v3630_v40 }
 0x534   : > { %5488 = vpow2.f32 %v3718_v55  ;;  %v3631_v29 = vsub.f32 %v6604_v61, %v3531_v42  ;;  %3832 = vadd.xlane.f32.xlu0 %v6834_v27  ;;  %v3533_v57 = vpop.xlane.xlu0 %3532 }
 0x535   : > { %5490 = vpow2.f32 %v3716_v25  ;;  %v3632_v44 = vsub.f32 %v6607_v63, %v3533_v57 }
 0x536   : > { %v6840_v18 = vpop.eup %5480  ;;  %v3722_v59 = vmul.f32 1.442695, %v3631_v29 }
 0x537   : > { %v6842_v31 = vpop.eup %5482  ;;  %3838 = vadd.xlane.f32.xlu1 %v6840_v18  ;;  %v3535_v48 = vpop.xlane.xlu1 %3534  ;;  %v3724_v22 = vmul.f32 1.442695, %v3632_v44 }
 0x538   : > { %5492 = vpow2.f32 %v3722_v59  ;;  %v3633_v33 = vsub.f32 %v6612_v2, %v3535_v48  ;;  %3836 = vadd.xlane.f32.xlu0 %v6842_v31  ;;  %v3537_v61 = vpop.xlane.xlu0 %3536 }
 0x539   : > { %5494 = vpow2.f32 %v3720_v16  ;;  %v3634_v50 = vsub.f32 %v6615_v4, %v3537_v61 }
 0x53a   : > { %v6848_v5 = vpop.eup %5484  ;;  %v3726_v63 = vmul.f32 1.442695, %v3633_v33 }
 0x53b   : > { %v6850_v35 = vpop.eup %5486  ;;  %3842 = vadd.xlane.f32.xlu1 %v6848_v5  ;;  %v3539_v51 = vpop.xlane.xlu1 %3538  ;;  %v3728_v9 = vmul.f32 1.442695, %v3634_v50 }
 0x53c   : > { %5496 = vpow2.f32 %v3726_v63  ;;  %v3635_v38 = vsub.f32 %v6620_v1, %v3539_v51  ;;  %3840 = vadd.xlane.f32.xlu0 %v6850_v35  ;;  %v3541_v2 = vpop.xlane.xlu0 %3540 }
 0x53d   : > { %5498 = vpow2.f32 %v3724_v22  ;;  %v3636_v53 = vsub.f32 %v6623_v10, %v3541_v2 }
 0x53e   : > { %v6856_v25 = vpop.eup %5488  ;;  %v3730_v4 = vmul.f32 1.442695, %v3635_v38 }
 0x53f   : > { %v6858_v40 = vpop.eup %5490  ;;  %3846 = vadd.xlane.f32.xlu1 %v6856_v25  ;;  %v3543_v55 = vpop.xlane.xlu1 %3542  ;;  %v3732_v29 = vmul.f32 1.442695, %v3636_v53 }
 0x540   : > { %5500 = vpow2.f32 %v3730_v4  ;;  %v3637_v42 = vsub.f32 %v6628_v13, %v3543_v55  ;;  %3844 = vadd.xlane.f32.xlu0 %v6858_v40  ;;  %v3545_v1 = vpop.xlane.xlu0 %3544 }
 0x541   : > { %5502 = vpow2.f32 %v3728_v9  ;;  %v3638_v57 = vsub.f32 %v6631_v17, %v3545_v1 }
 0x542   : > { %v6864_v16 = vpop.eup %5492  ;;  %v3734_v10 = vmul.f32 1.442695, %v3637_v42 }
 0x543   : > { %v6866_v44 = vpop.eup %5494  ;;  %3850 = vadd.xlane.f32.xlu1 %v6864_v16  ;;  %v3547_v59 = vpop.xlane.xlu1 %3546  ;;  %v3736_v33 = vmul.f32 1.442695, %v3638_v57 }
 0x544   : > { %5504 = vpow2.f32 %v3734_v10  ;;  %v3639_v48 = vsub.f32 %v6636_v21, %v3547_v59  ;;  %3848 = vadd.xlane.f32.xlu0 %v6866_v44  ;;  %v3549_v13 = vpop.xlane.xlu0 %3548 }
 0x545   : > { %5506 = vpow2.f32 %v3732_v29  ;;  %v3640_v61 = vsub.f32 %v6639_v24, %v3549_v13 }
 0x546   : > { %v6872_v22 = vpop.eup %5496  ;;  %v3738_v17 = vmul.f32 1.442695, %v3639_v48 }
 0x547   : > { %v6874_v50 = vpop.eup %5498  ;;  %3854 = vadd.xlane.f32.xlu1 %v6872_v22  ;;  %v3551_v63 = vpop.xlane.xlu1 %3550  ;;  %v3740_v38 = vmul.f32 1.442695, %v3640_v61 }
 0x548   : > { %5508 = vpow2.f32 %v3738_v17  ;;  %v3641_v51 = vsub.f32 %v6644_v28, %v3551_v63  ;;  %3852 = vadd.xlane.f32.xlu0 %v6874_v50  ;;  %v3553_v21 = vpop.xlane.xlu0 %3552 }
 0x549   : > { %5510 = vpow2.f32 %v3736_v33  ;;  %v3642_v2 = vsub.f32 %v6647_v32, %v3553_v21 }
 0x54a   : > { %v6880_v9 = vpop.eup %5500  ;;  %v3742_v24 = vmul.f32 1.442695, %v3641_v51 }
 0x54b   : > { %v6882_v53 = vpop.eup %5502  ;;  %3858 = vadd.xlane.f32.xlu1 %v6880_v9  ;;  %v3555_v4 = vpop.xlane.xlu1 %3554  ;;  %v3744_v42 = vmul.f32 1.442695, %v3642_v2 }
 0x54c   : > { %5512 = vpow2.f32 %v3742_v24  ;;  %v3643_v55 = vsub.f32 %v6652_v37, %v3555_v4  ;;  %3856 = vadd.xlane.f32.xlu0 %v6882_v53  ;;  %v3557_v28 = vpop.xlane.xlu0 %3556 }
 0x54d   : > { %5514 = vpow2.f32 %v3740_v38  ;;  %v3644_v1 = vsub.f32 %v6655_v41, %v3557_v28 }
 0x54e   : > { %v6888_v29 = vpop.eup %5504  ;;  %v3746_v32 = vmul.f32 1.442695, %v3643_v55 }
 0x54f   : > { %v6890_v57 = vpop.eup %5506  ;;  %3862 = vadd.xlane.f32.xlu1 %v6888_v29  ;;  %v3559_v10 = vpop.xlane.xlu1 %3558  ;;  %v3748_v48 = vmul.f32 1.442695, %v3644_v1 }
 0x550   : > { %5516 = vpow2.f32 %v3746_v32  ;;  %v3645_v59 = vsub.f32 %v6660_v46, %v3559_v10  ;;  %3860 = vadd.xlane.f32.xlu0 %v6890_v57  ;;  %v3561_v37 = vpop.xlane.xlu0 %3560 }
 0x551   : > { %5518 = vpow2.f32 %v3744_v42  ;;  %v3646_v13 = vsub.f32 %v6663_v36, %v3561_v37 }
 0x552   : > { %v6896_v33 = vpop.eup %5508  ;;  %v3750_v41 = vmul.f32 1.442695, %v3645_v59 }
 0x553   : > { %v6898_v61 = vpop.eup %5510  ;;  %3866 = vadd.xlane.f32.xlu1 %v6896_v33  ;;  %v3563_v17 = vpop.xlane.xlu1 %3562  ;;  %v3752_v51 = vmul.f32 1.442695, %v3646_v13 }
 0x554   : > { %5520 = vpow2.f32 %v3750_v41  ;;  %v3647_v63 = vsub.f32 %v6668_v54, %v3563_v17  ;;  %3864 = vadd.xlane.f32.xlu0 %v6898_v61  ;;  %v3565_v46 = vpop.xlane.xlu0 %3564 }
 0x555   : > { %5522 = vpow2.f32 %v3748_v48  ;;  %v3648_v21 = vsub.f32 %v6671_v58, %v3565_v46  ;;  %v7195_v46 = vld [vmem:[#allocation2_spill] sm:$0xff] }
 0x556   : > { %v6904_v38 = vpop.eup %5512  ;;  %v3754_v36 = vmul.f32 1.442695, %v3647_v63 }
 0x557   : > { %v6906_v2 = vpop.eup %5514  ;;  %3870 = vadd.xlane.f32.xlu1 %v6904_v38  ;;  %v3567_v24 = vpop.xlane.xlu1 %3566  ;;  %v3756_v55 = vmul.f32 1.442695, %v3648_v21 }
 0x558   : > { %5524 = vpow2.f32 %v3754_v36  ;;  %v3649_v4 = vsub.f32 %v6676_v62, %v3567_v24  ;;  %3868 = vadd.xlane.f32.xlu0 %v6906_v2  ;;  %v3569_v54 = vpop.xlane.xlu0 %3568 }
 0x559   : > { %5526 = vpow2.f32 %v3752_v51  ;;  %v3650_v28 = vsub.f32 %v6679_v3, %v3569_v54 }
 0x55a   : > { %v6912_v42 = vpop.eup %5516  ;;  %v3758_v58 = vmul.f32 1.442695, %v3649_v4  ;;  %v7196_v4 = vld [vmem:[#allocation3_spill] sm:$0xff] }
 0x55b   : > { %v6914_v1 = vpop.eup %5518  ;;  %3874 = vadd.xlane.f32.xlu1 %v6912_v42  ;;  %v3571_v32 = vpop.xlane.xlu1 %3570  ;;  %v3760_v59 = vmul.f32 1.442695, %v3650_v28  ;;  %v7197_v28 = vld [vmem:[#allocation4_spill] sm:$0xff] }
 0x55c   : > { %5528 = vpow2.f32 %v3758_v58  ;;  %v3651_v10 = vsub.f32 %v6684_v7, %v3571_v32  ;;  %3872 = vadd.xlane.f32.xlu0 %v6914_v1  ;;  %v3573_v62 = vpop.xlane.xlu0 %3572 }
 0x55d   : > { %5530 = vpow2.f32 %v3756_v55  ;;  %v3652_v37 = vsub.f32 %v6687_v15, %v3573_v62 }
 0x55e   : > { %v6920_v48 = vpop.eup %5520  ;;  %v3762_v3 = vmul.f32 1.442695, %v3651_v10 }
 0x55f   : > { %v6922_v13 = vpop.eup %5522  ;;  %3878 = vadd.xlane.f32.xlu1 %v6920_v48  ;;  %v3575_v41 = vpop.xlane.xlu1 %3574  ;;  %v3764_v63 = vmul.f32 1.442695, %v3652_v37  ;;  %v7198_v37 = vld [vmem:[#allocation5_spill] sm:$0xff] }
 0x560   : > { %5532 = vpow2.f32 %v3762_v3  ;;  %v3653_v17 = vsub.f32 %v6692_v45, %v3575_v41  ;;  %3876 = vadd.xlane.f32.xlu0 %v6922_v13  ;;  %v3577_v7 = vpop.xlane.xlu0 %3576 }
 0x561   : > { %5534 = vpow2.f32 %v3760_v59  ;;  %v3654_v51 = vsub.f32 %v7195_v46, %v3577_v7  ;;  %v7199_v7 = vld [vmem:[#allocation6_spill] sm:$0xff] }
 0x562   : > { %v6928_v21 = vpop.eup %5524  ;;  %v3766_v15 = vmul.f32 1.442695, %v3653_v17 }
 0x563   : > { %v6930_v36 = vpop.eup %5526  ;;  %3882 = vadd.xlane.f32.xlu1 %v6928_v21  ;;  %v3579_v24 = vpop.xlane.xlu1 %3578  ;;  %v3768_v55 = vmul.f32 1.442695, %v3654_v51 }
 0x564   : > { %5536 = vpow2.f32 %v3766_v15  ;;  %v3655_v54 = vsub.f32 %v7196_v4, %v3579_v24  ;;  %3880 = vadd.xlane.f32.xlu0 %v6930_v36  ;;  %v3581_v45 = vpop.xlane.xlu0 %3580  ;;  %v7200_v4 = vld [vmem:[#allocation7_spill] sm:$0xff] }
 0x565   : > { %5538 = vpow2.f32 %v3764_v63  ;;  %v3656_v58 = vsub.f32 %v7197_v28, %v3581_v45 }
 0x566   : > { %v6936_v32 = vpop.eup %5528  ;;  %v3770_v10 = vmul.f32 1.442695, %v3655_v54 }
 0x567   : > { %v6938_v62 = vpop.eup %5530  ;;  %3886 = vadd.xlane.f32.xlu1 %v6936_v32  ;;  %v3583_v59 = vpop.xlane.xlu1 %3582  ;;  %v3772_v17 = vmul.f32 1.442695, %v3656_v58 }
 0x568   : > { %5540 = vpow2.f32 %v3770_v10  ;;  %v3657_v3 = vsub.f32 %v7198_v37, %v3583_v59  ;;  %3884 = vadd.xlane.f32.xlu0 %v6938_v62  ;;  %v3585_v41 = vpop.xlane.xlu0 %3584 }
 0x569   : > { %5542 = vpow2.f32 %v3768_v55  ;;  %v3658_v63 = vsub.f32 %v7199_v7, %v3585_v41  ;;  %v7201_v55 = vld [vmem:[#allocation8_spill] sm:$0xff]  ;;  %v7204_v41 = vld [vmem:[#allocation9_spill] sm:$0xff] }
 0x56a   : > { %v6944_v46 = vpop.eup %5532  ;;  %v3774_v51 = vmul.f32 1.442695, %v3657_v3 }
 0x56b   : > { %v6946_v15 = vpop.eup %5534  ;;  %3890 = vadd.xlane.f32.xlu1 %v6944_v46  ;;  %v3587_v24 = vpop.xlane.xlu1 %3586  ;;  %v3776_v28 = vmul.f32 1.442695, %v3658_v63 }
 0x56c   : > { %5544 = vpow2.f32 %v3774_v51  ;;  %v3659_v54 = vsub.f32 %v7200_v4, %v3587_v24  ;;  %3888 = vadd.xlane.f32.xlu0 %v6946_v15  ;;  %v3589_v45 = vpop.xlane.xlu0 %3588 }
 0x56d   : > { %5546 = vpow2.f32 %v3772_v17  ;;  %v3660_v58 = vsub.f32 %v7201_v55, %v3589_v45  ;;  %v7205_v17 = vld [vmem:[#allocation10_spill] sm:$0xff] }
 0x56e   : > { %v6952_v10 = vpop.eup %5536  ;;  %v3778_v59 = vmul.f32 1.442695, %v3659_v54 }
 0x56f   : > { %7202 = vst [vmem:[#allocation2_spill] sm:$0xff] %v6952_v10  ;;  %v6954_v37 = vpop.eup %5538  ;;  %3894 = vadd.xlane.f32.xlu1 %v6952_v10  ;;  %v3591_v3 = vpop.xlane.xlu1 %3590  ;;  %v3780_v24 = vmul.f32 1.442695, %v3660_v58  ;;  %v7208_v10 = vld [vmem:[#allocation11_spill] sm:$0xff] }
 0x570   : > { %7203 = vst [vmem:[#allocation3_spill] sm:$0xff] %v6954_v37  ;;  %5548 = vpow2.f32 %v3778_v59  ;;  %v3661_v7 = vsub.f32 %v7204_v41, %v3591_v3  ;;  %3892 = vadd.xlane.f32.xlu0 %v6954_v37  ;;  %v3593_v51 = vpop.xlane.xlu0 %3592 }
 0x571   : > { %5550 = vpow2.f32 %v3776_v28  ;;  %v3662_v63 = vsub.f32 %v7205_v17, %v3593_v51  ;;  %v7209_v28 = vld [vmem:[#allocation12_spill] sm:$0xff] }
 0x572   : > { %v6960_v4 = vpop.eup %5540  ;;  %v3782_v45 = vmul.f32 1.442695, %v3661_v7 }
 0x573   : > { %7206 = vst [vmem:[#allocation4_spill] sm:$0xff] %v6960_v4  ;;  %v6962_v55 = vpop.eup %5542  ;;  %3898 = vadd.xlane.f32.xlu1 %v6960_v4  ;;  %v3595_v54 = vpop.xlane.xlu1 %3594  ;;  %v3784_v41 = vmul.f32 1.442695, %v3662_v63  ;;  %v7211_v4 = vld [vmem:[#allocation13_spill] sm:$0xff] }
 0x574   : > { %7207 = vst [vmem:[#allocation5_spill] sm:$0xff] %v6962_v55  ;;  %5552 = vpow2.f32 %v3782_v45  ;;  %v3663_v59 = vsub.f32 %v7208_v10, %v3595_v54  ;;  %3896 = vadd.xlane.f32.xlu0 %v6962_v55  ;;  %v3597_v3 = vpop.xlane.xlu0 %3596 }
 0x575   : > { %5554 = vpow2.f32 %v3780_v24  ;;  %v3664_v58 = vsub.f32 %v7209_v28, %v3597_v3  ;;  %v7212_v24 = vld [vmem:[#allocation14_spill] sm:$0xff] }
 0x576   : > { %v6968_v37 = vpop.eup %5544  ;;  %v3786_v51 = vmul.f32 1.442695, %v3663_v59 }
 0x577   : > { %7210 = vst [vmem:[#allocation6_spill] sm:$0xff] %v6968_v37  ;;  %v6970_v17 = vpop.eup %5546  ;;  %3902 = vadd.xlane.f32.xlu1 %v6968_v37  ;;  %v3599_v7 = vpop.xlane.xlu1 %3598  ;;  %v3788_v54 = vmul.f32 1.442695, %v3664_v58  ;;  %v7213_v37 = vld [vmem:[#allocation15_spill] sm:$0xff] }
 0x578   : > { %5556 = vpow2.f32 %v3786_v51  ;;  %v3665_v45 = vsub.f32 %v7211_v4, %v3599_v7  ;;  %3900 = vadd.xlane.f32.xlu0 %v6970_v17  ;;  %v3601_v10 = vpop.xlane.xlu0 %3600 }
 0x579   : > { %5558 = vpow2.f32 %v3784_v41  ;;  %v3666_v63 = vsub.f32 %v7212_v24, %v3601_v10 }
 0x57a   : > { %v6976_v55 = vpop.eup %5548  ;;  %v3790_v3 = vmul.f32 1.442695, %v3665_v45 }
 0x57b   : > { %v6978_v28 = vpop.eup %5550  ;;  %3906 = vadd.xlane.f32.xlu1 %v6976_v55  ;;  %v3603_v59 = vpop.xlane.xlu1 %3602  ;;  %v3792_v4 = vmul.f32 1.442695, %v3666_v63 }
 0x57c   : > { %5560 = vpow2.f32 %v3790_v3  ;;  %v3667_v51 = vsub.f32 %v7213_v37, %v3603_v59  ;;  %3904 = vadd.xlane.f32.xlu0 %v6978_v28 }
 0x57d   : > { %5562 = vpow2.f32 %v3788_v54 }
 0x57e   : > { %v6983_v7 = vpop.eup %5552  ;;  %v3794_v41 = vmul.f32 1.442695, %v3667_v51 }
 0x57f   : > { %v6985_v58 = vpop.eup %5554  ;;  %3910 = vadd.xlane.f32.xlu1 %v6983_v7 }
 0x580   : > { %5564 = vpow2.f32 %v3794_v41  ;;  %3908 = vadd.xlane.f32.xlu0 %v6985_v58 }
 0x581   : > { %5566 = vpow2.f32 %v3792_v4 }
 0x582   : > { %v6989_v45 = vpop.eup %5556 }
 0x583   : > { %v6991_v10 = vpop.eup %5558  ;;  %3914 = vadd.xlane.f32.xlu1 %v6989_v45 }
 0x584   : > { %7214 = vst [vmem:[#allocation7_spill] sm:$0xff] %v6991_v10  ;;  %3912 = vadd.xlane.f32.xlu0 %v6991_v10 }
 0x586   : > { %v6995_v37 = vpop.eup %5560 }
 0x587   : > { %7215 = vst [vmem:[#allocation8_spill] sm:$0xff] %v6995_v37  ;;  %v6997_v54 = vpop.eup %5562  ;;  %3918 = vadd.xlane.f32.xlu1 %v6995_v37 }
 0x588   : > { %7216 = vst [vmem:[#allocation9_spill] sm:$0xff] %v6997_v54  ;;  %3916 = vadd.xlane.f32.xlu0 %v6997_v54 }
 0x58a   : > { %v7001_v24 = vpop.eup %5564 }
 0x58b   : > { %7217 = vst [vmem:[#allocation10_spill] sm:$0xff] %v7001_v24  ;;  %v7003_v63 = vpop.eup %5566  ;;  %3922 = vadd.xlane.f32.xlu1 %v7001_v24 }
 0x58c   : > { %7218 = vst [vmem:[#allocation11_spill] sm:$0xff] %v7003_v63  ;;  %3920 = vadd.xlane.f32.xlu0 %v7003_v63 }
 0x598   : > { %v3799_v3 = vpop.xlane.xlu1 %3798 }
 0x599   : > { %5568 = vrcp.f32 %v3799_v3 }
 0x59c   : > { %v3803_v59 = vpop.xlane.xlu1 %3802 }
 0x59d   : > { %5570 = vrcp.f32 %v3803_v59  ;;  %v3797_v51 = vpop.xlane.xlu0 %3796 }
 0x59e   : > { %5572 = vrcp.f32 %v3797_v51 }
 0x5a1   : > { %v3801_v4 = vpop.xlane.xlu0 %3800 }
 0x5a2   : > { %5574 = vrcp.f32 %v3801_v4 }
 0x5a3   : > { %v5569_v41 = vpop.eup %5568 }
 0x5a4   : > { %v3989_v63 = vmul.f32 %v5569_v41, %v6758_v8  ;;  %v3807_v24 = vpop.xlane.xlu1 %3806 }
 0x5a5   : > { %5576 = vrcp.f32 %v3807_v24  ;;  %v3805_v3 = vpop.xlane.xlu0 %3804 }
 0x5a6   : > { %4053 = vst [vmem:[%s7012_s29 + $0x8] sm:$0xff] %v3989_v63  ;;  %5578 = vrcp.f32 %v3805_v3 }
 0x5a7   : > { %v5571_v59 = vpop.eup %5570 }
 0x5a8   : > { %v5573_v51 = vpop.eup %5572  ;;  %v3991_v4 = vmul.f32 %v5571_v59, %v6763_v43  ;;  %v3811_v54 = vpop.xlane.xlu1 %3810 }
 0x5a9   : > { %v3988_v37 = vmul.f32 %v5573_v51, %v6765_v60  ;;  %5580 = vrcp.f32 %v3811_v54  ;;  %v3809_v10 = vpop.xlane.xlu0 %3808 }
 0x5aa   : > { %4055 = vst [vmem:[%s7012_s29 + $0x18] sm:$0xff] %v3991_v4  ;;  %5582 = vrcp.f32 %v3809_v10 }
 0x5ab   : > { %4052 = vst [vmem:[%s7012_s29] sm:$0xff] %v3988_v37 }
 0x5ac   : > { %v5575_v8 = vpop.eup %5574  ;;  %v3815_v41 = vpop.xlane.xlu1 %3814 }
 0x5ad   : > { %v3990_v24 = vmul.f32 %v5575_v8, %v6771_v47  ;;  %5584 = vrcp.f32 %v3815_v41  ;;  %v3813_v63 = vpop.xlane.xlu0 %3812 }
 0x5ae   : > { %5586 = vrcp.f32 %v3813_v63 }
 0x5af   : > { %v5577_v3 = vpop.eup %5576  ;;  %4054 = vst [vmem:[%s7012_s29 + $0x10] sm:$0xff] %v3990_v24 }
 0x5b0   : > { %v5579_v43 = vpop.eup %5578  ;;  %v3993_v60 = vmul.f32 %v5577_v3, %v6776_v0  ;;  %v3819_v54 = vpop.xlane.xlu1 %3818 }
 0x5b1   : > { %v3992_v59 = vmul.f32 %v5579_v43, %v6778_v49  ;;  %5588 = vrcp.f32 %v3819_v54  ;;  %v3817_v10 = vpop.xlane.xlu0 %3816 }
 0x5b2   : > { %4057 = vst [vmem:[%s7012_s29 + $0x28] sm:$0xff] %v3993_v60  ;;  %5590 = vrcp.f32 %v3817_v10 }
 0x5b3   : > { %v5581_v37 = vpop.eup %5580  ;;  %4056 = vst [vmem:[%s7012_s29 + $0x20] sm:$0xff] %v3992_v59 }
 0x5b4   : > { %v5583_v47 = vpop.eup %5582  ;;  %v3995_v51 = vmul.f32 %v5581_v37, %v6784_v14  ;;  %v3823_v4 = vpop.xlane.xlu1 %3822 }
 0x5b5   : > { %v3994_v8 = vmul.f32 %v5583_v47, %v6786_v56  ;;  %5592 = vrcp.f32 %v3823_v4  ;;  %v3821_v0 = vpop.xlane.xlu0 %3820 }
 0x5b6   : > { %4059 = vst [vmem:[%s7012_s29 + $0x38] sm:$0xff] %v3995_v51  ;;  %5594 = vrcp.f32 %v3821_v0 }
 0x5b7   : > { %v5585_v49 = vpop.eup %5584  ;;  %4058 = vst [vmem:[%s7012_s29 + $0x30] sm:$0xff] %v3994_v8 }
 0x5b8   : > { %v5587_v41 = vpop.eup %5586  ;;  %v3997_v24 = vmul.f32 %v5585_v49, %v6792_v20  ;;  %v3827_v63 = vpop.xlane.xlu1 %3826 }
 0x5b9   : > { %v3996_v3 = vmul.f32 %v5587_v41, %v6794_v26  ;;  %5596 = vrcp.f32 %v3827_v63  ;;  %v3825_v14 = vpop.xlane.xlu0 %3824 }
 0x5ba   : > { %4061 = vst [vmem:[%s7012_s29 + $0x48] sm:$0xff] %v3997_v24  ;;  %5598 = vrcp.f32 %v3825_v14 }
 0x5bb   : > { %v5589_v56 = vpop.eup %5588  ;;  %4060 = vst [vmem:[%s7012_s29 + $0x40] sm:$0xff] %v3996_v3 }
 0x5bc   : > { %v5591_v43 = vpop.eup %5590  ;;  %v3999_v60 = vmul.f32 %v5589_v56, %v6800_v11  ;;  %v3831_v54 = vpop.xlane.xlu1 %3830 }
 0x5bd   : > { %v3998_v59 = vmul.f32 %v5591_v43, %v6802_v23  ;;  %5600 = vrcp.f32 %v3831_v54  ;;  %v3829_v20 = vpop.xlane.xlu0 %3828 }
 0x5be   : > { %4063 = vst [vmem:[%s7012_s29 + $0x58] sm:$0xff] %v3999_v60  ;;  %5602 = vrcp.f32 %v3829_v20 }
 0x5bf   : > { %v5593_v26 = vpop.eup %5592  ;;  %4062 = vst [vmem:[%s7012_s29 + $0x50] sm:$0xff] %v3998_v59 }
 0x5c0   : > { %v5595_v10 = vpop.eup %5594  ;;  %v4001_v37 = vmul.f32 %v5593_v26, %v6808_v12  ;;  %v3835_v47 = vpop.xlane.xlu1 %3834 }
 0x5c1   : > { %v4000_v51 = vmul.f32 %v5595_v10, %v6810_v30  ;;  %5604 = vrcp.f32 %v3835_v47  ;;  %v3833_v11 = vpop.xlane.xlu0 %3832 }
 0x5c2   : > { %4065 = vst [vmem:[%s7012_s29 + $0x68] sm:$0xff] %v4001_v37  ;;  %5606 = vrcp.f32 %v3833_v11 }
 0x5c3   : > { %v5597_v23 = vpop.eup %5596  ;;  %4064 = vst [vmem:[%s7012_s29 + $0x60] sm:$0xff] %v4000_v51 }
 0x5c4   : > { %v5599_v4 = vpop.eup %5598  ;;  %v4003_v8 = vmul.f32 %v5597_v23, %v6816_v34  ;;  %v3839_v0 = vpop.xlane.xlu1 %3838 }
 0x5c5   : > { %v4002_v49 = vmul.f32 %v5599_v4, %v6818_v52  ;;  %5608 = vrcp.f32 %v3839_v0  ;;  %v3837_v12 = vpop.xlane.xlu0 %3836 }
 0x5c6   : > { %4067 = vst [vmem:[%s7012_s29 + $0x78] sm:$0xff] %v4003_v8  ;;  %5610 = vrcp.f32 %v3837_v12 }
 0x5c7   : > { %v5601_v30 = vpop.eup %5600  ;;  %4066 = vst [vmem:[%s7012_s29 + $0x70] sm:$0xff] %v4002_v49 }
 0x5c8   : > { %v5603_v41 = vpop.eup %5602  ;;  %v4005_v24 = vmul.f32 %v5601_v30, %v6824_v6  ;;  %v3843_v63 = vpop.xlane.xlu1 %3842 }
 0x5c9   : > { %v4004_v3 = vmul.f32 %v5603_v41, %v6826_v19  ;;  %5612 = vrcp.f32 %v3843_v63  ;;  %v3841_v34 = vpop.xlane.xlu0 %3840 }
 0x5ca   : > { %4069 = vst [vmem:[%s7012_s29 + $0x88] sm:$0xff] %v4005_v24  ;;  %5614 = vrcp.f32 %v3841_v34 }
 0x5cb   : > { %v5605_v52 = vpop.eup %5604  ;;  %4068 = vst [vmem:[%s7012_s29 + $0x80] sm:$0xff] %v4004_v3 }
 0x5cc   : > { %v5607_v14 = vpop.eup %5606  ;;  %v4007_v56 = vmul.f32 %v5605_v52, %v6832_v39  ;;  %v3847_v43 = vpop.xlane.xlu1 %3846 }
 0x5cd   : > { %v4006_v60 = vmul.f32 %v5607_v14, %v6834_v27  ;;  %5616 = vrcp.f32 %v3847_v43  ;;  %v3845_v6 = vpop.xlane.xlu0 %3844 }
 0x5ce   : > { %4071 = vst [vmem:[%s7012_s29 + $0x98] sm:$0xff] %v4007_v56  ;;  %5618 = vrcp.f32 %v3845_v6 }
 0x5cf   : > { %v5609_v19 = vpop.eup %5608  ;;  %4070 = vst [vmem:[%s7012_s29 + $0x90] sm:$0xff] %v4006_v60 }
 0x5d0   : > { %v5611_v54 = vpop.eup %5610  ;;  %v4009_v59 = vmul.f32 %v5609_v19, %v6840_v18  ;;  %v3851_v20 = vpop.xlane.xlu1 %3850 }
 0x5d1   : > { %v4008_v26 = vmul.f32 %v5611_v54, %v6842_v31  ;;  %5620 = vrcp.f32 %v3851_v20  ;;  %v3849_v39 = vpop.xlane.xlu0 %3848 }
 0x5d2   : > { %4073 = vst [vmem:[%s7012_s29 + $0xa8] sm:$0xff] %v4009_v59  ;;  %5622 = vrcp.f32 %v3849_v39 }
 0x5d3   : > { %v5613_v27 = vpop.eup %5612  ;;  %4072 = vst [vmem:[%s7012_s29 + $0xa0] sm:$0xff] %v4008_v26 }
 0x5d4   : > { %v5615_v10 = vpop.eup %5614  ;;  %v4011_v37 = vmul.f32 %v5613_v27, %v6848_v5  ;;  %v3855_v47 = vpop.xlane.xlu1 %3854 }
 0x5d5   : > { %v4010_v51 = vmul.f32 %v5615_v10, %v6850_v35  ;;  %5624 = vrcp.f32 %v3855_v47  ;;  %v3853_v18 = vpop.xlane.xlu0 %3852 }
 0x5d6   : > { %4075 = vst [vmem:[%s7012_s29 + $0xb8] sm:$0xff] %v4011_v37  ;;  %5626 = vrcp.f32 %v3853_v18 }
 0x5d7   : > { %v5617_v31 = vpop.eup %5616  ;;  %4074 = vst [vmem:[%s7012_s29 + $0xb0] sm:$0xff] %v4010_v51 }
 0x5d8   : > { %v5619_v11 = vpop.eup %5618  ;;  %v4013_v23 = vmul.f32 %v5617_v31, %v6856_v25  ;;  %v3859_v4 = vpop.xlane.xlu1 %3858 }
 0x5d9   : > { %v4012_v8 = vmul.f32 %v5619_v11, %v6858_v40  ;;  %5628 = vrcp.f32 %v3859_v4  ;;  %v3857_v5 = vpop.xlane.xlu0 %3856 }
 0x5da   : > { %4077 = vst [vmem:[%s7012_s29 + $0xc8] sm:$0xff] %v4013_v23  ;;  %5630 = vrcp.f32 %v3857_v5 }
 0x5db   : > { %v5621_v35 = vpop.eup %5620  ;;  %4076 = vst [vmem:[%s7012_s29 + $0xc0] sm:$0xff] %v4012_v8 }
 0x5dc   : > { %v5623_v0 = vpop.eup %5622  ;;  %v4015_v49 = vmul.f32 %v5621_v35, %v6864_v16  ;;  %v3863_v12 = vpop.xlane.xlu1 %3862 }
 0x5dd   : > { %v4014_v30 = vmul.f32 %v5623_v0, %v6866_v44  ;;  %5632 = vrcp.f32 %v3863_v12  ;;  %v3861_v25 = vpop.xlane.xlu0 %3860 }
 0x5de   : > { %4079 = vst [vmem:[%s7012_s29 + $0xd8] sm:$0xff] %v4015_v49  ;;  %5634 = vrcp.f32 %v3861_v25 }
 0x5df   : > { %v5625_v40 = vpop.eup %5624  ;;  %4078 = vst [vmem:[%s7012_s29 + $0xd0] sm:$0xff] %v4014_v30 }
 0x5e0   : > { %v5627_v41 = vpop.eup %5626  ;;  %v4017_v24 = vmul.f32 %v5625_v40, %v6872_v22  ;;  %v3867_v63 = vpop.xlane.xlu1 %3866 }
 0x5e1   : > { %v4016_v3 = vmul.f32 %v5627_v41, %v6874_v50  ;;  %5636 = vrcp.f32 %v3867_v63  ;;  %v3865_v16 = vpop.xlane.xlu0 %3864 }
 0x5e2   : > { %4081 = vst [vmem:[%s7012_s29 + $0xe8] sm:$0xff] %v4017_v24  ;;  %5638 = vrcp.f32 %v3865_v16 }
 0x5e3   : > { %v5629_v44 = vpop.eup %5628  ;;  %4080 = vst [vmem:[%s7012_s29 + $0xe0] sm:$0xff] %v4016_v3 }
 0x5e4   : > { %v5631_v34 = vpop.eup %5630  ;;  %v4019_v52 = vmul.f32 %v5629_v44, %v6880_v9  ;;  %v3871_v14 = vpop.xlane.xlu1 %3870  ;;  %v7219_v44 = vld [vmem:[#allocation2_spill] sm:$0xff] }
 0x5e5   : > { %v4018_v56 = vmul.f32 %v5631_v34, %v6882_v53  ;;  %5640 = vrcp.f32 %v3871_v14  ;;  %v3869_v22 = vpop.xlane.xlu0 %3868  ;;  %v7220_v14 = vld [vmem:[#allocation3_spill] sm:$0xff] }
 0x5e6   : > { %4083 = vst [vmem:[%s7012_s29 + $0xf8] sm:$0xff] %v4019_v52  ;;  %5642 = vrcp.f32 %v3869_v22 }
 0x5e7   : > { %v5633_v50 = vpop.eup %5632  ;;  %4082 = vst [vmem:[%s7012_s29 + $0xf0] sm:$0xff] %v4018_v56 }
 0x5e8   : > { %v5635_v43 = vpop.eup %5634  ;;  %v4021_v60 = vmul.f32 %v5633_v50, %v6888_v29  ;;  %v3875_v6 = vpop.xlane.xlu1 %3874  ;;  %v7221_v50 = vld [vmem:[#allocation4_spill] sm:$0xff] }
 0x5e9   : > { %v4020_v19 = vmul.f32 %v5635_v43, %v6890_v57  ;;  %5644 = vrcp.f32 %v3875_v6  ;;  %v3873_v9 = vpop.xlane.xlu0 %3872  ;;  %v7222_v6 = vld [vmem:[#allocation5_spill] sm:$0xff] }
 0x5ea   : > { %4085 = vst [vmem:[%s7012_s29 + $0x108] sm:$0xff] %v4021_v60  ;;  %5646 = vrcp.f32 %v3873_v9 }
 0x5eb   : > { %v5637_v53 = vpop.eup %5636  ;;  %4084 = vst [vmem:[%s7012_s29 + $0x100] sm:$0xff] %v4020_v19 }
 0x5ec   : > { %v5639_v54 = vpop.eup %5638  ;;  %v4023_v59 = vmul.f32 %v5637_v53, %v6896_v33  ;;  %v3879_v20 = vpop.xlane.xlu1 %3878 }
 0x5ed   : > { %v4022_v26 = vmul.f32 %v5639_v54, %v6898_v61  ;;  %5648 = vrcp.f32 %v3879_v20  ;;  %v3877_v29 = vpop.xlane.xlu0 %3876 }
 0x5ee   : > { %4087 = vst [vmem:[%s7012_s29 + $0x118] sm:$0xff] %v4023_v59  ;;  %5650 = vrcp.f32 %v3877_v29  ;;  %v7223_v59 = vld [vmem:[#allocation6_spill] sm:$0xff] }
 0x5ef   : > { %v5641_v57 = vpop.eup %5640  ;;  %4086 = vst [vmem:[%s7012_s29 + $0x110] sm:$0xff] %v4022_v26 }
 0x5f0   : > { %v5643_v39 = vpop.eup %5642  ;;  %v4025_v27 = vmul.f32 %v5641_v57, %v6904_v38  ;;  %v3883_v10 = vpop.xlane.xlu1 %3882 }
 0x5f1   : > { %v4024_v37 = vmul.f32 %v5643_v39, %v6906_v2  ;;  %5652 = vrcp.f32 %v3883_v10  ;;  %v3881_v33 = vpop.xlane.xlu0 %3880 }
 0x5f2   : > { %4089 = vst [vmem:[%s7012_s29 + $0x128] sm:$0xff] %v4025_v27  ;;  %5654 = vrcp.f32 %v3881_v33 }
 0x5f3   : > { %v5645_v61 = vpop.eup %5644  ;;  %4088 = vst [vmem:[%s7012_s29 + $0x120] sm:$0xff] %v4024_v37 }
 0x5f4   : > { %v5647_v47 = vpop.eup %5646  ;;  %v4027_v51 = vmul.f32 %v5645_v61, %v6912_v42  ;;  %v3887_v18 = vpop.xlane.xlu1 %3886 }
 0x5f5   : > { %v4026_v31 = vmul.f32 %v5647_v47, %v6914_v1  ;;  %5656 = vrcp.f32 %v3887_v18  ;;  %v3885_v38 = vpop.xlane.xlu0 %3884 }
 0x5f6   : > { %4091 = vst [vmem:[%s7012_s29 + $0x138] sm:$0xff] %v4027_v51  ;;  %5658 = vrcp.f32 %v3885_v38 }
 0x5f7   : > { %v5649_v2 = vpop.eup %5648  ;;  %4090 = vst [vmem:[%s7012_s29 + $0x130] sm:$0xff] %v4026_v31 }
 0x5f8   : > { %v5651_v11 = vpop.eup %5650  ;;  %v4029_v23 = vmul.f32 %v5649_v2, %v6920_v48  ;;  %v3891_v4 = vpop.xlane.xlu1 %3890 }
 0x5f9   : > { %v4028_v8 = vmul.f32 %v5651_v11, %v6922_v13  ;;  %5660 = vrcp.f32 %v3891_v4  ;;  %v3889_v42 = vpop.xlane.xlu0 %3888  ;;  %v7224_v11 = vld [vmem:[#allocation7_spill] sm:$0xff] }
 0x5fa   : > { %4093 = vst [vmem:[%s7012_s29 + $0x148] sm:$0xff] %v4029_v23  ;;  %5662 = vrcp.f32 %v3889_v42  ;;  %v7226_v42 = vld [vmem:[#allocation9_spill] sm:$0xff] }
 0x5fb   : > { %v5653_v1 = vpop.eup %5652  ;;  %4092 = vst [vmem:[%s7012_s29 + $0x140] sm:$0xff] %v4028_v8 }
 0x5fc   : > { %v5655_v5 = vpop.eup %5654  ;;  %v4031_v35 = vmul.f32 %v5653_v1, %v6928_v21  ;;  %v3895_v0 = vpop.xlane.xlu1 %3894 }
 0x5fd   : > { %v4030_v49 = vmul.f32 %v5655_v5, %v6930_v36  ;;  %5664 = vrcp.f32 %v3895_v0  ;;  %v3893_v48 = vpop.xlane.xlu0 %3892  ;;  %v7227_v0 = vld [vmem:[#allocation10_spill] sm:$0xff] }
 0x5fe   : > { %4095 = vst [vmem:[%s7012_s29 + $0x158] sm:$0xff] %v4031_v35  ;;  %5666 = vrcp.f32 %v3893_v48  ;;  %v7228_v48 = vld [vmem:[#allocation11_spill] sm:$0xff] }
 0x5ff   : > { %v5657_v13 = vpop.eup %5656  ;;  %4094 = vst [vmem:[%s7012_s29 + $0x150] sm:$0xff] %v4030_v49 }
 0x600   : > { %v5659_v12 = vpop.eup %5658  ;;  %v4033_v30 = vmul.f32 %v5657_v13, %v6936_v32  ;;  %v3899_v25 = vpop.xlane.xlu1 %3898 }
 0x601   : > { %v4032_v40 = vmul.f32 %v5659_v12, %v6938_v62  ;;  %5668 = vrcp.f32 %v3899_v25  ;;  %v3897_v21 = vpop.xlane.xlu0 %3896 }
 0x602   : > { %4097 = vst [vmem:[%s7012_s29 + $0x168] sm:$0xff] %v4033_v30  ;;  %5670 = vrcp.f32 %v3897_v21 }
 0x603   : > { %v5661_v36 = vpop.eup %5660  ;;  %4096 = vst [vmem:[%s7012_s29 + $0x160] sm:$0xff] %v4032_v40 }
 0x604   : > { %v5663_v41 = vpop.eup %5662  ;;  %v4035_v24 = vmul.f32 %v5661_v36, %v6944_v46  ;;  %v3903_v63 = vpop.xlane.xlu1 %3902 }
 0x605   : > { %v4034_v3 = vmul.f32 %v5663_v41, %v6946_v15  ;;  %5672 = vrcp.f32 %v3903_v63  ;;  %v3901_v32 = vpop.xlane.xlu0 %3900 }
 0x606   : > { %4099 = vst [vmem:[%s7012_s29 + $0x178] sm:$0xff] %v4035_v24  ;;  %5674 = vrcp.f32 %v3901_v32 }
 0x607   : > { %v5665_v62 = vpop.eup %5664  ;;  %4098 = vst [vmem:[%s7012_s29 + $0x170] sm:$0xff] %v4034_v3 }
 0x608   : > { %v5667_v16 = vpop.eup %5666  ;;  %v4037_v34 = vmul.f32 %v5665_v62, %v7219_v44  ;;  %v3907_v52 = vpop.xlane.xlu1 %3906 }
 0x609   : > { %v4036_v56 = vmul.f32 %v5667_v16, %v7220_v14  ;;  %5676 = vrcp.f32 %v3907_v52  ;;  %v3905_v46 = vpop.xlane.xlu0 %3904 }
 0x60a   : > { %4101 = vst [vmem:[%s7012_s29 + $0x188] sm:$0xff] %v4037_v34  ;;  %5678 = vrcp.f32 %v3905_v46 }
 0x60b   : > { %v5669_v15 = vpop.eup %5668  ;;  %4100 = vst [vmem:[%s7012_s29 + $0x180] sm:$0xff] %v4036_v56 }
 0x60c   : > { %v5671_v22 = vpop.eup %5670  ;;  %v4039_v43 = vmul.f32 %v5669_v15, %v7221_v50  ;;  %v3911_v60 = vpop.xlane.xlu1 %3910 }
 0x60d   : > { %v4038_v19 = vmul.f32 %v5671_v22, %v7222_v6  ;;  %5680 = vrcp.f32 %v3911_v60  ;;  %v3909_v9 = vpop.xlane.xlu0 %3908 }
 0x60e   : > { %4103 = vst [vmem:[%s7012_s29 + $0x198] sm:$0xff] %v4039_v43  ;;  %5682 = vrcp.f32 %v3909_v9 }
 0x60f   : > { %v5673_v53 = vpop.eup %5672  ;;  %4102 = vst [vmem:[%s7012_s29 + $0x190] sm:$0xff] %v4038_v19 }
 0x610   : > { %v5675_v54 = vpop.eup %5674  ;;  %v4041_v20 = vmul.f32 %v5673_v53, %v7223_v59  ;;  %v3915_v26 = vpop.xlane.xlu1 %3914 }
 0x611   : > { %v4040_v29 = vmul.f32 %v5675_v54, %v6970_v17  ;;  %5684 = vrcp.f32 %v3915_v26  ;;  %v3913_v57 = vpop.xlane.xlu0 %3912 }
 0x612   : > { %4105 = vst [vmem:[%s7012_s29 + $0x1a8] sm:$0xff] %v4041_v20  ;;  %5686 = vrcp.f32 %v3913_v57 }
 0x613   : > { %v5677_v39 = vpop.eup %5676  ;;  %4104 = vst [vmem:[%s7012_s29 + $0x1a0] sm:$0xff] %v4040_v29 }
 0x614   : > { %v5679_v27 = vpop.eup %5678  ;;  %v4043_v10 = vmul.f32 %v5677_v39, %v6976_v55  ;;  %v3919_v37 = vpop.xlane.xlu1 %3918 }
 0x615   : > { %v4042_v33 = vmul.f32 %v5679_v27, %v6978_v28  ;;  %5688 = vrcp.f32 %v3919_v37  ;;  %v3917_v61 = vpop.xlane.xlu0 %3916 }
 0x616   : > { %4107 = vst [vmem:[%s7012_s29 + $0x1b8] sm:$0xff] %v4043_v10  ;;  %5690 = vrcp.f32 %v3917_v61 }
 0x617   : > { %v5681_v17 = vpop.eup %5680  ;;  %4106 = vst [vmem:[%s7012_s29 + $0x1b0] sm:$0xff] %v4042_v33 }
 0x618   : > { %v5683_v47 = vpop.eup %5682  ;;  %v4045_v51 = vmul.f32 %v5681_v17, %v6983_v7  ;;  %v3923_v18 = vpop.xlane.xlu1 %3922 }
 0x619   : > { %v4044_v31 = vmul.f32 %v5683_v47, %v6985_v58  ;;  %5692 = vrcp.f32 %v3923_v18  ;;  %v3921_v55 = vpop.xlane.xlu0 %3920  ;;  %v7225_v58 = vld [vmem:[#allocation8_spill] sm:$0xff] }
 0x61a   : > { %4109 = vst [vmem:[%s7012_s29 + $0x1c8] sm:$0xff] %v4045_v51  ;;  %5694 = vrcp.f32 %v3921_v55 }
 0x61b   : > { %v5685_v28 = vpop.eup %5684  ;;  %4108 = vst [vmem:[%s7012_s29 + $0x1c0] sm:$0xff] %v4044_v31 }
 0x61c   : > { %v5687_v38 = vpop.eup %5686  ;;  %v4047_v2 = vmul.f32 %v5685_v28, %v6989_v45 }
 0x61d   : > { %v4046_v23 = vmul.f32 %v5687_v38, %v7224_v11 }
 0x61e   : > { %4111 = vst [vmem:[%s7012_s29 + $0x1d8] sm:$0xff] %v4047_v2 }
 0x61f   : > { %v5689_v7 = vpop.eup %5688  ;;  %4110 = vst [vmem:[%s7012_s29 + $0x1d0] sm:$0xff] %v4046_v23 }
 0x620   : > { %v5691_v4 = vpop.eup %5690  ;;  %v4049_v8 = vmul.f32 %v5689_v7, %v7225_v58 }
 0x621   : > { %v4048_v1 = vmul.f32 %v5691_v4, %v7226_v42 }
 0x622   : > { %4113 = vst [vmem:[%s7012_s29 + $0x1e8] sm:$0xff] %v4049_v8 }
 0x623   : > { %v5693_v5 = vpop.eup %5692  ;;  %4112 = vst [vmem:[%s7012_s29 + $0x1e0] sm:$0xff] %v4048_v1 }
 0x624   : > { %v5695_v35 = vpop.eup %5694  ;;  %v4051_v49 = vmul.f32 %v5693_v5, %v7227_v0 }
 0x625   : > { %v4050_v13 = vmul.f32 %v5695_v35, %v7228_v48 }
 0x626   : > { %4115 = vst [vmem:[%s7012_s29 + $0x1f8] sm:$0xff] %v4051_v49 }
 0x627   : > { %4114 = vst [vmem:[%s7012_s29 + $0x1f0] sm:$0xff] %v4050_v13 }
 0x628 PF: > { %s21_s17 = sadd.s32 1, %s5702_s17  }
 0x629   : > { %p18_p4 = scmp.ge.s32.totalorder %s21_s17, 4  }
 0x62b   :  { %20 = sbr.rel (!%p18_p4) target bundleno = 1 (0x1), region = 94 }

</bundles_post_ra>
